<compile_context>
chip_gen: v5e
topology: v5e:2x2
jax: 0.10.0
libtpu: 0.0.40
codegen_flags: <defaults>
</compile_context>

<pallas_src>
import jax
import jax.numpy as jnp
from jax.experimental import pallas as pl
from jax.experimental.pallas import tpu as pltpu


# --------------------------------------------------------------------------- utilities

def _round_up(x, m):
    return -(-x // m) * m


def _tpu_generation():
    try:
        kind = jax.devices()[0].device_kind.lower()
    except Exception:
        return "unknown"
    if "v7" in kind or "tpu7" in kind:
        return "v7x"
    if "v6" in kind:
        return "v6e"
    if "v5" in kind:
        return "v5e"
    return "unknown"


# Per-generation tiling / precision policy (review items 1, 2, 4, 5).
_GEN_CONFIG = {
    #           weight storage   per-call VMEM limit     budget for streamed blocks  TCs
    "v7x":     dict(weight_dtype="fp8",  vmem_limit_bytes=48 << 20, vmem_budget_bytes=28 << 20, num_cores=2),
    "v6e":     dict(weight_dtype="int8", vmem_limit_bytes=64 << 20, vmem_budget_bytes=48 << 20, num_cores=1),
    "v5e":     dict(weight_dtype="int8", vmem_limit_bytes=64 << 20, vmem_budget_bytes=48 << 20, num_cores=1),
    "unknown": dict(weight_dtype="bf16", vmem_limit_bytes=32 << 20, vmem_budget_bytes=20 << 20, num_cores=1),
}


def _choose_k_tiling(Ds, Dt, TB, B, Hc, cpad, w_itemsize, vmem_budget):
    """Smallest nk whose double-buffered streamed blocks + residents fit the VMEM budget."""
    max_nk = max(1, pl.cdiv(max(Ds, Dt), 128))
    for nk in range(1, max_nk + 1):
        tk_s = _round_up(pl.cdiv(Ds, nk), 128)
        tk_t = _round_up(pl.cdiv(Dt, nk), 128)
        need = 2 * (tk_s + tk_t) * Hc * w_itemsize          # double-buffered W1 chunks
        need += 2 * (TB * tk_s + B * tk_t) * 2              # double-buffered bf16 activation chunks
        need += (TB + B) * Hc * 4                           # f32 accumulators (scratch)
        need += 2 * (2 * Hc * cpad * 2 + 2 * Hc * 4)        # resident head + biases (upper bound)
        if need <= vmem_budget:
            return nk, tk_s, tk_t
    nk = max_nk
    return nk, _round_up(pl.cdiv(Ds, nk), 128), _round_up(pl.cdiv(Dt, nk), 128)


def _quantize_per_column(w, weight_dtype):
    """Quantize [K, hidden] weights per output column. Returns (q, dequant_scale[1, hidden])."""
    if weight_dtype == "bf16":
        return w.astype(jnp.bfloat16), jnp.ones((1, w.shape[1]), jnp.float32)
    amax = jnp.maximum(jnp.max(jnp.abs(w), axis=0, keepdims=True), 1e-30)
    if weight_dtype == "int8":
        scale = amax / 127.0
        q = jnp.clip(jnp.round(w / scale), -127.0, 127.0).astype(jnp.int8)
    elif weight_dtype == "fp8":
        scale = amax / 448.0                      # float8_e4m3fn max finite
        q = (w / scale).astype(jnp.float8_e4m3fn)
    else:
        raise ValueError(weight_dtype)
    return q, scale.astype(jnp.float32)


# --------------------------------------------------------------------------- kernel

def dual_stream_kernel(xs_ref, xt_ref, w1s_ref, w1t_ref, b1s_ref, b1t_ref,
                       w2_ref, out_ref, acc_s_ref, acc_t_ref):
    """Grid = (ncore, nk).
    axis 0 ("parallel"): hidden-half split -> feeds both v7x TensorCores (size 1 elsewhere).
    axis 1 ("arbitrary"): K-chunk streaming of the first-layer weights (reduction)."""
    k = pl.program_id(1)

    @pl.when(k == 0)
    def _():
        acc_s_ref[...] = jnp.zeros_like(acc_s_ref)
        acc_t_ref[...] = jnp.zeros_like(acc_t_ref)

    # First-layer partial products for this K chunk.  Weights are stored low precision
    # (int8 / fp8 / bf16); the widen-to-bf16 happens only on the streamed chunk, the MXU
    # accumulates in f32.  Per-column dequant scales are folded into b1 / w2 in the wrapper.
    acc_s_ref[...] += jnp.dot(xs_ref[...], w1s_ref[...].astype(jnp.bfloat16),
                              preferred_element_type=jnp.float32)       # [T*B, Hc]
    acc_t_ref[...] += jnp.dot(xt_ref[...], w1t_ref[...].astype(jnp.bfloat16),
                              preferred_element_type=jnp.float32)       # [B,   Hc]

    @pl.when(k == pl.num_programs(1) - 1)
    def _():
        TB, Hc = acc_s_ref.shape
        B = acc_t_ref.shape[0]
        T = TB // B

        # Bias (already divided by the dequant scale -> exact fold) + ReLU.
        hs = jnp.maximum(acc_s_ref[...] + b1s_ref[...], 0.0)            # [T*B, Hc]
        # Frame SUM via one reduce (rows are frame-major: row = t*B + b); the 1/T frame
        # mean is folded into the spatial head weights, so no explicit scale here.
        hs_sum = jnp.sum(hs.reshape(T, B, Hc), axis=0)                  # [B, Hc]
        ht = jnp.maximum(acc_t_ref[...] + b1t_ref[...], 0.0)            # [B, Hc]

        # Fused head: two tiny MXU matmuls (avoids a concat relayout).  w2 already carries
        # the 0.5 stream average, the 1/T frame mean and the dequant scales; the head bias
        # is added outside (after summing the per-core partials).
        out = jnp.dot(hs_sum.astype(jnp.bfloat16), w2_ref[0],
                      preferred_element_type=jnp.float32)
        out += jnp.dot(ht.astype(jnp.bfloat16), w2_ref[1],
                       preferred_element_type=jnp.float32)
        out_ref[...] = out[None, :, :].astype(out_ref.dtype)            # [1, B, CPAD]


# --------------------------------------------------------------------------- wrapper

def dual_stream_forward(spatial_input, temporal_input, params, *, weight_dtype="auto"):
    """spatial_input: [B, 3, T, H, W]; temporal_input: [B, 18, H, W] -> [B, num_classes]."""
    B, Cch, T, H, W = spatial_input.shape
    Ds = Cch * H * W
    Dt = temporal_input.shape[1] * H * W

    (w1s, b1s, w2s, b2s, w1t, b1t, w2t, b2t) = params
    hidden = w1s.shape[1]
    num_classes = w2s.shape[1]
    CPAD = _round_up(max(num_classes, 128), 128)          # lane-dense head / output tile

    gen = _tpu_generation()
    cfg = _GEN_CONFIG.get(gen, _GEN_CONFIG["unknown"])
    if weight_dtype == "auto":
        weight_dtype = cfg["weight_dtype"]

    # v7x: split the hidden dim across the two TensorCores -> each core streams only half
    # of W1 (~2x effective HBM BW).  Needs lane-aligned halves; no-op on 1-TC chips.
    ncore = 2 if (cfg["num_cores"] == 2 and hidden % 256 == 0) else 1
    Hc = hidden // ncore

    w_itemsize = {"int8": 1, "fp8": 1, "bf16": 2}[weight_dtype]
    nk, tk_s, tk_t = _choose_k_tiling(Ds, Dt, T * B, B, Hc, CPAD, w_itemsize,
                                      cfg["vmem_budget_bytes"])
    Ds_pad, Dt_pad = nk * tk_s, nk * tk_t

    # Activations: frame-major rows (row = t*B + b) so all T frames stack into the matmul M
    # dimension; K zero-padded to nk * tk (zeros contribute nothing to the accumulation).
    xs = jnp.transpose(spatial_input, (2, 0, 1, 3, 4)).reshape(T * B, Ds)
    xs = jnp.pad(xs, ((0, 0), (0, Ds_pad - Ds))).astype(jnp.bfloat16)
    xt = jnp.pad(temporal_input.reshape(B, Dt),
                 ((0, 0), (0, Dt_pad - Dt))).astype(jnp.bfloat16)

    # First-layer weights: zero-pad K, quantize per output column.
    w1s_q, s_s = _quantize_per_column(jnp.pad(w1s, ((0, Ds_pad - Ds), (0, 0))), weight_dtype)
    w1t_q, s_t = _quantize_per_column(jnp.pad(w1t, ((0, Dt_pad - Dt), (0, 0))), weight_dtype)

    # Fold dequant scales into the first-layer bias: ReLU(a*s + b) == s*ReLU(a + b/s), s > 0.
    b1s_f = (b1s.reshape(1, hidden) / s_s).astype(jnp.float32)
    b1t_f = (b1t.reshape(1, hidden) / s_t).astype(jnp.float32)

    # Fused head: stack the two heads; fold dequant scale, 0.5 stream average and 1/T frame
    # mean into the weights; classes padded to a lane-dense 128 multiple.
    pad_c = CPAD - num_classes
    w2s_f = (w2s * s_s.reshape(hidden, 1)) * (0.5 / T)
    w2t_f = (w2t * s_t.reshape(hidden, 1)) * 0.5
    w2 = jnp.stack([jnp.pad(w2s_f, ((0, 0), (0, pad_c))),
                    jnp.pad(w2t_f, ((0, 0), (0, pad_c)))], axis=0).astype(jnp.bfloat16)
    b2 = (0.5 * (b2s.reshape(1, num_classes) + b2t.reshape(1, num_classes))).astype(jnp.float32)

    # Advisory cost so XLA schedules around the custom call sensibly (kernel is mem-bound).
    flops = 2 * (T * B * Ds_pad + B * Dt_pad) * hidden + 4 * B * hidden * CPAD
    bytes_accessed = int(w1s_q.size * w_itemsize + w1t_q.size * w_itemsize
                         + (xs.size + xt.size + w2.size) * 2
                         + (b1s_f.size + b1t_f.size) * 4 + ncore * B * CPAD * 4)
    cost = pl.CostEstimate(flops=int(flops), transcendentals=0, bytes_accessed=bytes_accessed)

    out_parts = pl.pallas_call(
        dual_stream_kernel,
        out_shape=jax.ShapeDtypeStruct((ncore, B, CPAD), jnp.float32),
        grid_spec=pltpu.PrefetchScalarGridSpec(
            num_scalar_prefetch=0,
            grid=(ncore, nk),                                         # (core-split, K-stream)
            in_specs=[
                pl.BlockSpec((T * B, tk_s), lambda h, k: (0, k)),     # xs  K chunk
                pl.BlockSpec((B, tk_t), lambda h, k: (0, k)),         # xt  K chunk
                pl.BlockSpec((tk_s, Hc), lambda h, k: (k, h)),        # W1s K chunk (streamed)
                pl.BlockSpec((tk_t, Hc), lambda h, k: (k, h)),        # W1t K chunk (streamed)
                pl.BlockSpec((1, Hc), lambda h, k: (0, h)),           # b1s (K-resident)
                pl.BlockSpec((1, Hc), lambda h, k: (0, h)),           # b1t (K-resident)
                pl.BlockSpec((2, Hc, CPAD), lambda h, k: (0, h, 0)),  # fused head (K-resident)
            ],
            out_specs=pl.BlockSpec((1, B, CPAD), lambda h, k: (h, 0, 0)),
            scratch_shapes=[
                pltpu.VMEM((T * B, Hc), jnp.float32),                 # spatial pre-act accum
                pltpu.VMEM((B, Hc), jnp.float32),                     # temporal pre-act accum
            ],
        ),
        compiler_params=pltpu.CompilerParams(
            dimension_semantics=("parallel", "arbitrary"),
            vmem_limit_bytes=cfg["vmem_limit_bytes"],
        ),
        cost_estimate=cost,
    )(xs, xt, w1s_q, w1t_q, b1s_f, b1t_f, w2)

    return jnp.sum(out_parts, axis=0)[:, :num_classes] + b2


# --------------------------------------------------------------------------- reference

def reference_forward(spatial_input, temporal_input, params):
    """Pure-JAX f32 reference in the exact PyTorch op order (mean AFTER the head matmul)."""
    (w1s, b1s, w2s, b2s, w1t, b1t, w2t, b2t) = params
    B, _, T, H, W = spatial_input.shape
    x = jnp.transpose(spatial_input, (0, 2, 1, 3, 4)).reshape(B * T, -1)
    ys = jnp.maximum(x @ w1s + b1s, 0.0) @ w2s + b2s
    ys = ys.reshape(B, T, -1).mean(axis=1)
    xt = temporal_input.reshape(B, -1)
    yt = jnp.maximum(xt @ w1t + b1t, 0.0) @ w2t + b2t
    return (ys + yt) * 0.5


if __name__ == "__main__":
    B, T, H, W = 2, 4, 16, 16
    hidden, num_classes = 256, 10
    Ds, Dt = 3 * H * W, 18 * H * W

    key = jax.random.PRNGKey(0)
    ks = list(jax.random.split(key, 10))

    spatial_input = jax.random.normal(ks[0], (B, 3, T, H, W), jnp.float32)
    temporal_input = jax.random.normal(ks[1], (B, 18, H, W), jnp.float32)

    def init_w(k, shape, fan_in):
        return jax.random.normal(k, shape, jnp.float32) * (1.0 / jnp.sqrt(fan_in))

    # Deterministic synthetic sub-model parameters (biases kept 2-D for TPU-friendly layout).
    w1s = init_w(ks[2], (Ds, hidden), Ds)
    b1s = init_w(ks[3], (1, hidden), hidden)
    w2s = init_w(ks[4], (hidden, num_classes), hidden)
    b2s = init_w(ks[5], (1, num_classes), num_classes)
    w1t = init_w(ks[6], (Dt, hidden), Dt)
    b1t = init_w(ks[7], (1, hidden), hidden)
    w2t = init_w(ks[8], (hidden, num_classes), hidden)
    b2t = init_w(ks[9], (1, num_classes), num_classes)
    params = (w1s, b1s, w2s, b2s, w1t, b1t, w2t, b2t)

    ref = reference_forward(spatial_input, temporal_input, params)

    # Baseline precision path (bf16 weights) -- tight tolerance.
    out_bf16 = jax.block_until_ready(
        dual_stream_forward(spatial_input, temporal_input, params, weight_dtype="bf16"))
    assert out_bf16.shape == (B, num_classes)
    assert jnp.allclose(out_bf16, ref, atol=3e-2, rtol=3e-2), "bf16 path mismatch vs reference"

    # Per-chip auto path (int8 on v5e/v6e, fp8 on v7x, bf16 elsewhere) -- dtype-aware tolerance.
    gen = _tpu_generation()
    wdtype = _GEN_CONFIG.get(gen, _GEN_CONFIG["unknown"])["weight_dtype"]
    out = jax.block_until_ready(dual_stream_forward(spatial_input, temporal_input, params))
    assert out.shape == (B, num_classes)
    tol = {"bf16": 3e-2, "int8": 6e-2, "fp8": 1.5e-1}[wdtype]
    assert jnp.allclose(out, ref, atol=tol, rtol=tol), (
        f"quantized ({wdtype}) path mismatch vs reference")

    print("KERNEL_OK")
</pallas_src>

<mosaic_0001>
module attributes {stable_mosaic.version = 11 : i64} {
  func.func @dual_stream_kernel(%arg0: i32, %arg1: i32, %arg2: memref<8x768xbf16, #tpu.memory_space<vmem>>, %arg3: memref<2x4608xbf16, #tpu.memory_space<vmem>>, %arg4: memref<768x256xbf16, #tpu.memory_space<vmem>>, %arg5: memref<4608x256xbf16, #tpu.memory_space<vmem>>, %arg6: memref<1x256xf32, #tpu.memory_space<vmem>>, %arg7: memref<1x256xf32, #tpu.memory_space<vmem>>, %arg8: memref<2x256x128xbf16, #tpu.memory_space<vmem>>, %arg9: memref<1x2x128xf32, #tpu.memory_space<vmem>>, %arg10: memref<8x256xf32, #tpu.memory_space<vmem>>, %arg11: memref<2x256xf32, #tpu.memory_space<vmem>>) attributes {dimension_semantics = [#tpu.dimension_semantics<parallel>, #tpu.dimension_semantics<arbitrary>], iteration_bounds = array<i64: 1, 1>, scalar_prefetch = 0 : i64, scratch_operands = 2 : i64, tpu.core_type = #tpu.core_type<tc>, window_params = [{transform_indices = @transform_0, window_bounds = array<i64: 8, 768>}, {transform_indices = @transform_1, window_bounds = array<i64: 2, 4608>}, {transform_indices = @transform_2, window_bounds = array<i64: 768, 256>}, {transform_indices = @transform_3, window_bounds = array<i64: 4608, 256>}, {transform_indices = @transform_4, window_bounds = array<i64: 1, 256>}, {transform_indices = @transform_5, window_bounds = array<i64: 1, 256>}, {transform_indices = @transform_6, window_bounds = array<i64: 2, 256, 128>}, {transform_indices = @transform_7, window_bounds = array<i64: 1, 2, 128>}]} {
    %c0_i32 = arith.constant 0 : i32
    %0 = arith.cmpi eq, %arg1, %c0_i32 : i32
    %1 = arith.extui %0 : i1 to i32
    %c0_i32_0 = arith.constant 0 : i32
    %2 = arith.cmpi ne, %1, %c0_i32_0 : i32
    scf.if %2 {
      %cst_19 = arith.constant 0.000000e+00 : f32
      %18 = vector.broadcast %cst_19 : f32 to vector<8x256xf32>
      %c0_20 = arith.constant 0 : index
      %c0_21 = arith.constant 0 : index
      %19 = vector.load %arg10[%c0_20, %c0_21] : memref<8x256xf32, #tpu.memory_space<vmem>>, vector<8x256xf32>
      tpu.vector_store %arg10[%c0_20, %c0_21], %18 {strides = array<i32>} : memref<8x256xf32, #tpu.memory_space<vmem>>, vector<8x256xf32>,
      %cst_22 = arith.constant 0.000000e+00 : f32
      %20 = vector.broadcast %cst_22 : f32 to vector<2x256xf32>
      %c0_23 = arith.constant 0 : index
      %c0_24 = arith.constant 0 : index
      %21 = vector.load %arg11[%c0_23, %c0_24] : memref<2x256xf32, #tpu.memory_space<vmem>>, vector<2x256xf32>
      tpu.vector_store %arg11[%c0_23, %c0_24], %20 {strides = array<i32>} : memref<2x256xf32, #tpu.memory_space<vmem>>, vector<2x256xf32>,
    } else {
    }
    %c0 = arith.constant 0 : index
    %c0_1 = arith.constant 0 : index
    %3 = vector.load %arg10[%c0, %c0_1] : memref<8x256xf32, #tpu.memory_space<vmem>>, vector<8x256xf32>
    %c0_2 = arith.constant 0 : index
    %c0_3 = arith.constant 0 : index
    %4 = vector.load %arg2[%c0_2, %c0_3] : memref<8x768xbf16, #tpu.memory_space<vmem>>, vector<8x768xbf16>
    %c0_4 = arith.constant 0 : index
    %c0_5 = arith.constant 0 : index
    %5 = vector.load %arg4[%c0_4, %c0_5] : memref<768x256xbf16, #tpu.memory_space<vmem>>, vector<768x256xbf16>
    %cst = arith.constant dense<0.000000e+00> : vector<8x256xf32>
    %6 = tpu.matmul %4, %5, %cst {dimension_numbers = #tpu.dot_dimension_numbers<[1], [0], [0], [1], [0, 0, 1, 1], [], []>} : vector<8x768xbf16>, vector<768x256xbf16>, vector<8x256xf32> -> vector<8x256xf32>
    %7 = arith.addf %3, %6 : vector<8x256xf32>
    %c0_6 = arith.constant 0 : index
    %c0_7 = arith.constant 0 : index
    %8 = vector.load %arg10[%c0_6, %c0_7] : memref<8x256xf32, #tpu.memory_space<vmem>>, vector<8x256xf32>
    tpu.vector_store %arg10[%c0_6, %c0_7], %7 {strides = array<i32>} : memref<8x256xf32, #tpu.memory_space<vmem>>, vector<8x256xf32>,
    %c0_8 = arith.constant 0 : index
    %c0_9 = arith.constant 0 : index
    %9 = vector.load %arg11[%c0_8, %c0_9] : memref<2x256xf32, #tpu.memory_space<vmem>>, vector<2x256xf32>
    %c0_10 = arith.constant 0 : index
    %c0_11 = arith.constant 0 : index
    %10 = vector.load %arg3[%c0_10, %c0_11] : memref<2x4608xbf16, #tpu.memory_space<vmem>>, vector<2x4608xbf16>
    %c0_12 = arith.constant 0 : index
    %c0_13 = arith.constant 0 : index
    %11 = vector.load %arg5[%c0_12, %c0_13] : memref<4608x256xbf16, #tpu.memory_space<vmem>>, vector<4608x256xbf16>
    %cst_14 = arith.constant dense<0.000000e+00> : vector<2x256xf32>
    %12 = tpu.matmul %10, %11, %cst_14 {dimension_numbers = #tpu.dot_dimension_numbers<[1], [0], [0], [1], [0, 0, 1, 1], [], []>} : vector<2x4608xbf16>, vector<4608x256xbf16>, vector<2x256xf32> -> vector<2x256xf32>
    %13 = arith.addf %9, %12 : vector<2x256xf32>
    %c0_15 = arith.constant 0 : index
    %c0_16 = arith.constant 0 : index
    %14 = vector.load %arg11[%c0_15, %c0_16] : memref<2x256xf32, #tpu.memory_space<vmem>>, vector<2x256xf32>
    tpu.vector_store %arg11[%c0_15, %c0_16], %13 {strides = array<i32>} : memref<2x256xf32, #tpu.memory_space<vmem>>, vector<2x256xf32>,
    %c0_i32_17 = arith.constant 0 : i32
    %15 = arith.cmpi eq, %arg1, %c0_i32_17 : i32
    %16 = arith.extui %15 : i1 to i32
    %c0_i32_18 = arith.constant 0 : i32
    %17 = arith.cmpi ne, %16, %c0_i32_18 : i32
    scf.if %17 {
      %c0_19 = arith.constant 0 : index
      %c0_20 = arith.constant 0 : index
      %18 = vector.load %arg10[%c0_19, %c0_20] : memref<8x256xf32, #tpu.memory_space<vmem>>, vector<8x256xf32>
      %c0_21 = arith.constant 0 : index
      %c0_22 = arith.constant 0 : index
      %19 = vector.load %arg6[%c0_21, %c0_22] : memref<1x256xf32, #tpu.memory_space<vmem>>, vector<1x256xf32>
      %20 = vector.broadcast %19 : vector<1x256xf32> to vector<8x256xf32>
      %21 = arith.addf %18, %20 : vector<8x256xf32>
      %cst_23 = arith.constant 0.000000e+00 : f32
      %22 = vector.broadcast %cst_23 : f32 to vector<8x256xf32>
      %23 = arith.maximumf %21, %22 : vector<8x256xf32>
      %24 = vector.shape_cast %23 : vector<8x256xf32> to vector<4x2x256xf32>
      %cst_24 = arith.constant dense<0.000000e+00> : vector<2x256xf32>
      %25 = vector.multi_reduction <add>, %24, %cst_24 [0] : vector<4x2x256xf32> to vector<2x256xf32>
      %c0_25 = arith.constant 0 : index
      %c0_26 = arith.constant 0 : index
      %26 = vector.load %arg11[%c0_25, %c0_26] : memref<2x256xf32, #tpu.memory_space<vmem>>, vector<2x256xf32>
      %c0_27 = arith.constant 0 : index
      %c0_28 = arith.constant 0 : index
      %27 = vector.load %arg7[%c0_27, %c0_28] : memref<1x256xf32, #tpu.memory_space<vmem>>, vector<1x256xf32>
      %28 = vector.broadcast %27 : vector<1x256xf32> to vector<2x256xf32>
      %29 = arith.addf %26, %28 : vector<2x256xf32>
      %cst_29 = arith.constant 0.000000e+00 : f32
      %30 = vector.broadcast %cst_29 : f32 to vector<2x256xf32>
      %31 = arith.maximumf %29, %30 : vector<2x256xf32>
      %32 = arith.truncf %25 : vector<2x256xf32> to vector<2x256xbf16>
      %c0_30 = arith.constant 0 : index
      %c0_31 = arith.constant 0 : index
      %c0_32 = arith.constant 0 : index
      %33 = vector.load %arg8[%c0_30, %c0_31, %c0_32] : memref<2x256x128xbf16, #tpu.memory_space<vmem>>, vector<1x256x128xbf16>
      %34 = vector.shape_cast %33 : vector<1x256x128xbf16> to vector<256x128xbf16>
      %cst_33 = arith.constant dense<0.000000e+00> : vector<2x128xf32>
      %35 = tpu.matmul %32, %34, %cst_33 {dimension_numbers = #tpu.dot_dimension_numbers<[1], [0], [0], [1], [0, 0, 1, 1], [], []>} : vector<2x256xbf16>, vector<256x128xbf16>, vector<2x128xf32> -> vector<2x128xf32>
      %36 = arith.truncf %31 : vector<2x256xf32> to vector<2x256xbf16>
      %c1 = arith.constant 1 : index
      %c0_34 = arith.constant 0 : index
      %c0_35 = arith.constant 0 : index
      %37 = vector.load %arg8[%c1, %c0_34, %c0_35] : memref<2x256x128xbf16, #tpu.memory_space<vmem>>, vector<1x256x128xbf16>
      %38 = vector.shape_cast %37 : vector<1x256x128xbf16> to vector<256x128xbf16>
      %cst_36 = arith.constant dense<0.000000e+00> : vector<2x128xf32>
      %39 = tpu.matmul %36, %38, %cst_36 {dimension_numbers = #tpu.dot_dimension_numbers<[1], [0], [0], [1], [0, 0, 1, 1], [], []>} : vector<2x256xbf16>, vector<256x128xbf16>, vector<2x128xf32> -> vector<2x128xf32>
      %40 = arith.addf %35, %39 : vector<2x128xf32>
      %41 = vector.shape_cast %40 : vector<2x128xf32> to vector<1x2x128xf32>
      %c0_37 = arith.constant 0 : index
      %c0_38 = arith.constant 0 : index
      %c0_39 = arith.constant 0 : index
      %42 = vector.load %arg9[%c0_37, %c0_38, %c0_39] : memref<1x2x128xf32, #tpu.memory_space<vmem>>, vector<1x2x128xf32>
      tpu.vector_store %arg9[%c0_37, %c0_38, %c0_39], %41 {strides = array<i32>} : memref<1x2x128xf32, #tpu.memory_space<vmem>>, vector<1x2x128xf32>,
    } else {
    }
    return
  }
  func.func @transform_0(%arg0: i32, %arg1: i32) -> (i32, i32) {
    %c0_i32 = arith.constant 0 : i32
    %c0_i32_0 = arith.constant 0 : i32
    return %c0_i32, %arg1 : i32, i32
  }
  func.func @transform_1(%arg0: i32, %arg1: i32) -> (i32, i32) {
    %c0_i32 = arith.constant 0 : i32
    %c0_i32_0 = arith.constant 0 : i32
    return %c0_i32, %arg1 : i32, i32
  }
  func.func @transform_2(%arg0: i32, %arg1: i32) -> (i32, i32) {
    %c0_i32 = arith.constant 0 : i32
    return %arg1, %arg0 : i32, i32
  }
  func.func @transform_3(%arg0: i32, %arg1: i32) -> (i32, i32) {
    %c0_i32 = arith.constant 0 : i32
    return %arg1, %arg0 : i32, i32
  }
  func.func @transform_4(%arg0: i32, %arg1: i32) -> (i32, i32) {
    %c0_i32 = arith.constant 0 : i32
    %c0_i32_0 = arith.constant 0 : i32
    return %c0_i32, %arg0 : i32, i32
  }
  func.func @transform_5(%arg0: i32, %arg1: i32) -> (i32, i32) {
    %c0_i32 = arith.constant 0 : i32
    %c0_i32_0 = arith.constant 0 : i32
    return %c0_i32, %arg0 : i32, i32
  }
  func.func @transform_6(%arg0: i32, %arg1: i32) -> (i32, i32, i32) {
    %c0_i32 = arith.constant 0 : i32
    %c0_i32_0 = arith.constant 0 : i32
    %c0_i32_1 = arith.constant 0 : i32
    return %c0_i32, %arg0, %c0_i32_0 : i32, i32, i32
  }
  func.func @transform_7(%arg0: i32, %arg1: i32) -> (i32, i32, i32) {
    %c0_i32 = arith.constant 0 : i32
    %c0_i32_0 = arith.constant 0 : i32
    %c0_i32_1 = arith.constant 0 : i32
    return %arg0, %c0_i32, %c0_i32_0 : i32, i32, i32
  }
}

</mosaic_0001>

<bundles_post_ra>
// kernel: tpu_custom_call.1
= control target key start
LH: loop header
LB: loop body
LE: loop exit
PB: predicated region body
PF: predicated region fallthrough
CT: control target
= control target key end

     0   :  { %12 = vsyncpa [#allocation5], 0  ;;  %s9880_s0 = inlined_call_operand.hbm [shape: bf16[8,768], index: 0, kind: input, shape index: {}]   ;;  %s9881_s1 = inlined_call_operand.hbm [shape: bf16[2,4608], index: 1, kind: input, shape index: {}]   ;;  %s9882_s2 = inlined_call_operand.hbm [shape: bf16[768,256], index: 2, kind: input, shape index: {}]   ;;  %s9883_s3 = inlined_call_operand.hbm [shape: bf16[4608,256], index: 3, kind: input, shape index: {}]   ;;  %s9884_s4 = inlined_call_operand.hbm [shape: f32[1,256], index: 4, kind: input, shape index: {}]   ;;  %s9885_s5 = inlined_call_operand.hbm [shape: f32[1,256], index: 5, kind: input, shape index: {}]   ;;  %s9886_s6 = inlined_call_operand.hbm [shape: bf16[2,256,128], index: 6, kind: input, shape index: {}]   ;;  %s9887_s7 = inlined_call_operand.hbm [shape: f32[1,2,128], index: 7, kind: output, shape index: {}]  }
   0x1   :  { %13 = vsyncpa [#allocation8], 0 }
   0x2   :  { %14 = vsyncpa [#allocation11], 0 }
   0x3   :  { %15 = vsyncpa [#allocation14], 0  ;;  %s33_s26 = sshll.u32 %s9881_s1, 4  ;;  %s34_s26 = int_to_ptr.hbm [resolvable:$true] %s33_s26 }
   0x4   :  { %16 = vsyncpa [#allocation6], 0  ;;  %s9533_s27 = smov [#allocation7]   ;;  %s56_s8 = sshll.u32 %s9883_s3, 4  ;;  %s57_s8 = int_to_ptr.hbm [resolvable:$true] %s56_s8 }
   0x5   :  { %s35_s28 = sshll.u32 %s9533_s27, 4  ;;  %s9534_s9 = smov [#allocation10]   ;;  %s36_s28 = int_to_ptr.vmem [resolvable:$true] %s35_s28 }
   0x6   :  { %38 = dma.hbm_to_vmem [thread:$0]  %s34_s26, 576, %s36_s28, [#allocation8]  }
   0x7   :  { %s58_s10 = sshll.u32 %s9534_s9, 4  ;;  %s81_s13 = sshll.u32 %s9885_s5, 4  ;;  %s59_s10 = int_to_ptr.vmem [resolvable:$true] %s58_s10  ;;  %s82_s13 = int_to_ptr.hbm [resolvable:$true] %s81_s13 }
   0x8   :  { %s9535_s1 = smov 128   ;;  %s9536_s14 = smov 8  }
   0x9   :  { %64 = dma.hbm_to_vmem [thread:$0]  %s57_s8, 73728, %s59_s10, [#allocation11], %s9535_s1, %s9535_s1, %s9536_s14  }
   0xa   :  { %s22_s17 = sshll.u32 %s9880_s0, 4  ;;  %s9537_s18 = smov [#allocation13]   ;;  %s23_s17 = int_to_ptr.hbm [resolvable:$true] %s22_s17 }
   0xb   :  { %s83_s19 = sshll.u32 %s9537_s18, 4  ;;  %s9538_s3 = smov [#allocation4]   ;;  %s84_s19 = int_to_ptr.vmem [resolvable:$true] %s83_s19 }
   0xc   :  { %86 = dma.hbm_to_vmem [thread:$0]  %s82_s13, 32, %s84_s19, [#allocation14]  }
   0xd   :  { %s24_s20 = sshll.u32 %s9538_s3, 4  ;;  %s43_s5 = sshll.u32 %s9882_s2, 4  ;;  %s25_s20 = int_to_ptr.vmem [resolvable:$true] %s24_s20  ;;  %s44_s5 = int_to_ptr.hbm [resolvable:$true] %s43_s5 }
   0xe   :  { %27 = dma.hbm_to_vmem [thread:$0]  %s23_s17, 384, %s25_s20, [#allocation5]  }
   0xf   :  { %s70_s25 = sshll.u32 %s9884_s4, 4  ;;  %s9539_s26 = smov [#allocation9]   ;;  %s71_s25 = int_to_ptr.hbm [resolvable:$true] %s70_s25 }
  0x10   :  { %s45_s0 = sshll.u32 %s9539_s26, 4  ;;  %s9540_s27 = smov [#allocation12]   ;;  %s46_s0 = int_to_ptr.vmem [resolvable:$true] %s45_s0 }
  0x11   :  { %51 = dma.hbm_to_vmem [thread:$0]  %s44_s5, 12288, %s46_s0, [#allocation8], %s9535_s1, %s9535_s1, %s9536_s14  }
  0x12   :  { %s72_s28 = sshll.u32 %s9540_s27, 4  ;;  %s91_s8 = sshll.u32 %s9886_s6, 4  ;;  %s73_s28 = int_to_ptr.vmem [resolvable:$true] %s72_s28  ;;  %s92_s8 = int_to_ptr.hbm [resolvable:$true] %s91_s8 }
  0x13   :  { %75 = dma.hbm_to_vmem [thread:$0]  %s71_s25, 32, %s73_s28, [#allocation11]  }
  0x14   :  { %s9541_s2 = smov [#allocation15]   ;;  %s9542_s10 = smov 64  }
  0x15   :  { %s93_s9 = sshll.u32 %s9541_s2, 4  ;;  %s9543_s11 = smov 4   ;;  %s94_s9 = int_to_ptr.vmem [resolvable:$true] %s93_s9 }
  0x16   :  { %99 = dma.hbm_to_vmem [thread:$0]  %s92_s8, 4096, %s94_s9, [#allocation14], %s9542_s10, %s9542_s10, %s9543_s11  }
  0x17   :  { %9523 = dma.done.wait [#allocation5], 384  }
  0x18   :  { %9524 = vsyncadd [#allocation5], 4294966912 }
  0x19   :  { %9525 = dma.done.wait [#allocation8], 12864  }
  0x1a   :  { %9526 = vsyncadd [#allocation8], 4294954432 }
  0x1b   :  { %9527 = dma.done.wait [#allocation11], 73760  }
  0x1c   :  { %9528 = vsyncadd [#allocation11], 4294893536 }
  0x1d   :  { %9529 = dma.done.wait [#allocation14], 4128  }
  0x1e   :  { %9530 = vsyncadd [#allocation14], 4294963168  ;;  %v5856_v0 = vld [vmem:[#allocation9 + $0x70] sm:$0xf]  ;;  %v8629_v1 = vld [vmem:[#allocation9 + $0x74] sm:$0xf0] }
  0x1f   :  { %v5920_v2 = vld [vmem:[#allocation9 + $0xf0] sm:$0xf]  ;;  %v5857_v3 = vor.u32 %v8629_v1, %v5856_v0  ;;  %v8645_v4 = vld [vmem:[#allocation9 + $0xf4] sm:$0xf0]  ;;  %v5848_v11 = vld [vmem:[#allocation9 + $0x60] sm:$0xf] }
  0x20   :  { %v5984_v5 = vld [vmem:[#allocation9 + $0x170] sm:$0xf]  ;;  %v8661_v6 = vld [vmem:[#allocation9 + $0x174] sm:$0xf0]  ;;  %v5921_v7 = vor.u32 %v8645_v4, %v5920_v2  ;;  %v8627_v13 = vld [vmem:[#allocation9 + $0x64] sm:$0xf0] }
  0x21   :  { %v5985_v8 = vor.u32 %v8661_v6, %v5984_v5  ;;  %v6048_v9 = vld [vmem:[#allocation9 + $0x1f0] sm:$0xf]  ;;  %v8677_v10 = vld [vmem:[#allocation9 + $0x1f4] sm:$0xf0]  ;;  %737 = vmatpush.bf16.msra.mxu0 %v5857_v3  ;;  %v5912_v14 = vld [vmem:[#allocation9 + $0xe0] sm:$0xf]  ;;  %v5849_v16 = vor.u32 %v8627_v13, %v5848_v11 }
  0x22   :  { %v6049_v12 = vor.u32 %v8677_v10, %v6048_v9  ;;  %v8643_v15 = vld [vmem:[#allocation9 + $0xe4] sm:$0xf0]  ;;  %750 = vmatpush.bf16.msra.mxu1 %v5921_v7  ;;  %v5976_v18 = vld [vmem:[#allocation9 + $0x160] sm:$0xf]  ;;  %v5840_v23 = vld [vmem:[#allocation9 + $0x50] sm:$0xf] }
  0x23   :  { %763 = vmatpush.bf16.msra.mxu2 %v5985_v8  ;;  %v5913_v17 = vor.u32 %v8643_v15, %v5912_v14  ;;  %v8659_v19 = vld [vmem:[#allocation9 + $0x164] sm:$0xf0]  ;;  %v6040_v20 = vld [vmem:[#allocation9 + $0x1e0] sm:$0xf]  ;;  %v8625_v24 = vld [vmem:[#allocation9 + $0x54] sm:$0xf0] }
  0x24   :  { %776 = vmatpush.bf16.msra.mxu3 %v6049_v12  ;;  %v5977_v21 = vor.u32 %v8659_v19, %v5976_v18  ;;  %v8675_v22 = vld [vmem:[#allocation9 + $0x1e4] sm:$0xf0]  ;;  %v5904_v26 = vld [vmem:[#allocation9 + $0xd0] sm:$0xf]  ;;  %v8641_v27 = vld [vmem:[#allocation9 + $0xd4] sm:$0xf0]  ;;  %v5841_v29 = vor.u32 %v8625_v24, %v5840_v23 }
  0x25   :  { %v6041_v25 = vor.u32 %v8675_v22, %v6040_v20  ;;  %v5968_v28 = vld [vmem:[#allocation9 + $0x150] sm:$0xf]  ;;  %738 = vmatpush.bf16.msra.mxu0 %v5849_v16  ;;  %v8657_v30 = vld [vmem:[#allocation9 + $0x154] sm:$0xf0]  ;;  %v5905_v33 = vor.u32 %v8641_v27, %v5904_v26  ;;  %v5832_v35 = vld [vmem:[#allocation9 + $0x40] sm:$0xf] }
  0x26   :  { %v6032_v31 = vld [vmem:[#allocation9 + $0x1d0] sm:$0xf]  ;;  %v8673_v32 = vld [vmem:[#allocation9 + $0x1d4] sm:$0xf0]  ;;  %751 = vmatpush.bf16.msra.mxu1 %v5913_v17  ;;  %v5969_v34 = vor.u32 %v8657_v30, %v5968_v28  ;;  %v8623_v36 = vld [vmem:[#allocation9 + $0x44] sm:$0xf0] }
  0x27   :  { %764 = vmatpush.bf16.msra.mxu2 %v5977_v21  ;;  %v5896_v37 = vld [vmem:[#allocation9 + $0xc0] sm:$0xf]  ;;  %v6033_v38 = vor.u32 %v8673_v32, %v6032_v31  ;;  %v8639_v39 = vld [vmem:[#allocation9 + $0xc4] sm:$0xf0]  ;;  %v5833_v44 = vor.u32 %v8623_v36, %v5832_v35  ;;  %v5824_v47 = vld [vmem:[#allocation9 + $0x30] sm:$0xf] }
  0x28   :  { %777 = vmatpush.bf16.msra.mxu3 %v6041_v25  ;;  %v5960_v40 = vld [vmem:[#allocation9 + $0x140] sm:$0xf]  ;;  %v8655_v41 = vld [vmem:[#allocation9 + $0x144] sm:$0xf0]  ;;  %v5897_v45 = vor.u32 %v8639_v39, %v5896_v37  ;;  %v8621_v48 = vld [vmem:[#allocation9 + $0x34] sm:$0xf0] }
  0x29   :  { %v6024_v42 = vld [vmem:[#allocation9 + $0x1c0] sm:$0xf]  ;;  %v8671_v43 = vld [vmem:[#allocation9 + $0x1c4] sm:$0xf0]  ;;  %739 = vmatpush.bf16.msra.mxu0 %v5841_v29  ;;  %v5961_v46 = vor.u32 %v8655_v41, %v5960_v40  ;;  %v5888_v49 = vld [vmem:[#allocation9 + $0xb0] sm:$0xf]  ;;  %v5825_v56 = vor.u32 %v8621_v48, %v5824_v47 }
  0x2a   :  { %752 = vmatpush.bf16.msra.mxu1 %v5905_v33  ;;  %v6025_v50 = vor.u32 %v8671_v43, %v6024_v42  ;;  %v8637_v51 = vld [vmem:[#allocation9 + $0xb4] sm:$0xf0]  ;;  %v5952_v52 = vld [vmem:[#allocation9 + $0x130] sm:$0xf]  ;;  %v5816_v59 = vld [vmem:[#allocation9 + $0x20] sm:$0xf] }
  0x2b   :  { %765 = vmatpush.bf16.msra.mxu2 %v5969_v34  ;;  %v8653_v53 = vld [vmem:[#allocation9 + $0x134] sm:$0xf0]  ;;  %v6016_v54 = vld [vmem:[#allocation9 + $0x1b0] sm:$0xf]  ;;  %v5889_v57 = vor.u32 %v8637_v51, %v5888_v49  ;;  %v8619_v60 = vld [vmem:[#allocation9 + $0x24] sm:$0xf0] }
  0x2c   :  { %778 = vmatpush.bf16.msra.mxu3 %v6033_v38  ;;  %v8669_v55 = vld [vmem:[#allocation9 + $0x1b4] sm:$0xf0]  ;;  %v5953_v58 = vor.u32 %v8653_v53, %v5952_v52  ;;  %v5880_v61 = vld [vmem:[#allocation9 + $0xa0] sm:$0xf]  ;;  %v8635_v63 = vld [vmem:[#allocation9 + $0xa4] sm:$0xf0]  ;;  %v5817_v4 = vor.u32 %v8619_v60, %v5816_v59 }
  0x2d   :  { %740 = vmatpush.bf16.msra.mxu0 %v5833_v44  ;;  %v6017_v62 = vor.u32 %v8669_v55, %v6016_v54  ;;  %v5944_v0 = vld [vmem:[#allocation9 + $0x120] sm:$0xf]  ;;  %v8651_v1 = vld [vmem:[#allocation9 + $0x124] sm:$0xf0]  ;;  %v5881_v5 = vor.u32 %v8635_v63, %v5880_v61  ;;  %v5808_v7 = vld [vmem:[#allocation9 + $0x10] sm:$0xf] }
  0x2e   :  { %753 = vmatpush.bf16.msra.mxu1 %v5897_v45  ;;  %v6008_v2 = vld [vmem:[#allocation9 + $0x1a0] sm:$0xf]  ;;  %v8667_v3 = vld [vmem:[#allocation9 + $0x1a4] sm:$0xf0]  ;;  %v5945_v6 = vor.u32 %v8651_v1, %v5944_v0  ;;  %v8617_v8 = vld [vmem:[#allocation9 + $0x14] sm:$0xf0] }
  0x2f   :  { %766 = vmatpush.bf16.msra.mxu2 %v5961_v46  ;;  %v5872_v9 = vld [vmem:[#allocation9 + $0x90] sm:$0xf]  ;;  %v6009_v10 = vor.u32 %v8667_v3, %v6008_v2  ;;  %v8633_v11 = vld [vmem:[#allocation9 + $0x94] sm:$0xf0]  ;;  %v5809_v16 = vor.u32 %v8617_v8, %v5808_v7  ;;  %v5800_v17 = vld [vmem:[#allocation9] sm:$0xf] }
  0x30   :  { %779 = vmatpush.bf16.msra.mxu3 %v6025_v50  ;;  %v5936_v12 = vld [vmem:[#allocation9 + $0x110] sm:$0xf]  ;;  %v8649_v13 = vld [vmem:[#allocation9 + $0x114] sm:$0xf0]  ;;  %v8615_v18 = vld [vmem:[#allocation9 + $0x4] sm:$0xf0]  ;;  %v5873_v19 = vor.u32 %v8633_v11, %v5872_v9 }
  0x31   :  { %741 = vmatpush.bf16.msra.mxu0 %v5825_v56  ;;  %v6000_v14 = vld [vmem:[#allocation9 + $0x190] sm:$0xf]  ;;  %v8665_v15 = vld [vmem:[#allocation9 + $0x194] sm:$0xf0]  ;;  %v5937_v20 = vor.u32 %v8649_v13, %v5936_v12  ;;  %v5864_v21 = vld [vmem:[#allocation9 + $0x80] sm:$0xf]  ;;  %v5801_v31 = vor.u32 %v8615_v18, %v5800_v17 }
  0x32   :  { %754 = vmatpush.bf16.msra.mxu1 %v5889_v57  ;;  %v8631_v22 = vld [vmem:[#allocation9 + $0x84] sm:$0xf0]  ;;  %v5928_v23 = vld [vmem:[#allocation9 + $0x100] sm:$0xf]  ;;  %v6001_v24 = vor.u32 %v8665_v15, %v6000_v14  ;;  %v6112_v28 = vld [vmem:[#allocation9 + $0x270] sm:$0xf] }
  0x33   :  { %767 = vmatpush.bf16.msra.mxu2 %v5953_v58  ;;  %v8647_v25 = vld [vmem:[#allocation9 + $0x104] sm:$0xf0]  ;;  %v5992_v26 = vld [vmem:[#allocation9 + $0x180] sm:$0xf]  ;;  %v8693_v29 = vld [vmem:[#allocation9 + $0x274] sm:$0xf0]  ;;  %v5865_v35 = vor.u32 %v8631_v22, %v5864_v21 }
  0x34   :  { %780 = vmatpush.bf16.msra.mxu3 %v6017_v62  ;;  %v8663_v27 = vld [vmem:[#allocation9 + $0x184] sm:$0xf0]  ;;  %v6176_v30 = vld [vmem:[#allocation9 + $0x2f0] sm:$0xf]  ;;  %v8709_v32 = vld [vmem:[#allocation9 + $0x2f4] sm:$0xf0]  ;;  %v5929_v36 = vor.u32 %v8647_v25, %v5928_v23  ;;  %v6113_v40 = vor.u32 %v8693_v29, %v6112_v28 }
  0x35   :  { %742 = vmatpush.bf16.msra.mxu0 %v5817_v4  ;;  %v8628_v33 = vld [vmem:[#allocation9 + $0x74] sm:$0xf]  ;;  %v5858_v34 = vld [vmem:[#allocation9 + $0x78] sm:$0xf0]  ;;  %v5993_v39 = vor.u32 %v8663_v27, %v5992_v26  ;;  %v6177_v41 = vor.u32 %v8709_v32, %v6176_v30  ;;  %v6104_v43 = vld [vmem:[#allocation9 + $0x260] sm:$0xf] }
  0x36   :  { %755 = vmatpush.bf16.msra.mxu1 %v5881_v5  ;;  %v8644_v37 = vld [vmem:[#allocation9 + $0xf4] sm:$0xf]  ;;  %v5922_v38 = vld [vmem:[#allocation9 + $0xf8] sm:$0xf0]  ;;  %v5861_v42 = vor.u32 %v8628_v33, %v5858_v34  ;;  %v8691_v44 = vld [vmem:[#allocation9 + $0x264] sm:$0xf0] }
  0x37   :  { %768 = vmatpush.bf16.msra.mxu2 %v5945_v6  ;;  %v6168_v45 = vld [vmem:[#allocation9 + $0x2e0] sm:$0xf]  ;;  %v5925_v46 = vor.u32 %v8644_v37, %v5922_v38  ;;  %v8707_v47 = vld [vmem:[#allocation9 + $0x2e4] sm:$0xf0]  ;;  %v8626_v48 = vld [vmem:[#allocation9 + $0x64] sm:$0xf]  ;;  %v6105_v52 = vor.u32 %v8691_v44, %v6104_v43 }
  0x38   :  { %781 = vmatpush.bf16.msra.mxu3 %v6009_v10  ;;  %v5850_v49 = vld [vmem:[#allocation9 + $0x68] sm:$0xf0]  ;;  %v8642_v50 = vld [vmem:[#allocation9 + $0xe4] sm:$0xf]  ;;  %v6096_v53 = vld [vmem:[#allocation9 + $0x250] sm:$0xf]  ;;  %v6169_v54 = vor.u32 %v8707_v47, %v6168_v45 }
  0x39   :  { %743 = vmatpush.bf16.msra.mxu0 %v5809_v16  ;;  %v5914_v51 = vld [vmem:[#allocation9 + $0xe8] sm:$0xf0]  ;;  %v5853_v55 = vor.u32 %v8626_v48, %v5850_v49  ;;  %v8689_v56 = vld [vmem:[#allocation9 + $0x254] sm:$0xf0]  ;;  %v6160_v57 = vld [vmem:[#allocation9 + $0x2d0] sm:$0xf] }
  0x3a   :  { %756 = vmatpush.bf16.msra.mxu1 %v5873_v19  ;;  %v8705_v58 = vld [vmem:[#allocation9 + $0x2d4] sm:$0xf0]  ;;  %v5917_v59 = vor.u32 %v8642_v50, %v5914_v51  ;;  %v8624_v60 = vld [vmem:[#allocation9 + $0x54] sm:$0xf]  ;;  %v5842_v61 = vld [vmem:[#allocation9 + $0x58] sm:$0xf0]  ;;  %v6097_v0 = vor.u32 %v8689_v56, %v6096_v53 }
  0x3b   :  { %769 = vmatpush.bf16.msra.mxu2 %v5937_v20  ;;  %v8640_v62 = vld [vmem:[#allocation9 + $0xd4] sm:$0xf]  ;;  %v5906_v63 = vld [vmem:[#allocation9 + $0xd8] sm:$0xf0]  ;;  %v6161_v1 = vor.u32 %v8705_v58, %v6160_v57  ;;  %v137_v2 = vld [vmem:[#allocation4] sm:$0xff]  ;;  %v5845_v4 = vor.u32 %v8624_v60, %v5842_v61  ;;  %vm5404_vm0 = vcmask 1043458  }
  0x3c   :  { %782 = vmatpush.bf16.msra.mxu3 %v6001_v24  ;;  %v138_v3 = vld [vmem:[#allocation4 + $0x8] sm:$0xff]  ;;  %v6088_v5 = vld [vmem:[#allocation9 + $0x240] sm:$0xf]  ;;  %v8687_v6 = vld [vmem:[#allocation9 + $0x244] sm:$0xf0]  ;;  %v239_v8 = vunpack.c.l.b16 %v137_v2  ;;  %v240_v10 = vunpack.c.h.b16 %v137_v2  ;;  %v5909_v11 = vor.u32 %v8640_v62, %v5906_v63  ;;  %vm5380_vm1 = vcmask 1041408  }
  0x3d   :  { %744 = vmatpush.bf16.msra.mxu0 %v5801_v31  ;;  %v6152_v7 = vld [vmem:[#allocation9 + $0x2c0] sm:$0xf]  ;;  %v241_v9 = vunpack.c.l.b16 %v138_v3  ;;  %v8703_v12 = vld [vmem:[#allocation9 + $0x2c4] sm:$0xf0]  ;;  %v8622_v13 = vld [vmem:[#allocation9 + $0x44] sm:$0xf]  ;;  %v242_v15 = vunpack.c.h.b16 %v138_v3  ;;  %v6089_v21 = vor.u32 %v8687_v6, %v6088_v5 }
  0x3e   :  { %757 = vmatpush.bf16.msra.mxu1 %v5865_v35  ;;  %v5834_v14 = vld [vmem:[#allocation9 + $0x48] sm:$0xf0]  ;;  %v8638_v16 = vld [vmem:[#allocation9 + $0xc4] sm:$0xf]  ;;  %v9607_v18 = vpack.c.b16 %v239_v8, %v239_v8  ;;  %v9611_v20 = vpack.c.b16 %v240_v10, %v240_v10  ;;  %v6153_v23 = vor.u32 %v8703_v12, %v6152_v7  ;;  %v6080_v25 = vld [vmem:[#allocation9 + $0x230] sm:$0xf] }
  0x3f   :  { %770 = vmatpush.bf16.msra.mxu2 %v5929_v36  ;;  %v5898_v17 = vld [vmem:[#allocation9 + $0xc8] sm:$0xf0]  ;;  %v9609_v19 = vpack.c.b16 %v241_v9, %v241_v9  ;;  %v9613_v22 = vpack.c.b16 %v242_v15, %v242_v15  ;;  %v5837_v24 = vor.u32 %v8622_v13, %v5834_v14  ;;  %v8685_v26 = vld [vmem:[#allocation9 + $0x234] sm:$0xf0]  ;;  %v6144_v27 = vld [vmem:[#allocation9 + $0x2b0] sm:$0xf] }
  0x40   :  { %783 = vmatpush.bf16.msra.mxu3 %v5993_v39  ;;  %v5901_v28 = vor.u32 %v8638_v16, %v5898_v17  ;;  %v8701_v29 = vld [vmem:[#allocation9 + $0x2b4] sm:$0xf0]  ;;  %v8620_v30 = vld [vmem:[#allocation9 + $0x34] sm:$0xf]  ;;  %v5826_v31 = vld [vmem:[#allocation9 + $0x38] sm:$0xf0]  ;;  %745 = vmatmul.bf16.vlgmr.msra.gmra.mxu0 %v9607_v18  ;;  %v6081_v34 = vor.u32 %v8685_v26, %v6080_v25 }
  0x41   :  { %789 = vmatpush.bf16.msrb.mxu0 %v6113_v40  ;;  %v8636_v32 = vld [vmem:[#allocation9 + $0xb4] sm:$0xf]  ;;  %v5890_v33 = vld [vmem:[#allocation9 + $0xb8] sm:$0xf0]  ;;  %758 = vmatmul.bf16.vlgmr.msra.gmra.mxu1 %v9611_v20  ;;  %v6145_v35 = vor.u32 %v8701_v29, %v6144_v27  ;;  %v5829_v36 = vor.u32 %v8620_v30, %v5826_v31  ;;  %v6072_v37 = vld [vmem:[#allocation9 + $0x220] sm:$0xf] }
  0x42   :  { %802 = vmatpush.bf16.msrb.mxu1 %v6177_v41  ;;  %771 = vmatmul.bf16.vlgmr.msra.gmra.mxu2 %v9609_v19  ;;  %v8683_v38 = vld [vmem:[#allocation9 + $0x224] sm:$0xf0]  ;;  %v6136_v39 = vld [vmem:[#allocation9 + $0x2a0] sm:$0xf]  ;;  %v5893_v40 = vor.u32 %v8636_v32, %v5890_v33  ;;  %v5818_v43 = vld [vmem:[#allocation9 + $0x28] sm:$0xf0] }
  0x43   :  { %815 = vmatpush.bf16.msrb.mxu2 %v5861_v42  ;;  %784 = vmatmul.bf16.vlgmr.msra.gmra.mxu3 %v9613_v22  ;;  %v8699_v41 = vld [vmem:[#allocation9 + $0x2a4] sm:$0xf0]  ;;  %v8618_v42 = vld [vmem:[#allocation9 + $0x24] sm:$0xf]  ;;  %v5882_v45 = vld [vmem:[#allocation9 + $0xa8] sm:$0xf0] }
  0x44   :  { %828 = vmatpush.bf16.msrb.mxu3 %v5925_v46  ;;  %v8634_v44 = vld [vmem:[#allocation9 + $0xa4] sm:$0xf]  ;;  %v6073_v46 = vor.u32 %v8683_v38, %v6072_v37  ;;  %v6137_v47 = vor.u32 %v8699_v41, %v6136_v39  ;;  %v5821_v48 = vor.u32 %v8618_v42, %v5818_v43  ;;  %v6064_v49 = vld [vmem:[#allocation9 + $0x210] sm:$0xf]  ;;  %v8681_v50 = vld [vmem:[#allocation9 + $0x214] sm:$0xf0] }
  0x45   :  { %790 = vmatpush.bf16.msrb.mxu0 %v6105_v52  ;;  %v6128_v51 = vld [vmem:[#allocation9 + $0x290] sm:$0xf]  ;;  %v5885_v52 = vor.u32 %v8634_v44, %v5882_v45  ;;  %v8697_v53 = vld [vmem:[#allocation9 + $0x294] sm:$0xf0]  ;;  %v8632_v56 = vld [vmem:[#allocation9 + $0x94] sm:$0xf]  ;;  %v6065_v58 = vor.u32 %v8681_v50, %v6064_v49 }
  0x46   :  { %803 = vmatpush.bf16.msrb.mxu1 %v6169_v54  ;;  %v8616_v54 = vld [vmem:[#allocation9 + $0x14] sm:$0xf]  ;;  %v5874_v57 = vld [vmem:[#allocation9 + $0x98] sm:$0xf0]  ;;  %v8679_v60 = vld [vmem:[#allocation9 + $0x204] sm:$0xf0]  ;;  %v6129_v62 = vor.u32 %v8697_v53, %v6128_v51 }
  0x47   :  { %816 = vmatpush.bf16.msrb.mxu2 %v5853_v55  ;;  %v5810_v55 = vld [vmem:[#allocation9 + $0x18] sm:$0xf0]  ;;  %v6120_v61 = vld [vmem:[#allocation9 + $0x280] sm:$0xf]  ;;  %v139_v2 = vld [vmem:[#allocation4 + $0x10] sm:$0xff]  ;;  %v5877_v3 = vor.u32 %v8632_v56, %v5874_v57  ;;  %vm5407_vm2 = vcmask 1045508  }
  0x48   :  { %829 = vmatpush.bf16.msrb.mxu3 %v5917_v59  ;;  %v6056_v59 = vld [vmem:[#allocation9 + $0x200] sm:$0xf]  ;;  %v5813_v63 = vor.u32 %v8616_v54, %v5810_v55  ;;  %v8630_v5 = vld [vmem:[#allocation9 + $0x84] sm:$0xf]  ;;  %v5866_v6 = vld [vmem:[#allocation9 + $0x88] sm:$0xf0]  ;;  %v243_v14 = vunpack.c.l.b16 %v139_v2 }
  0x49   :  { %791 = vmatpush.bf16.msrb.mxu0 %v6097_v0  ;;  %v8695_v0 = vld [vmem:[#allocation9 + $0x284] sm:$0xf0]  ;;  %v8660_v7 = vld [vmem:[#allocation9 + $0x174] sm:$0xf]  ;;  %v5986_v8 = vld [vmem:[#allocation9 + $0x178] sm:$0xf0]  ;;  %v6057_v10 = vor.u32 %v8679_v60, %v6056_v59 }
  0x4a   :  { %804 = vmatpush.bf16.msrb.mxu1 %v6161_v1  ;;  %v8614_v1 = vld [vmem:[#allocation9 + $0x4] sm:$0xf]  ;;  %v8676_v9 = vld [vmem:[#allocation9 + $0x1f4] sm:$0xf]  ;;  %v6114_v13 = vld [vmem:[#allocation9 + $0x278] sm:$0xf0]  ;;  %v6121_v15 = vor.u32 %v8695_v0, %v6120_v61  ;;  %v5989_v25 = vor.u32 %v8660_v7, %v5986_v8 }
  0x4b   :  { %817 = vmatpush.bf16.msrb.mxu2 %v5845_v4  ;;  %v5802_v4 = vld [vmem:[#allocation9 + $0x8] sm:$0xf0]  ;;  %v8692_v12 = vld [vmem:[#allocation9 + $0x274] sm:$0xf]  ;;  %v8674_v30 = vld [vmem:[#allocation9 + $0x1e4] sm:$0xf] }
  0x4c   :  { %830 = vmatpush.bf16.msrb.mxu3 %v5909_v11  ;;  %v6050_v11 = vld [vmem:[#allocation9 + $0x1f8] sm:$0xf0]  ;;  %v5805_v16 = vor.u32 %v8614_v1, %v5802_v4  ;;  %v8708_v17 = vld [vmem:[#allocation9 + $0x2f4] sm:$0xf]  ;;  %v6117_v27 = vor.u32 %v8692_v12, %v6114_v13  ;;  %v5978_v29 = vld [vmem:[#allocation9 + $0x168] sm:$0xf0] }
  0x4d   :  { %792 = vmatpush.bf16.msrb.mxu0 %v6089_v21  ;;  %v6178_v21 = vld [vmem:[#allocation9 + $0x2f8] sm:$0xf0]  ;;  %v6053_v26 = vor.u32 %v8676_v9, %v6050_v11  ;;  %v6042_v32 = vld [vmem:[#allocation9 + $0x1e8] sm:$0xf0]  ;;  %v8690_v33 = vld [vmem:[#allocation9 + $0x264] sm:$0xf] }
  0x4e   :  { %805 = vmatpush.bf16.msrb.mxu1 %v6153_v23  ;;  %v244_v23 = vunpack.c.h.b16 %v139_v2  ;;  %v6181_v31 = vor.u32 %v8708_v17, %v6178_v21  ;;  %v6170_v37 = vld [vmem:[#allocation9 + $0x2e8] sm:$0xf0]  ;;  %v8656_v42 = vld [vmem:[#allocation9 + $0x154] sm:$0xf]  ;;  %v5970_v43 = vld [vmem:[#allocation9 + $0x158] sm:$0xf0] }
  0x4f   :  { %818 = vmatpush.bf16.msrb.mxu2 %v5837_v24  ;;  %v5869_v24 = vor.u32 %v8630_v5, %v5866_v6  ;;  %v8672_v44 = vld [vmem:[#allocation9 + $0x1d4] sm:$0xf]  ;;  %v6162_v50 = vld [vmem:[#allocation9 + $0x2d8] sm:$0xf0]  ;;  %v5973_v51 = vor.u32 %v8656_v42, %v5970_v43  ;;  %v8654_v54 = vld [vmem:[#allocation9 + $0x144] sm:$0xf] }
  0x50   :  { %831 = vmatpush.bf16.msrb.mxu3 %v5901_v28  ;;  %v8658_v28 = vld [vmem:[#allocation9 + $0x164] sm:$0xf]  ;;  %v9621_v38 = vpack.c.b16 %v244_v23, %v244_v23  ;;  %v8704_v49 = vld [vmem:[#allocation9 + $0x2d4] sm:$0xf]  ;;  %v5962_v55 = vld [vmem:[#allocation9 + $0x148] sm:$0xf0] }
  0x51   :  { %793 = vmatpush.bf16.msrb.mxu0 %v6081_v34  ;;  %v6106_v34 = vld [vmem:[#allocation9 + $0x268] sm:$0xf0]  ;;  %v5981_v39 = vor.u32 %v8658_v28, %v5978_v29  ;;  %v8670_v56 = vld [vmem:[#allocation9 + $0x1c4] sm:$0xf]  ;;  %v6165_v57 = vor.u32 %v8704_v49, %v6162_v50  ;;  %v8652_v0 = vld [vmem:[#allocation9 + $0x134] sm:$0xf] }
  0x52   :  { %806 = vmatpush.bf16.msrb.mxu1 %v6145_v35  ;;  %v9619_v35 = vpack.c.b16 %v243_v14, %v243_v14  ;;  %v6109_v41 = vor.u32 %v8690_v33, %v6106_v34  ;;  %v8686_v59 = vld [vmem:[#allocation9 + $0x244] sm:$0xf]  ;;  %v6090_v60 = vld [vmem:[#allocation9 + $0x248] sm:$0xf0]  ;;  %v5954_v1 = vld [vmem:[#allocation9 + $0x138] sm:$0xf0] }
  0x53   :  { %819 = vmatpush.bf16.msrb.mxu2 %v5829_v36  ;;  %v8706_v36 = vld [vmem:[#allocation9 + $0x2e4] sm:$0xf]  ;;  %v8668_v2 = vld [vmem:[#allocation9 + $0x1b4] sm:$0xf]  ;;  %v6018_v4 = vld [vmem:[#allocation9 + $0x1b8] sm:$0xf0]  ;;  %v5957_v9 = vor.u32 %v8652_v0, %v5954_v1 }
  0x54   :  { %832 = vmatpush.bf16.msrb.mxu3 %v5893_v40  ;;  %v6045_v40 = vor.u32 %v8674_v30, %v6042_v32  ;;  %v6173_v45 = vor.u32 %v8706_v36, %v6170_v37  ;;  %v8702_v61 = vld [vmem:[#allocation9 + $0x2c4] sm:$0xf]  ;;  %v8684_v5 = vld [vmem:[#allocation9 + $0x234] sm:$0xf]  ;;  %v6082_v6 = vld [vmem:[#allocation9 + $0x238] sm:$0xf0] }
  0x55   :  { %794 = vmatpush.bf16.msrb.mxu0 %v6073_v46  ;;  %v6034_v46 = vld [vmem:[#allocation9 + $0x1d8] sm:$0xf0]  ;;  %v8700_v7 = vld [vmem:[#allocation9 + $0x2b4] sm:$0xf]  ;;  %v6085_v11 = vor.u32 %v8684_v5, %v6082_v6  ;;  %v8650_v12 = vld [vmem:[#allocation9 + $0x124] sm:$0xf] }
  0x56   :  { %807 = vmatpush.bf16.msrb.mxu1 %v6137_v47  ;;  %v8688_v47 = vld [vmem:[#allocation9 + $0x254] sm:$0xf]  ;;  %v6146_v8 = vld [vmem:[#allocation9 + $0x2b8] sm:$0xf0]  ;;  %v5946_v13 = vld [vmem:[#allocation9 + $0x128] sm:$0xf0] }
  0x57   :  { %820 = vmatpush.bf16.msrb.mxu2 %v5821_v48  ;;  %v6098_v48 = vld [vmem:[#allocation9 + $0x258] sm:$0xf0]  ;;  %v8666_v14 = vld [vmem:[#allocation9 + $0x1a4] sm:$0xf]  ;;  %v6074_v21 = vld [vmem:[#allocation9 + $0x228] sm:$0xf0] }
  0x58   :  { %833 = vmatpush.bf16.msrb.mxu3 %v5885_v52  ;;  %v6037_v52 = vor.u32 %v8672_v44, %v6034_v46  ;;  %v6101_v53 = vor.u32 %v8688_v47, %v6098_v48  ;;  %v8682_v17 = vld [vmem:[#allocation9 + $0x224] sm:$0xf]  ;;  %v8648_v28 = vld [vmem:[#allocation9 + $0x114] sm:$0xf]  ;;  %v5938_v29 = vld [vmem:[#allocation9 + $0x118] sm:$0xf0] }
  0x59   :  { %795 = vmatpush.bf16.msrb.mxu0 %v6065_v58  ;;  %v6026_v58 = vld [vmem:[#allocation9 + $0x1c8] sm:$0xf0]  ;;  %v8698_v23 = vld [vmem:[#allocation9 + $0x2a4] sm:$0xf]  ;;  %v8664_v30 = vld [vmem:[#allocation9 + $0x194] sm:$0xf] }
  0x5a   :  { %808 = vmatpush.bf16.msrb.mxu1 %v6129_v62  ;;  %v6154_v62 = vld [vmem:[#allocation9 + $0x2c8] sm:$0xf0]  ;;  %v6002_v32 = vld [vmem:[#allocation9 + $0x198] sm:$0xf0]  ;;  %v8680_v33 = vld [vmem:[#allocation9 + $0x214] sm:$0xf] }
  0x5b   :  { %821 = vmatpush.bf16.msrb.mxu2 %v5813_v63  ;;  %v6029_v63 = vor.u32 %v8670_v56, %v6026_v58  ;;  %v6066_v34 = vld [vmem:[#allocation9 + $0x218] sm:$0xf0]  ;;  %v8696_v36 = vld [vmem:[#allocation9 + $0x294] sm:$0xf]  ;;  %v6005_v42 = vor.u32 %v8664_v30, %v6002_v32  ;;  %v8662_v44 = vld [vmem:[#allocation9 + $0x184] sm:$0xf] }
  0x5c   :  { %834 = vmatpush.bf16.msrb.mxu3 %v5877_v3  ;;  %v6157_v3 = vor.u32 %v8702_v61, %v6154_v62  ;;  %v6130_v37 = vld [vmem:[#allocation9 + $0x298] sm:$0xf0]  ;;  %v6069_v43 = vor.u32 %v8680_v33, %v6066_v34  ;;  %v8678_v46 = vld [vmem:[#allocation9 + $0x204] sm:$0xf]  ;;  %v6058_v48 = vld [vmem:[#allocation9 + $0x208] sm:$0xf0] }
  0x5d   :  { %796 = vmatpush.bf16.msrb.mxu0 %v6057_v10  ;;  %v6021_v10 = vor.u32 %v8668_v2, %v6018_v4  ;;  %v6133_v47 = vor.u32 %v8696_v36, %v6130_v37  ;;  %v8694_v49 = vld [vmem:[#allocation9 + $0x284] sm:$0xf]  ;;  %v6122_v50 = vld [vmem:[#allocation9 + $0x288] sm:$0xf0]  ;;  %v6368_v56 = vld [vmem:[#allocation10 + $0x170] sm:$0xf] }
  0x5e   :  { %809 = vmatpush.bf16.msrb.mxu1 %v6121_v15  ;;  %v6149_v15 = vor.u32 %v8700_v7, %v6146_v8  ;;  %v8773_v61 = vld [vmem:[#allocation10 + $0x1f4] sm:$0xf0]  ;;  %v6125_v62 = vor.u32 %v8694_v49, %v6122_v50  ;;  %v6232_v0 = vld [vmem:[#allocation10 + $0x60] sm:$0xf]  ;;  %v8723_v1 = vld [vmem:[#allocation10 + $0x64] sm:$0xf0] }
  0x5f   :  { %822 = vmatpush.bf16.msrb.mxu2 %v5805_v16  ;;  %v6010_v16 = vld [vmem:[#allocation9 + $0x1a8] sm:$0xf0]  ;;  %v6296_v2 = vld [vmem:[#allocation10 + $0xe0] sm:$0xf]  ;;  %v8739_v4 = vld [vmem:[#allocation10 + $0xe4] sm:$0xf0] }
  0x60   :  { %835 = vmatpush.bf16.msrb.mxu3 %v5869_v24  ;;  %797 = vmatmul.bf16.vlgmr.msrb.gmra.mxu0 %v9619_v35  ;;  %v6138_v24 = vld [vmem:[#allocation9 + $0x2a8] sm:$0xf0]  ;;  %v6360_v5 = vld [vmem:[#allocation10 + $0x160] sm:$0xf]  ;;  %v8755_v6 = vld [vmem:[#allocation10 + $0x164] sm:$0xf0] }
  0x61   :  { %841 = vmatpush.bf16.msra.mxu0 %v5989_v25  ;;  %810 = vmatmul.bf16.vlgmr.msrb.gmra.mxu1 %v9621_v38  ;;  %v5949_v25 = vor.u32 %v8650_v12, %v5946_v13  ;;  %v6424_v7 = vld [vmem:[#allocation10 + $0x1e0] sm:$0xf]  ;;  %v8771_v8 = vld [vmem:[#allocation10 + $0x1e4] sm:$0xf0]  ;;  %v6224_v12 = vld [vmem:[#allocation10 + $0x50] sm:$0xf] }
  0x62   :  { %854 = vmatpush.bf16.msra.mxu1 %v6053_v26  ;;  %823 = vmatmul.bf16.vlgmr.msrb.gmra.mxu2 %v9607_v18  ;;  %v5965_v18 = vor.u32 %v8654_v54, %v5962_v55  ;;  %v6013_v26 = vor.u32 %v8666_v14, %v6010_v16  ;;  %v8741_v55 = vld [vmem:[#allocation10 + $0xf4] sm:$0xf0]  ;;  %v6288_v14 = vld [vmem:[#allocation10 + $0xd0] sm:$0xf]  ;;  %v6344_v32 = vld [vmem:[#allocation10 + $0x140] sm:$0xf] }
  0x63   :  { %867 = vmatpush.bf16.msra.mxu2 %v6117_v27  ;;  %836 = vmatmul.bf16.vlgmr.msrb.gmra.mxu3 %v9611_v20  ;;  %v6093_v20 = vor.u32 %v8686_v59, %v6090_v60  ;;  %v6077_v27 = vor.u32 %v8682_v17, %v6074_v21  ;;  %v6061_v59 = vor.u32 %v8678_v46, %v6058_v48  ;;  %v6432_v60 = vld [vmem:[#allocation10 + $0x1f0] sm:$0xf]  ;;  %v8721_v13 = vld [vmem:[#allocation10 + $0x54] sm:$0xf0]  ;;  %v6408_v33 = vld [vmem:[#allocation10 + $0x1c0] sm:$0xf] }
  0x64   :  { %880 = vmatpush.bf16.msra.mxu3 %v6181_v31  ;;  %v6141_v31 = vor.u32 %v8698_v23, %v6138_v24  ;;  %v8737_v16 = vld [vmem:[#allocation10 + $0xd4] sm:$0xf0]  ;;  %v6352_v17 = vld [vmem:[#allocation10 + $0x150] sm:$0xf]  ;;  %vm5410_vm3 = vcmask 1045504   ;;  %s9545_s4 = smov [#allocation16]  }
  0x65   :  { %842 = vmatpush.bf16.msra.mxu0 %v5981_v39  ;;  %v5941_v39 = vor.u32 %v8648_v28, %v5938_v29  ;;  %v8753_v21 = vld [vmem:[#allocation10 + $0x154] sm:$0xf0]  ;;  %v6416_v23 = vld [vmem:[#allocation10 + $0x1d0] sm:$0xf]  ;;  %v6216_v28 = vld [vmem:[#allocation10 + $0x40] sm:$0xf] }
  0x66   :  { %855 = vmatpush.bf16.msra.mxu1 %v6045_v40  ;;  %v8646_v40 = vld [vmem:[#allocation9 + $0x104] sm:$0xf]  ;;  %v8769_v24 = vld [vmem:[#allocation10 + $0x1d4] sm:$0xf0]  ;;  %v6280_v29 = vld [vmem:[#allocation10 + $0xc0] sm:$0xf] }
  0x67   :  { %868 = vmatpush.bf16.msra.mxu2 %v6109_v41  ;;  %v5930_v41 = vld [vmem:[#allocation9 + $0x108] sm:$0xf0]  ;;  %v6417_v30 = vor.u32 %v8769_v24, %v6416_v23  ;;  %v6208_v37 = vld [vmem:[#allocation10 + $0x30] sm:$0xf]  ;;  %v8765_v46 = vld [vmem:[#allocation10 + $0x1b4] sm:$0xf0] }
  0x68   :  { %881 = vmatpush.bf16.msra.mxu3 %v6173_v45  ;;  %v5994_v45 = vld [vmem:[#allocation9 + $0x188] sm:$0xf0]  ;;  %v5933_v54 = vor.u32 %v8646_v40, %v5930_v41  ;;  %v6272_v40 = vld [vmem:[#allocation10 + $0xb0] sm:$0xf]  ;;  %v8789_v23 = vld [vmem:[#allocation10 + $0x274] sm:$0xf0] }
  0x69   :  { %843 = vmatpush.bf16.msra.mxu0 %v5973_v51  ;;  %v6240_v51 = vld [vmem:[#allocation10 + $0x70] sm:$0xf]  ;;  %v5997_v58 = vor.u32 %v8662_v44, %v5994_v45  ;;  %v8749_v44 = vld [vmem:[#allocation10 + $0x134] sm:$0xf0]  ;;  %s5783_s6 = sshll.u32 %s9545_s4, 4  ;;  %s5785_s1 = sshll.u32 %s9887_s7, 4  ;;  %s5784_s6 = int_to_ptr.vmem [resolvable:$true] %s5783_s6  ;;  %s5786_s1 = int_to_ptr.hbm [resolvable:$true] %s5785_s1 }
  0x6a   :  { %856 = vmatpush.bf16.msra.mxu1 %v6037_v52  ;;  %v8725_v52 = vld [vmem:[#allocation10 + $0x74] sm:$0xf0]  ;;  %v6400_v45 = vld [vmem:[#allocation10 + $0x1b0] sm:$0xf] }
  0x6b   :  { %869 = vmatpush.bf16.msra.mxu2 %v6101_v53  ;;  %v6304_v53 = vld [vmem:[#allocation10 + $0xf0] sm:$0xf] }
  0x6c   :  { %882 = vmatpush.bf16.msra.mxu3 %v6165_v57  ;;  %v8757_v57 = vld [vmem:[#allocation10 + $0x174] sm:$0xf0]  ;;  %v6560_v24 = vld [vmem:[#allocation10 + $0x2f0] sm:$0xf] }
  0x6d   :  { %844 = vmatpush.bf16.msra.mxu0 %v5965_v18  ;;  %v6241_v18 = vor.u32 %v8725_v52, %v6240_v51  ;;  %v6200_v51 = vld [vmem:[#allocation10 + $0x20] sm:$0xf]  ;;  %v8715_v52 = vld [vmem:[#allocation10 + $0x24] sm:$0xf0] }
  0x6e   :  { %857 = vmatpush.bf16.msra.mxu1 %v6029_v63  ;;  %v6305_v63 = vor.u32 %v8741_v55, %v6304_v53  ;;  %v6264_v53 = vld [vmem:[#allocation10 + $0xa0] sm:$0xf]  ;;  %v8731_v55 = vld [vmem:[#allocation10 + $0xa4] sm:$0xf0] }
  0x6f   :  { %870 = vmatpush.bf16.msra.mxu2 %v6093_v20  ;;  %v6369_v20 = vor.u32 %v8757_v57, %v6368_v56  ;;  %v6328_v56 = vld [vmem:[#allocation10 + $0x120] sm:$0xf]  ;;  %v8747_v57 = vld [vmem:[#allocation10 + $0x124] sm:$0xf0] }
  0x70   :  { %883 = vmatpush.bf16.msra.mxu3 %v6157_v3  ;;  %v6433_v3 = vor.u32 %v8773_v61, %v6432_v60  ;;  %v6201_v60 = vor.u32 %v8715_v52, %v6200_v51  ;;  %v6265_v61 = vor.u32 %v8731_v55, %v6264_v53  ;;  %v8785_v51 = vld [vmem:[#allocation10 + $0x254] sm:$0xf0]  ;;  %v6544_v52 = vld [vmem:[#allocation10 + $0x2d0] sm:$0xf] }
  0x71   :  { %845 = vmatpush.bf16.msra.mxu0 %v5957_v9  ;;  %v6233_v9 = vor.u32 %v8723_v1, %v6232_v0  ;;  %v8729_v1 = vld [vmem:[#allocation10 + $0x94] sm:$0xf0] }
  0x72   :  { %858 = vmatpush.bf16.msra.mxu1 %v6021_v10  ;;  %v6297_v10 = vor.u32 %v8739_v4, %v6296_v2  ;;  %v6320_v2 = vld [vmem:[#allocation10 + $0x110] sm:$0xf]  ;;  %v8801_v55 = vld [vmem:[#allocation10 + $0x2d4] sm:$0xf0] }
  0x73   :  { %871 = vmatpush.bf16.msra.mxu2 %v6085_v11  ;;  %v6361_v11 = vor.u32 %v8755_v6, %v6360_v5  ;;  %v6384_v4 = vld [vmem:[#allocation10 + $0x190] sm:$0xf]  ;;  %v8761_v5 = vld [vmem:[#allocation10 + $0x194] sm:$0xf0] }
  0x74   :  { %884 = vmatpush.bf16.msra.mxu3 %v6149_v15  ;;  %v6425_v15 = vor.u32 %v8771_v8, %v6424_v7  ;;  %v6184_v7 = vld [vmem:[#allocation10] sm:$0xf]  ;;  %v8711_v8 = vld [vmem:[#allocation10 + $0x4] sm:$0xf0] }
  0x75   :  { %846 = vmatpush.bf16.msra.mxu0 %v5949_v25  ;;  %v6225_v25 = vor.u32 %v8721_v13, %v6224_v12  ;;  %v8727_v12 = vld [vmem:[#allocation10 + $0x84] sm:$0xf0]  ;;  %v6312_v13 = vld [vmem:[#allocation10 + $0x100] sm:$0xf] }
  0x76   :  { %859 = vmatpush.bf16.msra.mxu1 %v6013_v26  ;;  %v6289_v26 = vor.u32 %v8737_v16, %v6288_v14  ;;  %v6385_v14 = vor.u32 %v8761_v5, %v6384_v4  ;;  %v6376_v16 = vld [vmem:[#allocation10 + $0x180] sm:$0xf]  ;;  %v8831_v5 = vld [vmem:[#allocation10 + $0x3c4] sm:$0xf0] }
  0x77   :  { %872 = vmatpush.bf16.msra.mxu2 %v6077_v27  ;;  %v6353_v27 = vor.u32 %v8753_v21, %v6352_v17  ;;  %v8759_v17 = vld [vmem:[#allocation10 + $0x184] sm:$0xf0]  ;;  %v6496_v21 = vld [vmem:[#allocation10 + $0x270] sm:$0xf]  ;;  %v6664_v4 = vld [vmem:[#allocation10 + $0x3c0] sm:$0xf] }
  0x78   :  { %885 = vmatpush.bf16.msra.mxu3 %v6141_v31  ;;  %v8735_v31 = vld [vmem:[#allocation10 + $0xc4] sm:$0xf0] }
  0x79   :  { %847 = vmatpush.bf16.msra.mxu0 %v5941_v39  ;;  %v8717_v39 = vld [vmem:[#allocation10 + $0x34] sm:$0xf0] }
  0x7a   :  { %860 = vmatpush.bf16.msra.mxu1 %v6005_v42  ;;  %v8733_v42 = vld [vmem:[#allocation10 + $0xb4] sm:$0xf0]  ;;  %v6209_v48 = vor.u32 %v8717_v39, %v6208_v37  ;;  %v8803_v39 = vld [vmem:[#allocation10 + $0x2e4] sm:$0xf0] }
  0x7b   :  { %873 = vmatpush.bf16.msra.mxu2 %v6069_v43  ;;  %v6336_v43 = vld [vmem:[#allocation10 + $0x130] sm:$0xf]  ;;  %v6273_v49 = vor.u32 %v8733_v42, %v6272_v40  ;;  %v6616_v40 = vld [vmem:[#allocation10 + $0x360] sm:$0xf] }
  0x7c   :  { %886 = vmatpush.bf16.msra.mxu3 %v6133_v47  ;;  %v898_v47 = vld [vmem:[#allocation7] sm:$0xff]  ;;  %v6337_v50 = vor.u32 %v8749_v44, %v6336_v43  ;;  %v8835_v43 = vld [vmem:[#allocation10 + $0x3e4] sm:$0xf0] }
  0x7d   :  { %848 = vmatpush.bf16.msra.mxu0 %v5933_v54  ;;  %1480 = vst [vmem:[#allocation1] ss:$9 sm:$0xff] %v898_v47  ;;  %v6401_v54 = vor.u32 %v8765_v46, %v6400_v45  ;;  %v6680_v42 = vld [vmem:[#allocation10 + $0x3e0] sm:$0xf]  ;;  %v6480_v46 = vld [vmem:[#allocation10 + $0x250] sm:$0xf] }
  0x7e   :  { %861 = vmatpush.bf16.msra.mxu1 %v5997_v58  ;;  %v6392_v58 = vld [vmem:[#allocation10 + $0x1a0] sm:$0xf] }
  0x7f   :  { %874 = vmatpush.bf16.msra.mxu2 %v6061_v59  ;;  %v8763_v59 = vld [vmem:[#allocation10 + $0x1a4] sm:$0xf0] }
  0x80   :  { %887 = vmatpush.bf16.msra.mxu3 %v6125_v62  ;;  %849 = vmatmul.bf16.vlgmr.msra.gmra.mxu0 %v9609_v19  ;;  %v8751_v19 = vld [vmem:[#allocation10 + $0x144] sm:$0xf0]  ;;  %v6329_v62 = vor.u32 %v8747_v57, %v6328_v56  ;;  %v6393_v0 = vor.u32 %v8763_v59, %v6392_v58  ;;  %v6608_v56 = vld [vmem:[#allocation10 + $0x350] sm:$0xf]  ;;  %v8817_v57 = vld [vmem:[#allocation10 + $0x354] sm:$0xf0] }
  0x81   :  { %4441 = vmatpush.bf16.msrb.mxu0 %v6241_v18  ;;  %862 = vmatmul.bf16.vlgmr.msra.gmra.mxu1 %v9613_v22  ;;  %v6281_v22 = vor.u32 %v8735_v31, %v6280_v29  ;;  %v6345_v36 = vor.u32 %v8751_v19, %v6344_v32  ;;  %v6192_v18 = vld [vmem:[#allocation10 + $0x10] sm:$0xf]  ;;  %v8837_v31 = vld [vmem:[#allocation10 + $0x3f4] sm:$0xf0]  ;;  %v6377_v32 = vor.u32 %v8759_v17, %v6376_v16 }
  0x82   :  { %4454 = vmatpush.bf16.msrb.mxu1 %v6305_v63  ;;  %875 = vmatmul.bf16.vlgmr.msra.gmra.mxu2 %v9619_v35  ;;  %v8719_v35 = vld [vmem:[#allocation10 + $0x44] sm:$0xf0]  ;;  %v8713_v63 = vld [vmem:[#allocation10 + $0x14] sm:$0xf0]  ;;  %v6497_v19 = vor.u32 %v8789_v23, %v6496_v21  ;;  %v6672_v58 = vld [vmem:[#allocation10 + $0x3d0] sm:$0xf]  ;;  %v6665_v17 = vor.u32 %v8831_v5, %v6664_v4 }
  0x83   :  { %4467 = vmatpush.bf16.msrb.mxu2 %v6369_v20  ;;  %888 = vmatmul.bf16.vlgmr.msra.gmra.mxu3 %v9621_v38  ;;  %v8767_v38 = vld [vmem:[#allocation10 + $0x1c4] sm:$0xf0]  ;;  %v6217_v34 = vor.u32 %v8719_v35, %v6216_v28  ;;  %v6256_v20 = vld [vmem:[#allocation10 + $0x90] sm:$0xf]  ;;  %v6193_v6 = vor.u32 %v8713_v63, %v6192_v18  ;;  %v8821_v28 = vld [vmem:[#allocation10 + $0x374] sm:$0xf0]  ;;  %v6545_v18 = vor.u32 %v8801_v55, %v6544_v52 }
  0x84   :  { %4480 = vmatpush.bf16.msrb.mxu3 %v6433_v3  ;;  %v6409_v41 = vor.u32 %v8767_v38, %v6408_v33  ;;  %v8745_v3 = vld [vmem:[#allocation10 + $0x114] sm:$0xf0]  ;;  %v9631_v44 = vld [vmem:[#allocation1 + $0x12] sm:$0xff]  ;;  %v9637_v53 = vld [vmem:[#allocation1 + $0x9] sm:$0xff]  ;;  %v6609_v63 = vor.u32 %v8817_v57, %v6608_v56 }
  0x85   :  { %4442 = vmatpush.bf16.msrb.mxu0 %v6233_v9  ;;  %v6257_v9 = vor.u32 %v8729_v1, %v6256_v20  ;;  %v9633_v47 = vld [vmem:[#allocation1] sm:$0xff]  ;;  %v6536_v20 = vld [vmem:[#allocation10 + $0x2c0] sm:$0xf]  ;;  %v6528_v16 = vld [vmem:[#allocation10 + $0x2b0] sm:$0xf] }
  0x86   :  { %4455 = vmatpush.bf16.msrb.mxu1 %v6297_v10  ;;  %v6321_v10 = vor.u32 %v8745_v3, %v6320_v2  ;;  %v8833_v59 = vld [vmem:[#allocation10 + $0x3d4] sm:$0xf0]  ;;  %v6600_v1 = vld [vmem:[#allocation10 + $0x340] sm:$0xf]  ;;  %v8815_v3 = vld [vmem:[#allocation10 + $0x344] sm:$0xf0] }
  0x87   :  { %4468 = vmatpush.bf16.msrb.mxu2 %v6361_v11  ;;  %v6248_v11 = vld [vmem:[#allocation10 + $0x80] sm:$0xf]  ;;  %v6673_v2 = vor.u32 %v8833_v59, %v6672_v58  ;;  %v8797_v21 = vld [vmem:[#allocation10 + $0x2b4] sm:$0xf0]  ;;  %v6592_v23 = vld [vmem:[#allocation10 + $0x330] sm:$0xf] }
  0x88   :  { %4481 = vmatpush.bf16.msrb.mxu3 %v6425_v15  ;;  %v8743_v15 = vld [vmem:[#allocation10 + $0x104] sm:$0xf0]  ;;  %v6249_v35 = vor.u32 %v8727_v12, %v6248_v11  ;;  %v6504_v58 = vld [vmem:[#allocation10 + $0x280] sm:$0xf]  ;;  %v6880_v4 = vld [vmem:[#allocation10 + $0x570] sm:$0xf] }
  0x89   :  { %4443 = vmatpush.bf16.msrb.mxu0 %v6225_v25  ;;  %v6185_v25 = vor.u32 %v8711_v8, %v6184_v7  ;;  %v6313_v29 = vor.u32 %v8743_v15, %v6312_v13  ;;  %v9643_v7 = vld [vmem:[#allocation1 + $0x36] sm:$0xff]  ;;  %v9645_v8 = vld [vmem:[#allocation1 + $0x24] sm:$0xff]  ;;  %v899_v11 = vld [vmem:[#allocation7 + $0x8] sm:$0xff] }
  0x8a   :  { %4456 = vmatpush.bf16.msrb.mxu1 %v6289_v26  ;;  %v8805_v26 = vld [vmem:[#allocation10 + $0x2f4] sm:$0xf0]  ;;  %v9649_v12 = vld [vmem:[#allocation1 + $0x2d] sm:$0xff] }
  0x8b   :  { %4469 = vmatpush.bf16.msrb.mxu2 %v6353_v27  ;;  %v6624_v27 = vld [vmem:[#allocation10 + $0x370] sm:$0xf]  ;;  %v6561_v33 = vor.u32 %v8805_v26, %v6560_v24  ;;  %v8781_v15 = vld [vmem:[#allocation10 + $0x234] sm:$0xf0]  ;;  %v8775_v55 = vld [vmem:[#allocation10 + $0x204] sm:$0xf0] }
  0x8c   :  { %4482 = vmatpush.bf16.msrb.mxu3 %v6417_v30  ;;  %v6688_v30 = vld [vmem:[#allocation10 + $0x3f0] sm:$0xf]  ;;  %v6625_v38 = vor.u32 %v8821_v28, %v6624_v27  ;;  %v8813_v24 = vld [vmem:[#allocation10 + $0x334] sm:$0xf0]  ;;  %v6529_v28 = vor.u32 %v8797_v21, %v6528_v16  ;;  %v8791_v59 = vld [vmem:[#allocation10 + $0x284] sm:$0xf0] }
  0x8d   :  { %4444 = vmatpush.bf16.msrb.mxu0 %v6217_v34  ;;  %v6488_v34 = vld [vmem:[#allocation10 + $0x260] sm:$0xf]  ;;  %v6689_v37 = vor.u32 %v8837_v31, %v6688_v30  ;;  %v8829_v26 = vld [vmem:[#allocation10 + $0x3b4] sm:$0xf0]  ;;  %v8779_v30 = vld [vmem:[#allocation10 + $0x224] sm:$0xf0] }
  0x8e   :  { %4457 = vmatpush.bf16.msrb.mxu1 %v6281_v22  ;;  %v8787_v22 = vld [vmem:[#allocation10 + $0x264] sm:$0xf0]  ;;  %v6520_v31 = vld [vmem:[#allocation10 + $0x2a0] sm:$0xf]  ;;  %v8885_v5 = vld [vmem:[#allocation10 + $0x574] sm:$0xf0] }
  0x8f   :  { %4470 = vmatpush.bf16.msrb.mxu2 %v6345_v36  ;;  %v6552_v36 = vld [vmem:[#allocation10 + $0x2e0] sm:$0xf]  ;;  %v6489_v45 = vor.u32 %v8787_v22, %v6488_v34  ;;  %v8827_v22 = vld [vmem:[#allocation10 + $0x3a4] sm:$0xf0] }
  0x90   :  { %4483 = vmatpush.bf16.msrb.mxu3 %v6409_v41  ;;  %v8819_v41 = vld [vmem:[#allocation10 + $0x364] sm:$0xf0]  ;;  %v6648_v34 = vld [vmem:[#allocation10 + $0x3a0] sm:$0xf] }
  0x91   :  { %4445 = vmatpush.bf16.msrb.mxu0 %v6209_v48  ;;  %v9635_v48 = vld [vmem:[#allocation1 + $0x1b] sm:$0xff]  ;;  %v6744_v21 = vld [vmem:[#allocation10 + $0x460] sm:$0xf] }
  0x92   :  { %4458 = vmatpush.bf16.msrb.mxu1 %v6273_v49  ;;  %v6553_v49 = vor.u32 %v8803_v39, %v6552_v36 }
  0x93   :  { %4471 = vmatpush.bf16.msrb.mxu2 %v6337_v50  ;;  %v6617_v50 = vor.u32 %v8819_v41, %v6616_v40  ;;  %v6448_v40 = vld [vmem:[#allocation10 + $0x210] sm:$0xf]  ;;  %v8777_v41 = vld [vmem:[#allocation10 + $0x214] sm:$0xf0] }
  0x94   :  { %4484 = vmatpush.bf16.msrb.mxu3 %v6401_v54  ;;  %v6681_v54 = vor.u32 %v8835_v43, %v6680_v42  ;;  %v6512_v42 = vld [vmem:[#allocation10 + $0x290] sm:$0xf]  ;;  %v6649_v43 = vor.u32 %v8827_v22, %v6648_v34  ;;  %v6449_v52 = vor.u32 %v8777_v41, %v6448_v40  ;;  %v8865_v22 = vld [vmem:[#allocation10 + $0x4d4] sm:$0xf0] }
  0x95   :  { %4446 = vmatpush.bf16.msrb.mxu0 %v6201_v60  ;;  %v6481_v60 = vor.u32 %v8785_v51, %v6480_v46  ;;  %v6576_v46 = vld [vmem:[#allocation10 + $0x310] sm:$0xf]  ;;  %v8825_v51 = vld [vmem:[#allocation10 + $0x394] sm:$0xf0] }
  0x96   :  { %4459 = vmatpush.bf16.msrb.mxu1 %v6265_v61  ;;  %v6472_v61 = vld [vmem:[#allocation10 + $0x240] sm:$0xf]  ;;  %v8897_v40 = vld [vmem:[#allocation10 + $0x5d4] sm:$0xf0] }
  0x97   :  { %4472 = vmatpush.bf16.msrb.mxu2 %v6329_v62  ;;  %v8783_v62 = vld [vmem:[#allocation10 + $0x244] sm:$0xf0] }
  0x98   :  { %4485 = vmatpush.bf16.msrb.mxu3 %v6393_v0  ;;  %v8799_v0 = vld [vmem:[#allocation10 + $0x2c4] sm:$0xf0] }
  0x99   :  { %4447 = vmatpush.bf16.msrb.mxu0 %v6193_v6  ;;  %v6464_v6 = vld [vmem:[#allocation10 + $0x230] sm:$0xf]  ;;  %v6537_v13 = vor.u32 %v8799_v0, %v6536_v20  ;;  %v8853_v0 = vld [vmem:[#allocation10 + $0x474] sm:$0xf0] }
  0x9a   :  { %4460 = vmatpush.bf16.msrb.mxu1 %v6257_v9  ;;  %v6473_v9 = vor.u32 %v8783_v62, %v6472_v61  ;;  %v6465_v27 = vor.u32 %v8781_v15, %v6464_v6  ;;  %v8807_v62 = vld [vmem:[#allocation10 + $0x304] sm:$0xf0]  ;;  %v6752_v20 = vld [vmem:[#allocation10 + $0x470] sm:$0xf]  ;;  %v6505_v6 = vor.u32 %v8791_v59, %v6504_v58 }
  0x9b   :  { %4473 = vmatpush.bf16.msrb.mxu2 %v6321_v10  ;;  %v9647_v10 = vld [vmem:[#allocation1 + $0x3f] sm:$0xff]  ;;  %v6753_v15 = vor.u32 %v8853_v0, %v6752_v20  ;;  %v6848_v20 = vld [vmem:[#allocation10 + $0x530] sm:$0xf] }
  0x9c   :  { %4486 = vmatpush.bf16.msrb.mxu3 %v6385_v14  ;;  %v6601_v14 = vor.u32 %v8815_v3, %v6600_v1  ;;  %1490 = vst [vmem:[#allocation1] ss:$9 sm:$0xff] %v899_v11  ;;  %v6816_v1 = vld [vmem:[#allocation10 + $0x4f0] sm:$0xf]  ;;  %v8869_v3 = vld [vmem:[#allocation10 + $0x4f4] sm:$0xf0] }
  0x9d   :  { %4448 = vmatpush.bf16.msrb.mxu0 %v6185_v25  ;;  %v6656_v25 = vld [vmem:[#allocation10 + $0x3b0] sm:$0xf]  ;;  %v6817_v16 = vor.u32 %v8869_v3, %v6816_v1  ;;  %v8877_v0 = vld [vmem:[#allocation10 + $0x534] sm:$0xf0] }
  0x9e   :  { %4461 = vmatpush.bf16.msrb.mxu1 %v6249_v35  ;;  %v6593_v35 = vor.u32 %v8813_v24, %v6592_v23  ;;  %v6944_v11 = vld [vmem:[#allocation10 + $0x5f0] sm:$0xf]  ;;  %v8851_v23 = vld [vmem:[#allocation10 + $0x464] sm:$0xf0]  ;;  %v6808_v24 = vld [vmem:[#allocation10 + $0x4e0] sm:$0xf] }
  0x9f   :  { %4474 = vmatpush.bf16.msrb.mxu2 %v6313_v29  ;;  %v6456_v29 = vld [vmem:[#allocation10 + $0x220] sm:$0xf]  ;;  %v6912_v1 = vld [vmem:[#allocation10 + $0x5b0] sm:$0xf] }
  0xa0   :  { %4487 = vmatpush.bf16.msrb.mxu3 %v6377_v32  ;;  %4449 = vmatmul.bf16.vlgmr.msrb.gmra.mxu0 %v9633_v47  ;;  %v6657_v32 = vor.u32 %v8829_v26, %v6656_v25  ;;  %v6457_v36 = vor.u32 %v8779_v30, %v6456_v29  ;;  %v8867_v26 = vld [vmem:[#allocation10 + $0x4e4] sm:$0xf0]  ;;  %v6745_v30 = vor.u32 %v8851_v23, %v6744_v21 }
  0xa1   :  { %4493 = vmatpush.bf16.msra.mxu0 %v6497_v19  ;;  %4462 = vmatmul.bf16.vlgmr.msrb.gmra.mxu1 %v9637_v53  ;;  %v8795_v19 = vld [vmem:[#allocation10 + $0x2a4] sm:$0xf0] }
  0xa2   :  { %4506 = vmatpush.bf16.msra.mxu1 %v6561_v33  ;;  %4475 = vmatmul.bf16.vlgmr.msrb.gmra.mxu2 %v9631_v44  ;;  %v6584_v33 = vld [vmem:[#allocation10 + $0x320] sm:$0xf]  ;;  %v8899_v29 = vld [vmem:[#allocation10 + $0x5e4] sm:$0xf0] }
  0xa3   :  { %4519 = vmatpush.bf16.msra.mxu2 %v6625_v38  ;;  %4488 = vmatmul.bf16.vlgmr.msrb.gmra.mxu3 %v9635_v48  ;;  %v8811_v38 = vld [vmem:[#allocation10 + $0x324] sm:$0xf0] }
  0xa4   :  { %4532 = vmatpush.bf16.msra.mxu3 %v6689_v37  ;;  %v6521_v37 = vor.u32 %v8795_v19, %v6520_v31  ;;  %v6585_v39 = vor.u32 %v8811_v38, %v6584_v33  ;;  %v6809_v31 = vor.u32 %v8867_v26, %v6808_v24  ;;  %v6736_v19 = vld [vmem:[#allocation10 + $0x450] sm:$0xf]  ;;  %v8849_v33 = vld [vmem:[#allocation10 + $0x454] sm:$0xf0]  ;;  %v8891_v21 = vld [vmem:[#allocation10 + $0x5a4] sm:$0xf0] }
  0xa5   :  { %4494 = vmatpush.bf16.msra.mxu0 %v6489_v45  ;;  %v8793_v45 = vld [vmem:[#allocation10 + $0x294] sm:$0xf0]  ;;  %v6800_v38 = vld [vmem:[#allocation10 + $0x4d0] sm:$0xf]  ;;  %v6737_v41 = vor.u32 %v8849_v33, %v6736_v19 }
  0xa6   :  { %4507 = vmatpush.bf16.msra.mxu1 %v6553_v49  ;;  %v8809_v49 = vld [vmem:[#allocation10 + $0x314] sm:$0xf0]  ;;  %v6513_v56 = vor.u32 %v8793_v45, %v6512_v42  ;;  %v6801_v42 = vor.u32 %v8865_v22, %v6800_v38  ;;  %v6728_v45 = vld [vmem:[#allocation10 + $0x440] sm:$0xf]  ;;  %v6896_v33 = vld [vmem:[#allocation10 + $0x590] sm:$0xf] }
  0xa7   :  { %4520 = vmatpush.bf16.msra.mxu2 %v6617_v50  ;;  %v6640_v50 = vld [vmem:[#allocation10 + $0x390] sm:$0xf]  ;;  %v6577_v57 = vor.u32 %v8809_v49, %v6576_v46  ;;  %v8847_v46 = vld [vmem:[#allocation10 + $0x444] sm:$0xf0]  ;;  %v6792_v49 = vld [vmem:[#allocation10 + $0x4c0] sm:$0xf] }
  0xa8   :  { %4533 = vmatpush.bf16.msra.mxu3 %v6681_v54  ;;  %v6440_v54 = vld [vmem:[#allocation10 + $0x200] sm:$0xf]  ;;  %v6641_v61 = vor.u32 %v8825_v51, %v6640_v50  ;;  %v8863_v51 = vld [vmem:[#allocation10 + $0x4c4] sm:$0xf0]  ;;  %v8873_v19 = vld [vmem:[#allocation10 + $0x514] sm:$0xf0] }
  0xa9   :  { %4495 = vmatpush.bf16.msra.mxu0 %v6481_v60  ;;  %v6568_v60 = vld [vmem:[#allocation10 + $0x300] sm:$0xf]  ;;  %v6793_v58 = vor.u32 %v8863_v51, %v6792_v49  ;;  %v8889_v38 = vld [vmem:[#allocation10 + $0x594] sm:$0xf0]  ;;  %v8887_v49 = vld [vmem:[#allocation10 + $0x584] sm:$0xf0] }
  0xaa   :  { %4508 = vmatpush.bf16.msra.mxu1 %v6545_v18  ;;  %v6632_v18 = vld [vmem:[#allocation10 + $0x380] sm:$0xf]  ;;  %v7008_v51 = vld [vmem:[#allocation10 + $0x670] sm:$0xf] }
  0xab   :  { %4521 = vmatpush.bf16.msra.mxu2 %v6609_v63  ;;  %v8823_v63 = vld [vmem:[#allocation10 + $0x384] sm:$0xf0]  ;;  %v6696_v22 = vld [vmem:[#allocation10 + $0x400] sm:$0xf] }
  0xac   :  { %4534 = vmatpush.bf16.msra.mxu3 %v6673_v2  ;;  %v6441_v2 = vor.u32 %v8775_v55, %v6440_v54  ;;  %v8879_v54 = vld [vmem:[#allocation10 + $0x544] sm:$0xf0]  ;;  %v6920_v55 = vld [vmem:[#allocation10 + $0x5c0] sm:$0xf] }
  0xad   :  { %4496 = vmatpush.bf16.msra.mxu0 %v6473_v9  ;;  %v6569_v9 = vor.u32 %v8807_v62, %v6568_v60  ;;  %v6720_v60 = vld [vmem:[#allocation10 + $0x430] sm:$0xf] }
  0xae   :  { %4509 = vmatpush.bf16.msra.mxu1 %v6537_v13  ;;  %v8901_v13 = vld [vmem:[#allocation10 + $0x5f4] sm:$0xf0]  ;;  %v6784_v62 = vld [vmem:[#allocation10 + $0x4b0] sm:$0xf] }
  0xaf   :  { %4522 = vmatpush.bf16.msra.mxu2 %v6601_v14  ;;  %v6633_v14 = vor.u32 %v8823_v63, %v6632_v18  ;;  %v6945_v25 = vor.u32 %v8901_v13, %v6944_v11  ;;  %v8861_v63 = vld [vmem:[#allocation10 + $0x4b4] sm:$0xf0]  ;;  %v6776_v11 = vld [vmem:[#allocation10 + $0x4a0] sm:$0xf] }
  0xb0   :  { %4535 = vmatpush.bf16.msra.mxu3 %v6665_v17  ;;  %v6881_v17 = vor.u32 %v8885_v5, %v6880_v4  ;;  %v6785_v4 = vor.u32 %v8861_v63, %v6784_v62  ;;  %v6849_v5 = vor.u32 %v8877_v0, %v6848_v20  ;;  %v7200_v63 = vld [vmem:[#allocation10 + $0x7f0] sm:$0xf]  ;;  %v8965_v20 = vld [vmem:[#allocation10 + $0x7f4] sm:$0xf0] }
  0xb1   :  { %4497 = vmatpush.bf16.msra.mxu0 %v6465_v27  ;;  %v6872_v27 = vld [vmem:[#allocation10 + $0x560] sm:$0xf] }
  0xb2   :  { %4510 = vmatpush.bf16.msra.mxu1 %v6529_v28  ;;  %v8883_v28 = vld [vmem:[#allocation10 + $0x564] sm:$0xf0] }
  0xb3   :  { %4523 = vmatpush.bf16.msra.mxu2 %v6593_v35  ;;  %v6936_v35 = vld [vmem:[#allocation10 + $0x5e0] sm:$0xf] }
  0xb4   :  { %4536 = vmatpush.bf16.msra.mxu3 %v6657_v32  ;;  %v6873_v32 = vor.u32 %v8883_v28, %v6872_v27  ;;  %v6937_v34 = vor.u32 %v8899_v29, %v6936_v35  ;;  %v6704_v28 = vld [vmem:[#allocation10 + $0x410] sm:$0xf]  ;;  %v8841_v35 = vld [vmem:[#allocation10 + $0x414] sm:$0xf0] }
  0xb5   :  { %4498 = vmatpush.bf16.msra.mxu0 %v6457_v36  ;;  %v6864_v36 = vld [vmem:[#allocation10 + $0x550] sm:$0xf] }
  0xb6   :  { %4511 = vmatpush.bf16.msra.mxu1 %v6521_v37  ;;  %v8881_v37 = vld [vmem:[#allocation10 + $0x554] sm:$0xf0]  ;;  %v6768_v29 = vld [vmem:[#allocation10 + $0x490] sm:$0xf] }
  0xb7   :  { %4524 = vmatpush.bf16.msra.mxu2 %v6585_v39  ;;  %v6928_v39 = vld [vmem:[#allocation10 + $0x5d0] sm:$0xf] }
  0xb8   :  { %4537 = vmatpush.bf16.msra.mxu3 %v6649_v43  ;;  %v6865_v43 = vor.u32 %v8881_v37, %v6864_v36  ;;  %v6929_v50 = vor.u32 %v8897_v40, %v6928_v39  ;;  %v8839_v36 = vld [vmem:[#allocation10 + $0x404] sm:$0xf0]  ;;  %v6760_v40 = vld [vmem:[#allocation10 + $0x480] sm:$0xf] }
  0xb9   :  { %4499 = vmatpush.bf16.msra.mxu0 %v6449_v52  ;;  %v6856_v52 = vld [vmem:[#allocation10 + $0x540] sm:$0xf] }
  0xba   :  { %4512 = vmatpush.bf16.msra.mxu1 %v6513_v56  ;;  %v8895_v56 = vld [vmem:[#allocation10 + $0x5c4] sm:$0xf0]  ;;  %v6857_v59 = vor.u32 %v8879_v54, %v6856_v52  ;;  %v8917_v52 = vld [vmem:[#allocation10 + $0x674] sm:$0xf0]  ;;  %v7072_v54 = vld [vmem:[#allocation10 + $0x6f0] sm:$0xf] }
  0xbb   :  { %4525 = vmatpush.bf16.msra.mxu2 %v6577_v57  ;;  %v6729_v57 = vor.u32 %v8847_v46, %v6728_v45  ;;  %v6921_v18 = vor.u32 %v8895_v56, %v6920_v55  ;;  %v8871_v45 = vld [vmem:[#allocation10 + $0x504] sm:$0xf0]  ;;  %v6888_v46 = vld [vmem:[#allocation10 + $0x580] sm:$0xf] }
  0xbc   :  { %4538 = vmatpush.bf16.msra.mxu3 %v6641_v61  ;;  %v8845_v61 = vld [vmem:[#allocation10 + $0x434] sm:$0xf0]  ;;  %v6889_v0 = vor.u32 %v8887_v49, %v6888_v46  ;;  %v7112_v49 = vld [vmem:[#allocation10 + $0x740] sm:$0xf] }
  0xbd   :  { %4500 = vmatpush.bf16.msra.mxu0 %v6441_v2  ;;  %v8893_v2 = vld [vmem:[#allocation10 + $0x5b4] sm:$0xf0]  ;;  %v6721_v3 = vor.u32 %v8845_v61, %v6720_v60  ;;  %v9655_v23 = vpop.f32.mrf.mxu0 }
  0xbe   :  { %4513 = vmatpush.bf16.msra.mxu1 %v6505_v6  ;;  %v6712_v6 = vld [vmem:[#allocation10 + $0x420] sm:$0xf]  ;;  %v6913_v13 = vor.u32 %v8893_v2, %v6912_v1  ;;  %v8949_v60 = vld [vmem:[#allocation10 + $0x774] sm:$0xf0]  ;;  %v7009_v1 = vor.u32 %v8917_v52, %v7008_v51  ;;  %v9675_v51 = vld [vmem:[#allocation1 + $0x2d] sm:$0xff] }
  0xbf   :  { %4526 = vmatpush.bf16.msra.mxu2 %v6569_v9  ;;  %v8843_v9 = vld [vmem:[#allocation10 + $0x424] sm:$0xf0]  ;;  %9892 = vst [vmem:[#allocation22_spill] sm:$0xff] %v9675_v51  ;;  %v9677_v52 = vld [vmem:[#allocation1 + $0x3f] sm:$0xff] }
  0xc0   :  { %4539 = vmatpush.bf16.msra.mxu3 %v6633_v14  ;;  %4501 = vmatmul.bf16.vlgmr.msra.gmra.mxu0 %v9645_v8  ;;  %v8859_v14 = vld [vmem:[#allocation10 + $0x4a4] sm:$0xf0]  ;;  %v6713_v24 = vor.u32 %v8843_v9, %v6712_v6  ;;  %v7064_v6 = vld [vmem:[#allocation10 + $0x6e0] sm:$0xf]  ;;  %v7201_v9 = vor.u32 %v8965_v20, %v7200_v63  ;;  %9893 = vst [vmem:[#allocation23_spill] sm:$0xff] %v9677_v52 }
  0xc1   :  { %4545 = vmatpush.bf16.msrb.mxu0 %v6753_v15  ;;  %4514 = vmatmul.bf16.vlgmr.msra.gmra.mxu1 %v9649_v12  ;;  %v6840_v15 = vld [vmem:[#allocation10 + $0x520] sm:$0xf]  ;;  %v6777_v26 = vor.u32 %v8859_v14, %v6776_v11  ;;  %v8931_v11 = vld [vmem:[#allocation10 + $0x6e4] sm:$0xf0] }
  0xc2   :  { %4558 = vmatpush.bf16.msrb.mxu1 %v6817_v16  ;;  %4527 = vmatmul.bf16.vlgmr.msra.gmra.mxu2 %v9643_v7  ;;  %v8875_v16 = vld [vmem:[#allocation10 + $0x524] sm:$0xf0] }
  0xc3   :  { %4571 = vmatpush.bf16.msrb.mxu2 %v6881_v17  ;;  %4540 = vmatmul.bf16.vlgmr.msra.gmra.mxu3 %v9647_v10  ;;  %v6904_v17 = vld [vmem:[#allocation10 + $0x5a0] sm:$0xf]  ;;  %v6841_v27 = vor.u32 %v8875_v16, %v6840_v15  ;;  %v8947_v14 = vld [vmem:[#allocation10 + $0x764] sm:$0xf0]  ;;  %v9663_v15 = vld [vmem:[#allocation1] sm:$0xff] }
  0xc4   :  { %4584 = vmatpush.bf16.msrb.mxu3 %v6945_v25  ;;  %v9657_v25 = vpop.f32.mrf.mxu1  ;;  %v7192_v16 = vld [vmem:[#allocation10 + $0x7e0] sm:$0xf] }
  0xc5   :  { %4546 = vmatpush.bf16.msrb.mxu0 %v6745_v30  ;;  %v6905_v30 = vor.u32 %v8891_v21, %v6904_v17  ;;  %v748_v55 = vpop.f32.mrf.mxu0  ;;  %v8963_v17 = vld [vmem:[#allocation10 + $0x7e4] sm:$0xf0] }
  0xc6   :  { %4559 = vmatpush.bf16.msrb.mxu1 %v6809_v31  ;;  %v8857_v31 = vld [vmem:[#allocation10 + $0x494] sm:$0xf0]  ;;  %v9661_v56 = vpop.f32.mrf.mxu3  ;;  %v9665_v21 = vld [vmem:[#allocation1 + $0x12] sm:$0xff] }
  0xc7   :  { %4572 = vmatpush.bf16.msrb.mxu2 %v6873_v32  ;;  %v6832_v32 = vld [vmem:[#allocation10 + $0x510] sm:$0xf]  ;;  %v6769_v37 = vor.u32 %v8857_v31, %v6768_v29  ;;  %v8913_v31 = vld [vmem:[#allocation10 + $0x654] sm:$0xf0]  ;;  %v8943_v55 = vld [vmem:[#allocation10 + $0x744] sm:$0xf0] }
  0xc8   :  { %4585 = vmatpush.bf16.msrb.mxu3 %v6937_v34  ;;  %v6705_v34 = vor.u32 %v8841_v35, %v6704_v28  ;;  %v6833_v39 = vor.u32 %v8873_v19, %v6832_v32  ;;  %v7065_v35 = vor.u32 %v8931_v11, %v7064_v6  ;;  %v7056_v32 = vld [vmem:[#allocation10 + $0x6d0] sm:$0xf] }
  0xc9   :  { %4547 = vmatpush.bf16.msrb.mxu0 %v6737_v41  ;;  %v8855_v41 = vld [vmem:[#allocation10 + $0x484] sm:$0xf0]  ;;  %v7104_v6 = vld [vmem:[#allocation10 + $0x730] sm:$0xf] }
  0xca   :  { %4560 = vmatpush.bf16.msrb.mxu1 %v6801_v42  ;;  %v6824_v42 = vld [vmem:[#allocation10 + $0x500] sm:$0xf]  ;;  %v6761_v62 = vor.u32 %v8855_v41, %v6760_v40  ;;  %v8911_v41 = vld [vmem:[#allocation10 + $0x644] sm:$0xf0]  ;;  %v7168_v11 = vld [vmem:[#allocation10 + $0x7b0] sm:$0xf] }
  0xcb   :  { %4573 = vmatpush.bf16.msrb.mxu2 %v6865_v43  ;;  %v6897_v43 = vor.u32 %v8889_v38, %v6896_v33  ;;  %v7193_v33 = vor.u32 %v8963_v17, %v7192_v16  ;;  %v8929_v38 = vld [vmem:[#allocation10 + $0x6d4] sm:$0xf0] }
  0xcc   :  { %4586 = vmatpush.bf16.msrb.mxu3 %v6929_v50  ;;  %v9659_v50 = vpop.f32.mrf.mxu2  ;;  %v761_v61 = vpop.f32.mrf.mxu1 }
  0xcd   :  { %4548 = vmatpush.bf16.msrb.mxu0 %v6729_v57  ;;  %v6697_v57 = vor.u32 %v8839_v36, %v6696_v22  ;;  %v8945_v22 = vld [vmem:[#allocation10 + $0x754] sm:$0xf0]  ;;  %v7184_v36 = vld [vmem:[#allocation10 + $0x7d0] sm:$0xf] }
  0xce   :  { %4561 = vmatpush.bf16.msrb.mxu1 %v6793_v58  ;;  %v8933_v58 = vld [vmem:[#allocation10 + $0x6f4] sm:$0xf0]  ;;  %v787_v19 = vpop.f32.mrf.mxu3  ;;  %v9683_v61 = vld [vmem:[#allocation1 + $0x36] sm:$0xff] }
  0xcf   :  { %4574 = vmatpush.bf16.msrb.mxu2 %v6857_v59  ;;  %v7136_v59 = vld [vmem:[#allocation10 + $0x770] sm:$0xf]  ;;  %v7073_v2 = vor.u32 %v8933_v58, %v7072_v54  ;;  %v8959_v58 = vld [vmem:[#allocation10 + $0x7c4] sm:$0xf0] }
  0xd0   :  { %4587 = vmatpush.bf16.msrb.mxu3 %v6921_v18  ;;  %v6825_v18 = vor.u32 %v8871_v45, %v6824_v42  ;;  %v7048_v42 = vld [vmem:[#allocation10 + $0x6c0] sm:$0xf]  ;;  %v7057_v45 = vor.u32 %v8929_v38, %v7056_v32  ;;  %v8939_v32 = vld [vmem:[#allocation10 + $0x724] sm:$0xf0] }
  0xd1   :  { %4549 = vmatpush.bf16.msrb.mxu0 %v6721_v3  ;;  %v7137_v3 = vor.u32 %v8949_v60, %v7136_v59  ;;  %v9681_v60 = vld [vmem:[#allocation1 + $0x24] sm:$0xff]  ;;  %v8955_v38 = vld [vmem:[#allocation10 + $0x7a4] sm:$0xf0] }
  0xd2   :  { %4562 = vmatpush.bf16.msrb.mxu1 %v6785_v4  ;;  %v7000_v4 = vld [vmem:[#allocation10 + $0x660] sm:$0xf] }
  0xd3   :  { %4575 = vmatpush.bf16.msrb.mxu2 %v6849_v5  ;;  %v8915_v5 = vld [vmem:[#allocation10 + $0x664] sm:$0xf0] }
  0xd4   :  { %4588 = vmatpush.bf16.msrb.mxu3 %v6913_v13  ;;  %v7128_v13 = vld [vmem:[#allocation10 + $0x760] sm:$0xf]  ;;  %v774_v28 = vpop.f32.mrf.mxu2 }
  0xd5   :  { %4550 = vmatpush.bf16.msrb.mxu0 %v6713_v24  ;;  %v9667_v24 = vld [vmem:[#allocation1 + $0x9] sm:$0xff]  ;;  %v7129_v29 = vor.u32 %v8947_v14, %v7128_v13  ;;  %v8957_v13 = vld [vmem:[#allocation10 + $0x7b4] sm:$0xf0] }
  0xd6   :  { %4563 = vmatpush.bf16.msrb.mxu1 %v6777_v26  ;;  %v9669_v26 = vld [vmem:[#allocation1 + $0x1b] sm:$0xff]  ;;  %v8907_v28 = vld [vmem:[#allocation10 + $0x624] sm:$0xf0] }
  0xd7   :  { %4576 = vmatpush.bf16.msrb.mxu2 %v6841_v27  ;;  %v7001_v27 = vor.u32 %v8915_v5, %v7000_v4  ;;  %v8925_v5 = vld [vmem:[#allocation10 + $0x6b4] sm:$0xf0] }
  0xd8   :  { %4589 = vmatpush.bf16.msrb.mxu3 %v6905_v30  ;;  %v6992_v30 = vld [vmem:[#allocation10 + $0x650] sm:$0xf] }
  0xd9   :  { %4551 = vmatpush.bf16.msrb.mxu0 %v6705_v34  ;;  %v7120_v34 = vld [vmem:[#allocation10 + $0x750] sm:$0xf]  ;;  %v6993_v40 = vor.u32 %v8913_v31, %v6992_v30  ;;  %v8923_v30 = vld [vmem:[#allocation10 + $0x6a4] sm:$0xf0]  ;;  %v7096_v31 = vld [vmem:[#allocation10 + $0x720] sm:$0xf] }
  0xda   :  { %4564 = vmatpush.bf16.msrb.mxu1 %v6769_v37  ;;  %v8961_v37 = vld [vmem:[#allocation10 + $0x7d4] sm:$0xf0]  ;;  %v7121_v46 = vor.u32 %v8945_v22, %v7120_v34 }
  0xdb   :  { %4577 = vmatpush.bf16.msrb.mxu2 %v6833_v39  ;;  %v6984_v39 = vld [vmem:[#allocation10 + $0x640] sm:$0xf]  ;;  %v7185_v54 = vor.u32 %v8961_v37, %v7184_v36  ;;  %v6960_v37 = vld [vmem:[#allocation10 + $0x610] sm:$0xf] }
  0xdc   :  { %4590 = vmatpush.bf16.msrb.mxu3 %v6897_v43  ;;  %v8927_v43 = vld [vmem:[#allocation10 + $0x6c4] sm:$0xf0] }
  0xdd   :  { %4552 = vmatpush.bf16.msrb.mxu0 %v6697_v57  ;;  %v7176_v57 = vld [vmem:[#allocation10 + $0x7c0] sm:$0xf]  ;;  %v9679_v59 = vpop.f32.mrf.mxu0  ;;  %v7049_v20 = vor.u32 %v8927_v43, %v7048_v42  ;;  %v8905_v42 = vld [vmem:[#allocation10 + $0x614] sm:$0xf0]  ;;  %v7024_v43 = vld [vmem:[#allocation10 + $0x690] sm:$0xf] }
  0xde   :  { %4565 = vmatpush.bf16.msrb.mxu1 %v6761_v62  ;;  %v900_v62 = vld [vmem:[#allocation7 + $0x10] sm:$0xff]  ;;  %v9685_v63 = vpop.f32.mrf.mxu1  ;;  %v7177_v4 = vor.u32 %v8959_v58, %v7176_v57  ;;  %v8953_v57 = vld [vmem:[#allocation10 + $0x794] sm:$0xf0]  ;;  %v6952_v58 = vld [vmem:[#allocation10 + $0x600] sm:$0xf] }
  0xdf   :  { %4578 = vmatpush.bf16.msrb.mxu2 %v6825_v18  ;;  %v6985_v18 = vor.u32 %v8911_v41, %v6984_v39  ;;  %1500 = vst [vmem:[#allocation1] ss:$9 sm:$0xff] %v900_v62  ;;  %v7097_v41 = vor.u32 %v8939_v32, %v7096_v31  ;;  %v8903_v62 = vld [vmem:[#allocation10 + $0x604] sm:$0xf0] }
  0xe0   :  { %4591 = vmatpush.bf16.msrb.mxu3 %v6889_v0  ;;  %4553 = vmatmul.bf16.vlgmr.msrb.gmra.mxu0 %v9663_v15  ;;  %v7113_v0 = vor.u32 %v8943_v55, %v7112_v49  ;;  %v7088_v49 = vld [vmem:[#allocation10 + $0x710] sm:$0xf]  ;;  %v6953_v31 = vor.u32 %v8903_v62, %v6952_v58  ;;  %v7320_v58 = vld [vmem:[#allocation10 + $0x8e0] sm:$0xf]  ;;  %v760_v62 = vadd.f32 %v9657_v25, %v9655_v23 }
  0xe1   :  { %4597 = vmatpush.bf16.msra.mxu0 %v7009_v1  ;;  %4566 = vmatmul.bf16.vlgmr.msrb.gmra.mxu1 %v9667_v24  ;;  %v6976_v1 = vld [vmem:[#allocation10 + $0x630] sm:$0xf] }
  0xe2   :  { %4610 = vmatpush.bf16.msra.mxu1 %v7073_v2  ;;  %4579 = vmatmul.bf16.vlgmr.msrb.gmra.mxu2 %v9665_v21  ;;  %v8909_v2 = vld [vmem:[#allocation10 + $0x634] sm:$0xf0]  ;;  %v7152_v55 = vld [vmem:[#allocation10 + $0x790] sm:$0xf]  ;;  %v773_v25 = vadd.f32 %v9659_v50, %v760_v62 }
  0xe3   :  { %4623 = vmatpush.bf16.msra.mxu2 %v7137_v3  ;;  %4592 = vmatmul.bf16.vlgmr.msrb.gmra.mxu3 %v9669_v26  ;;  %v7040_v3 = vld [vmem:[#allocation10 + $0x6b0] sm:$0xf]  ;;  %v6977_v14 = vor.u32 %v8909_v2, %v6976_v1  ;;  %v7080_v1 = vld [vmem:[#allocation10 + $0x700] sm:$0xf]  ;;  %v8935_v2 = vld [vmem:[#allocation10 + $0x704] sm:$0xf0] }
  0xe4   :  { %4636 = vmatpush.bf16.msra.mxu3 %v7201_v9  ;;  %v8941_v9 = vld [vmem:[#allocation10 + $0x734] sm:$0xf0]  ;;  %v7041_v16 = vor.u32 %v8925_v5, %v7040_v3  ;;  %v7144_v5 = vld [vmem:[#allocation10 + $0x780] sm:$0xf]  ;;  %v7312_v23 = vld [vmem:[#allocation10 + $0x8d0] sm:$0xf] }
  0xe5   :  { %4598 = vmatpush.bf16.msra.mxu0 %v7001_v27  ;;  %v7105_v17 = vor.u32 %v8941_v9, %v7104_v6  ;;  %v6968_v27 = vld [vmem:[#allocation10 + $0x620] sm:$0xf]  ;;  %v9687_v19 = vpop.f32.mrf.mxu2  ;;  %v800_v22 = vpop.f32.mrf.mxu0  ;;  %v8951_v6 = vld [vmem:[#allocation10 + $0x784] sm:$0xf0]  ;;  %v7264_v9 = vld [vmem:[#allocation10 + $0x870] sm:$0xf] }
  0xe6   :  { %4611 = vmatpush.bf16.msra.mxu1 %v7065_v35  ;;  %v7032_v35 = vld [vmem:[#allocation10 + $0x6a0] sm:$0xf]  ;;  %v9689_v34 = vpop.f32.mrf.mxu3  ;;  %v6969_v36 = vor.u32 %v8907_v28, %v6968_v27  ;;  %v813_v39 = vpop.f32.mrf.mxu1  ;;  %v9013_v28 = vld [vmem:[#allocation10 + $0x974] sm:$0xf0]  ;;  %v7232_v62 = vld [vmem:[#allocation10 + $0x830] sm:$0xf] }
  0xe7   :  { %4624 = vmatpush.bf16.msra.mxu2 %v7129_v29  ;;  %v7169_v29 = vor.u32 %v8957_v13, %v7168_v11  ;;  %v8981_v11 = vld [vmem:[#allocation10 + $0x874] sm:$0xf0]  ;;  %v7153_v13 = vor.u32 %v8953_v57, %v7152_v55  ;;  %v9699_v39 = vld [vmem:[#allocation1 + $0x24] sm:$0xff]  ;;  %v8979_v57 = vld [vmem:[#allocation10 + $0x864] sm:$0xf0]  ;;  %v838_v50 = vadd.f32 %v9689_v34, %v9687_v19 }
  0xe8   :  { %4637 = vmatpush.bf16.msra.mxu3 %v7193_v33  ;;  %v7160_v33 = vld [vmem:[#allocation10 + $0x7a0] sm:$0xf]  ;;  %v9691_v32 = vld [vmem:[#allocation1] sm:$0xff] }
  0xe9   :  { %4599 = vmatpush.bf16.msra.mxu0 %v6993_v40  ;;  %v7033_v40 = vor.u32 %v8923_v30, %v7032_v35  ;;  %v7456_v35 = vld [vmem:[#allocation10 + $0x9f0] sm:$0xf]  ;;  %v7256_v55 = vld [vmem:[#allocation10 + $0x860] sm:$0xf] }
  0xea   :  { %4612 = vmatpush.bf16.msra.mxu1 %v7057_v45  ;;  %v8921_v45 = vld [vmem:[#allocation10 + $0x694] sm:$0xf0] }
  0xeb   :  { %4625 = vmatpush.bf16.msra.mxu2 %v7121_v46  ;;  %v7161_v46 = vor.u32 %v8955_v38, %v7160_v33  ;;  %v7025_v3 = vor.u32 %v8921_v45, %v7024_v43  ;;  %v9693_v33 = vld [vmem:[#allocation1 + $0x12] sm:$0xff]  ;;  %v9695_v38 = vld [vmem:[#allocation1 + $0x9] sm:$0xff]  ;;  %v9705_v45 = vld [vmem:[#allocation1 + $0x3f] sm:$0xff] }
  0xec   :  { %4638 = vmatpush.bf16.msra.mxu3 %v7185_v54  ;;  %v8937_v54 = vld [vmem:[#allocation10 + $0x714] sm:$0xf0]  ;;  %9894 = vst [vmem:[#allocation24_spill] sm:$0xff] %v9695_v38  ;;  %v9703_v43 = vld [vmem:[#allocation1 + $0x2d] sm:$0xff] }
  0xed   :  { %4600 = vmatpush.bf16.msra.mxu0 %v6985_v18  ;;  %v6961_v18 = vor.u32 %v8905_v42, %v6960_v37  ;;  %v826_v27 = vpop.f32.mrf.mxu2  ;;  %v9697_v37 = vld [vmem:[#allocation1 + $0x1b] sm:$0xff]  ;;  %v7265_v42 = vor.u32 %v8981_v11, %v7264_v9 }
  0xee   :  { %4613 = vmatpush.bf16.msra.mxu1 %v7049_v20  ;;  %v7016_v20 = vld [vmem:[#allocation10 + $0x680] sm:$0xf]  ;;  %v839_v30 = vpop.f32.mrf.mxu3  ;;  %9895 = vst [vmem:[#allocation25_spill] sm:$0xff] %v9697_v37  ;;  %v7248_v9 = vld [vmem:[#allocation10 + $0x850] sm:$0xf] }
  0xef   :  { %4626 = vmatpush.bf16.msra.mxu2 %v7113_v0  ;;  %v8919_v0 = vld [vmem:[#allocation10 + $0x684] sm:$0xf0]  ;;  %v8977_v11 = vld [vmem:[#allocation10 + $0x854] sm:$0xf0]  ;;  %v7440_v27 = vld [vmem:[#allocation10 + $0x9d0] sm:$0xf] }
  0xf0   :  { %4639 = vmatpush.bf16.msra.mxu3 %v7177_v4  ;;  %v7089_v4 = vor.u32 %v8937_v54, %v7088_v49  ;;  %v7017_v22 = vor.u32 %v8919_v0, %v7016_v20  ;;  %v8995_v20 = vld [vmem:[#allocation10 + $0x8e4] sm:$0xf0]  ;;  %v7384_v0 = vld [vmem:[#allocation10 + $0x960] sm:$0xf] }
  0xf1   :  { %4601 = vmatpush.bf16.msra.mxu0 %v6977_v14  ;;  %v7328_v14 = vld [vmem:[#allocation10 + $0x8f0] sm:$0xf] }
  0xf2   :  { %4614 = vmatpush.bf16.msra.mxu1 %v7041_v16  ;;  %v8997_v16 = vld [vmem:[#allocation10 + $0x8f4] sm:$0xf0] }
  0xf3   :  { %4627 = vmatpush.bf16.msra.mxu2 %v7105_v17  ;;  %v7392_v17 = vld [vmem:[#allocation10 + $0x970] sm:$0xf]  ;;  %v7329_v49 = vor.u32 %v8997_v16, %v7328_v14  ;;  %v8993_v14 = vld [vmem:[#allocation10 + $0x8d4] sm:$0xf0] }
  0xf4   :  { %4640 = vmatpush.bf16.msra.mxu3 %v7169_v29  ;;  %v9029_v29 = vld [vmem:[#allocation10 + $0x9f4] sm:$0xf0]  ;;  %v7393_v54 = vor.u32 %v9013_v28, %v7392_v17  ;;  %v7376_v16 = vld [vmem:[#allocation10 + $0x950] sm:$0xf]  ;;  %v7313_v30 = vor.u32 %v8993_v14, %v7312_v23  ;;  %v902_v14 = vld [vmem:[#allocation7 + $0x20] sm:$0xf] }
  0xf5   :  { %4602 = vmatpush.bf16.msra.mxu0 %v6969_v36  ;;  %v7081_v36 = vor.u32 %v8935_v2, %v7080_v1  ;;  %v9011_v1 = vld [vmem:[#allocation10 + $0x964] sm:$0xf0]  ;;  %v7448_v2 = vld [vmem:[#allocation10 + $0x9e0] sm:$0xf]  ;;  %v9009_v17 = vld [vmem:[#allocation10 + $0x954] sm:$0xf0] }
  0xf6   :  { %4615 = vmatpush.bf16.msra.mxu1 %v7033_v40  ;;  %v9701_v40 = vld [vmem:[#allocation1 + $0x36] sm:$0xff]  ;;  %v9025_v28 = vld [vmem:[#allocation10 + $0x9d4] sm:$0xf0] }
  0xf7   :  { %4628 = vmatpush.bf16.msra.mxu2 %v7097_v41  ;;  %v7145_v41 = vor.u32 %v8951_v6, %v7144_v5  ;;  %v7321_v5 = vor.u32 %v8995_v20, %v7320_v58  ;;  %v7385_v6 = vor.u32 %v9011_v1, %v7384_v0  ;;  %v9023_v58 = vld [vmem:[#allocation10 + $0x9c4] sm:$0xf0]  ;;  %v7296_v20 = vld [vmem:[#allocation10 + $0x8b0] sm:$0xf]  ;;  %v8989_v0 = vld [vmem:[#allocation10 + $0x8b4] sm:$0xf0] }
  0xf8   :  { %4641 = vmatpush.bf16.msra.mxu3 %v7161_v46  ;;  %v901_v46 = vld [vmem:[#allocation7 + $0x18] sm:$0xff]  ;;  %v7360_v1 = vld [vmem:[#allocation10 + $0x930] sm:$0xf] }
  0xf9   :  { %4603 = vmatpush.bf16.msra.mxu0 %v6961_v18  ;;  %v7457_v18 = vor.u32 %v9029_v29, %v7456_v35  ;;  %1510 = vst [vmem:[#allocation1] ss:$9 sm:$0xff] %v901_v46  ;;  %v7249_v35 = vor.u32 %v8977_v11, %v7248_v9  ;;  %v7240_v29 = vld [vmem:[#allocation10 + $0x840] sm:$0xf]  ;;  %v7441_v46 = vor.u32 %v9025_v28, %v7440_v27  ;;  %v9021_v9 = vld [vmem:[#allocation10 + $0x9b4] sm:$0xf0] }
  0xfa   :  { %4616 = vmatpush.bf16.msra.mxu1 %v7025_v3  ;;  %v9027_v3 = vld [vmem:[#allocation10 + $0x9e4] sm:$0xf0] }
  0xfb   :  { %4629 = vmatpush.bf16.msra.mxu2 %v7089_v4  ;;  %v7257_v4 = vor.u32 %v8979_v57, %v7256_v55  ;;  %v7432_v55 = vld [vmem:[#allocation10 + $0x9c0] sm:$0xf] }
  0xfc   :  { %4642 = vmatpush.bf16.msra.mxu3 %v7153_v13  ;;  %v7449_v13 = vor.u32 %v9027_v3, %v7448_v2  ;;  %v9717_v57 = vld [vmem:[#allocation12] sm:$0x3]  ;;  %v7433_v23 = vor.u32 %v9023_v58, %v7432_v55 }
  0xfd   :  { %4604 = vmatpush.bf16.msra.mxu0 %v6953_v31  ;;  %v7377_v31 = vor.u32 %v9009_v17, %v7376_v16  ;;  %v850_v34 = vpop.f32.mrf.mxu0 }
  0xfe   :  { %4617 = vmatpush.bf16.msra.mxu1 %v7017_v22  ;;  %v8975_v22 = vld [vmem:[#allocation10 + $0x844] sm:$0xf0]  ;;  %v851_v3 = vadd.f32 %v850_v34, %v838_v50  ;;  %v7416_v34 = vld [vmem:[#allocation10 + $0x9a0] sm:$0xf] }
  0xff   :  { %4630 = vmatpush.bf16.msra.mxu2 %v7081_v36  ;;  %v7304_v36 = vld [vmem:[#allocation10 + $0x8c0] sm:$0xf]  ;;  %v7241_v19 = vor.u32 %v8975_v22, %v7240_v29  ;;  %v7297_v22 = vor.u32 %v8989_v0, %v7296_v20 }
 0x100   :  { %4643 = vmatpush.bf16.msra.mxu3 %v7145_v41  ;;  %4605 = vmatmul.bf16.vlgmr.msra.gmra.mxu0 %v9681_v60  ;;  %v8991_v41 = vld [vmem:[#allocation10 + $0x8c4] sm:$0xf0]  ;;  %v9726_v27 = vld [vmem:[#allocation1 + $0x1b] sm:$0xff]  ;;  %v9728_v28 = vld [vmem:[#allocation1 + $0x24] sm:$0xff] }
 0x101   :  { %4649 = vmatpush.bf16.msrb.mxu0 %v7265_v42  ;;  %4618 = vmatmul.bf16.vlgmr.msra.gmra.mxu1 %v9675_v51  ;;  %v786_v42 = vadd.f32 %v9661_v56, %v773_v25  ;;  %v7305_v2 = vor.u32 %v8991_v41, %v7304_v36  ;;  %v9720_v25 = vld [vmem:[#allocation1] sm:$0xff]  ;;  %v9724_v17 = vld [vmem:[#allocation1 + $0x9] sm:$0xff]  ;;  %v9732_v50 = vld [vmem:[#allocation1 + $0x36] sm:$0xff] }
 0x102   :  { %4662 = vmatpush.bf16.msrb.mxu1 %v7329_v49  ;;  %4631 = vmatmul.bf16.vlgmr.msra.gmra.mxu2 %v9683_v61  ;;  %v7368_v49 = vld [vmem:[#allocation10 + $0x940] sm:$0xf] }
 0x103   :  { %4675 = vmatpush.bf16.msrb.mxu2 %v7393_v54  ;;  %4644 = vmatmul.bf16.vlgmr.msra.gmra.mxu3 %v9677_v52  ;;  %v9007_v54 = vld [vmem:[#allocation10 + $0x944] sm:$0xf0]  ;;  %v799_v11 = vadd.f32 %v9679_v59, %v786_v42  ;;  %v5393_v59 = vperm.slane %v9717_v57, 1  ;;  %v7224_v42 = vld [vmem:[#allocation10 + $0x820] sm:$0xf] }
 0x104   :  { %4688 = vmatpush.bf16.msrb.mxu3 %v7457_v18  ;;  %v8973_v18 = vld [vmem:[#allocation10 + $0x834] sm:$0xf0]  ;;  %v7369_v56 = vor.u32 %v9007_v54, %v7368_v49  ;;  %v7288_v49 = vld [vmem:[#allocation10 + $0x8a0] sm:$0xf] }
 0x105   :  { %4650 = vmatpush.bf16.msrb.mxu0 %v7257_v4  ;;  %v863_v4 = vpop.f32.mrf.mxu1  ;;  %v7233_v29 = vor.u32 %v8973_v18, %v7232_v62  ;;  %v876_v41 = vpop.f32.mrf.mxu2  ;;  %v812_v54 = vadd.f32 %v9685_v63, %v799_v11  ;;  %v8987_v62 = vld [vmem:[#allocation10 + $0x8a4] sm:$0xf0]  ;;  %v7352_v18 = vld [vmem:[#allocation10 + $0x920] sm:$0xf]  ;;  %v8969_v63 = vld [vmem:[#allocation10 + $0x814] sm:$0xf0] }
 0x106   :  { %4663 = vmatpush.bf16.msrb.mxu1 %v7321_v5  ;;  %v9005_v5 = vld [vmem:[#allocation10 + $0x934] sm:$0xf0]  ;;  %v864_v16 = vadd.f32 %v863_v4, %v851_v3  ;;  %v9019_v3 = vld [vmem:[#allocation10 + $0x9a4] sm:$0xf0]  ;;  %v852_v0 = vpop.f32.mrf.mxu0  ;;  %v7216_v4 = vld [vmem:[#allocation10 + $0x810] sm:$0xf] }
 0x107   :  { %4676 = vmatpush.bf16.msrb.mxu2 %v7385_v6  ;;  %v7424_v6 = vld [vmem:[#allocation10 + $0x9b0] sm:$0xf]  ;;  %v7361_v36 = vor.u32 %v9005_v5, %v7360_v1  ;;  %v7289_v1 = vor.u32 %v8987_v62, %v7288_v49  ;;  %v9001_v52 = vld [vmem:[#allocation10 + $0x914] sm:$0xf0]  ;;  %v7640_v51 = vld [vmem:[#allocation10 + $0xb60] sm:$0xf] }
 0x108   :  { %4689 = vmatpush.bf16.msrb.mxu3 %v7449_v13  ;;  %v9722_v13 = vld [vmem:[#allocation1 + $0x12] sm:$0xff]  ;;  %v7425_v55 = vor.u32 %v9021_v9, %v7424_v6  ;;  %v877_v58 = vadd.f32 %v876_v41, %v864_v16  ;;  %v8985_v16 = vld [vmem:[#allocation10 + $0x894] sm:$0xf0] }
 0x109   :  { %4651 = vmatpush.bf16.msrb.mxu0 %v7249_v35  ;;  %v5392_v35 = vperm.slane %v9717_v57, 0  ;;  %v889_v57 = vpop.f32.mrf.mxu3  ;;  %v7280_v5 = vld [vmem:[#allocation10 + $0x890] sm:$0xf]  ;;  %v9045_v0 = vld [vmem:[#allocation10 + $0xa74] sm:$0xf0] }
 0x10a   :  { %4664 = vmatpush.bf16.msrb.mxu1 %v7313_v30  ;;  %v9734_v30 = vld [vmem:[#allocation1 + $0x2d] sm:$0xff]  ;;  %v7344_v41 = vld [vmem:[#allocation10 + $0x910] sm:$0xf]  ;;  %v7281_v49 = vor.u32 %v8985_v16, %v7280_v5  ;;  %v9077_v5 = vld [vmem:[#allocation10 + $0xb74] sm:$0xf0] }
 0x10b   :  { %4677 = vmatpush.bf16.msrb.mxu2 %v7377_v31  ;;  %v9736_v31 = vld [vmem:[#allocation1 + $0x3f] sm:$0xff]  ;;  %v5396_v9 = vadd.f32 %v5392_v35, %v812_v54  ;;  %v8983_v35 = vld [vmem:[#allocation10 + $0x884] sm:$0xf0]  ;;  %v7336_v54 = vld [vmem:[#allocation10 + $0x900] sm:$0xf] }
 0x10c   :  { %4690 = vmatpush.bf16.msrb.mxu3 %v7441_v46  ;;  %v8971_v46 = vld [vmem:[#allocation10 + $0x824] sm:$0xf0]  ;;  %1520 = vst [vmem:[#allocation1] ss:$9 sm:$0xff] %v902_v14  ;;  %v7408_v14 = vld [vmem:[#allocation10 + $0x990] sm:$0xf] }
 0x10d   :  { %4652 = vmatpush.bf16.msrb.mxu0 %v7241_v19  ;;  %v9003_v19 = vld [vmem:[#allocation10 + $0x924] sm:$0xf0]  ;;  %v7225_v20 = vor.u32 %v8971_v46, %v7224_v42  ;;  %v865_v6 = vpop.f32.mrf.mxu1  ;;  %v7272_v46 = vld [vmem:[#allocation10 + $0x880] sm:$0xf]  ;;  %v9739_v62 = vmax.f32 %v5396_v9, 0.0 }
 0x10e   :  { %4665 = vmatpush.bf16.msrb.mxu1 %v7305_v2  ;;  %v890_v2 = vadd.f32 %v889_v57, %v877_v58  ;;  %v7208_v58 = vld [vmem:[#allocation10 + $0x800] sm:$0xf]  ;;  %v7345_v57 = vor.u32 %v9001_v52, %v7344_v41  ;;  %v7273_v6 = vor.u32 %v8983_v35, %v7272_v46 }
 0x10f   :  { %4678 = vmatpush.bf16.msrb.mxu2 %v7369_v56  ;;  %v7353_v56 = vor.u32 %v9003_v19, %v7352_v18  ;;  %v7704_v46 = vld [vmem:[#allocation10 + $0xbe0] sm:$0xf] }
 0x110   :  { %4691 = vmatpush.bf16.msrb.mxu3 %v7433_v23  ;;  %v5397_v11 = vadd.f32 %v5393_v59, %v890_v2  ;;  %v7417_v23 = vor.u32 %v9019_v3, %v7416_v34  ;;  %v8999_v59 = vld [vmem:[#allocation10 + $0x904] sm:$0xf0]  ;;  %v7400_v34 = vld [vmem:[#allocation10 + $0x980] sm:$0xf] }
 0x111   :  { %4653 = vmatpush.bf16.msrb.mxu0 %v7233_v29  ;;  %v9017_v29 = vld [vmem:[#allocation10 + $0x994] sm:$0xf0]  ;;  %v9015_v3 = vld [vmem:[#allocation10 + $0x984] sm:$0xf0]  ;;  %v891_v2 = vpop.f32.mrf.mxu3  ;;  %v7337_v9 = vor.u32 %v8999_v59, %v7336_v54 }
 0x112   :  { %4666 = vmatpush.bf16.msrb.mxu1 %v7297_v22  ;;  %v5399_v42 = vmax.f32 %v5397_v11, 0.0  ;;  %v7217_v22 = vor.u32 %v8969_v63, %v7216_v4  ;;  %v7409_v19 = vor.u32 %v9017_v29, %v7408_v14  ;;  %v7584_v4 = vld [vmem:[#allocation10 + $0xaf0] sm:$0xf]  ;;  %v7401_v41 = vor.u32 %v9015_v3, %v7400_v34  ;;  %v9043_v2 = vld [vmem:[#allocation10 + $0xa64] sm:$0xf0] }
 0x113   :  { %4679 = vmatpush.bf16.msrb.mxu2 %v7361_v36  ;;  %v8967_v36 = vld [vmem:[#allocation10 + $0x804] sm:$0xf0]  ;;  %v7648_v63 = vld [vmem:[#allocation10 + $0xb70] sm:$0xf] }
 0x114   :  { %4692 = vmatpush.bf16.msrb.mxu3 %v7425_v55  ;;  %v878_v55 = vpop.f32.mrf.mxu2  ;;  %v9741_v18 = vrot.slane %v5399_v42, 6  ;;  %v7712_v11 = vld [vmem:[#allocation10 + $0xbf0] sm:$0xf]  ;;  %v7649_v42 = vor.u32 %v9077_v5, %v7648_v63  ;;  %v9755_v3 = vld [vmem:[#allocation1 + $0x9] sm:$0xff]  ;;  %v9057_v63 = vld [vmem:[#allocation10 + $0xad4] sm:$0xf0] }
 0x115   :  { %4654 = vmatpush.bf16.msrb.mxu0 %v7225_v20  ;;  %v7520_v20 = vld [vmem:[#allocation10 + $0xa70] sm:$0xf]  ;;  %v7512_v55 = vld [vmem:[#allocation10 + $0xa60] sm:$0xf] }
 0x116   :  { %4667 = vmatpush.bf16.msrb.mxu1 %v7289_v1  ;;  %v5405_v52 = vsel %vm5404_vm0, %v9739_v62, %v9741_v18  ;;  %v7209_v1 = vor.u32 %v8967_v36, %v7208_v58  ;;  %v7521_v14 = vor.u32 %v9045_v0, %v7520_v20  ;;  %v9059_v36 = vld [vmem:[#allocation10 + $0xae4] sm:$0xf0]  ;;  %v9746_v35 = vld [vmem:[#allocation1 + $0x1b] sm:$0xff]  ;;  %v5403_v54 = vsel %vm5380_vm1, %v9739_v62, %v9741_v18 }
 0x117   :  { %4680 = vmatpush.bf16.msrb.mxu2 %v7353_v56  ;;  %v9061_v56 = vld [vmem:[#allocation10 + $0xaf4] sm:$0xf0]  ;;  %v5406_v16 = vrot.slane %v5405_v52, 2  ;;  %v7513_v59 = vor.u32 %v9043_v2, %v7512_v55  ;;  %v9753_v34 = vld [vmem:[#allocation1 + $0x12] sm:$0xff]  ;;  %v7624_v2 = vld [vmem:[#allocation10 + $0xb40] sm:$0xf] }
 0x118   :  { %4693 = vmatpush.bf16.msrb.mxu3 %v7417_v23  ;;  %v9093_v23 = vld [vmem:[#allocation10 + $0xbf4] sm:$0xf0]  ;;  %v7585_v29 = vor.u32 %v9061_v56, %v7584_v4  ;;  %v7504_v4 = vld [vmem:[#allocation10 + $0xa50] sm:$0xf]  ;;  %v9055_v55 = vld [vmem:[#allocation10 + $0xac4] sm:$0xf0] }
 0x119   :  { %4655 = vmatpush.bf16.msrb.mxu0 %v7217_v22  ;;  %v7576_v22 = vld [vmem:[#allocation10 + $0xae0] sm:$0xf]  ;;  %v7713_v58 = vor.u32 %v9093_v23, %v7712_v11  ;;  %5417 = vst [vmem:[#allocation1 + $0x20] ss:$4 sm:$0xff] %v5406_v16  ;;  %v9041_v52 = vld [vmem:[#allocation10 + $0xa54] sm:$0xf0] }
 0x11a   :  { %4668 = vmatpush.bf16.msrb.mxu1 %v7281_v49  ;;  %v9075_v49 = vld [vmem:[#allocation10 + $0xb64] sm:$0xf0]  ;;  %v7577_v20 = vor.u32 %v9059_v36, %v7576_v22  ;;  %v7632_v5 = vld [vmem:[#allocation10 + $0xb50] sm:$0xf]  ;;  %v7505_v23 = vor.u32 %v9041_v52, %v7504_v4  ;;  %v7496_v16 = vld [vmem:[#allocation10 + $0xa40] sm:$0xf] }
 0x11b   :  { %4681 = vmatpush.bf16.msrb.mxu2 %v7345_v57  ;;  %v9091_v57 = vld [vmem:[#allocation10 + $0xbe4] sm:$0xf0]  ;;  %v7641_v0 = vor.u32 %v9075_v49, %v7640_v51  ;;  %v7696_v11 = vld [vmem:[#allocation10 + $0xbd0] sm:$0xf]  ;;  %v9089_v51 = vld [vmem:[#allocation10 + $0xbd4] sm:$0xf0] }
 0x11c   :  { %4694 = vmatpush.bf16.msrb.mxu3 %v7409_v19  ;;  %v9751_v19 = vld [vmem:[#allocation1] sm:$0xff]  ;;  %v7705_v56 = vor.u32 %v9091_v57, %v7704_v46  ;;  %v9071_v22 = vld [vmem:[#allocation10 + $0xb44] sm:$0xf0]  ;;  %v7697_v36 = vor.u32 %v9089_v51, %v7696_v11  ;;  %v7688_v49 = vld [vmem:[#allocation10 + $0xbc0] sm:$0xf]  ;;  %v5408_v57 = vsel %vm5407_vm2, %v9739_v62, %v9741_v18 }
 0x11d   :  { %4656 = vmatpush.bf16.msrb.mxu0 %v7209_v1  ;;  %v7568_v1 = vld [vmem:[#allocation10 + $0xad0] sm:$0xf]  ;;  %5413 = vst [vmem:[#allocation1] ss:$4 sm:$0xff] %v5403_v54  ;;  %v9087_v46 = vld [vmem:[#allocation10 + $0xbc4] sm:$0xf0] }
 0x11e   :  { %4669 = vmatpush.bf16.msrb.mxu1 %v7273_v6  ;;  %v9073_v6 = vld [vmem:[#allocation10 + $0xb54] sm:$0xf0]  ;;  %v7488_v54 = vld [vmem:[#allocation10 + $0xa30] sm:$0xf]  ;;  %v4463_v11 = vpop.f32.mrf.mxu1 }
 0x11f   :  { %4682 = vmatpush.bf16.msrb.mxu2 %v7337_v9  ;;  %v5411_v9 = vsel %vm5410_vm3, %v9741_v18, %v9739_v62  ;;  %v7552_v52 = vld [vmem:[#allocation10 + $0xab0] sm:$0xf]  ;;  %v5409_v62 = vrot.slane %v5408_v57, 4  ;;  %v7689_v18 = vor.u32 %v9087_v46, %v7688_v49  ;;  %v7608_v49 = vld [vmem:[#allocation10 + $0xb20] sm:$0xf] }
 0x120   :  { %4695 = vmatpush.bf16.msrb.mxu3 %v7401_v41  ;;  %4657 = vmatmul.bf16.vlgmr.msrb.gmra.mxu0 %v9691_v32  ;;  %v9039_v41 = vld [vmem:[#allocation10 + $0xa44] sm:$0xf0]  ;;  %v9769_v4 = vld.sshfl [vmem:[#allocation1 + $0x20] sm:$0xff pattern:$0x73625140] }
 0x121   :  { %4701 = vmatpush.bf16.msra.mxu0 %v7521_v14  ;;  %4670 = vmatmul.bf16.vlgmr.msrb.gmra.mxu1 %v9695_v38  ;;  %v7560_v14 = vld [vmem:[#allocation10 + $0xac0] sm:$0xf]  ;;  %9897 = vst [vmem:[#allocation27_spill] sm:$0xff] %v9769_v4  ;;  %v7680_v51 = vld [vmem:[#allocation10 + $0xbb0] sm:$0xf] }
 0x122   :  { %4714 = vmatpush.bf16.msra.mxu1 %v7585_v29  ;;  %4683 = vmatmul.bf16.vlgmr.msrb.gmra.mxu2 %v9693_v33  ;;  %v7569_v29 = vor.u32 %v9057_v63, %v7568_v1  ;;  %v4450_v1 = vpop.f32.mrf.mxu0  ;;  %v7625_v63 = vor.u32 %v9071_v22, %v7624_v2  ;;  %v7544_v2 = vld [vmem:[#allocation10 + $0xaa0] sm:$0xf]  ;;  %v9067_v46 = vld [vmem:[#allocation10 + $0xb24] sm:$0xf0] }
 0x123   :  { %4727 = vmatpush.bf16.msra.mxu2 %v7649_v42  ;;  %4696 = vmatmul.bf16.vlgmr.msrb.gmra.mxu3 %v9697_v37  ;;  %v7633_v42 = vor.u32 %v9073_v6, %v7632_v5  ;;  %v9053_v5 = vld [vmem:[#allocation10 + $0xab4] sm:$0xf0]  ;;  %v7616_v6 = vld [vmem:[#allocation10 + $0xb30] sm:$0xf]  ;;  %v4464_v4 = vadd.f32 %v4463_v11, %v4450_v1  ;;  %v7672_v11 = vld [vmem:[#allocation10 + $0xba0] sm:$0xf] }
 0x124   :  { %4740 = vmatpush.bf16.msra.mxu3 %v7713_v58  ;;  %v5412_v58 = vrot.slane %v5411_v9, 6  ;;  %v9069_v9 = vld [vmem:[#allocation10 + $0xb34] sm:$0xf0]  ;;  %v7832_v37 = vld [vmem:[#allocation10 + $0xce0] sm:$0xf] }
 0x125   :  { %4702 = vmatpush.bf16.msra.mxu0 %v7513_v59  ;;  %v9767_v59 = vld.sshfl [vmem:[#allocation1 + $0x28] sm:$0xff pattern:$0x73625140]  ;;  %v4476_v22 = vpop.f32.mrf.mxu2  ;;  %v9139_v38 = vld [vmem:[#allocation10 + $0xd64] sm:$0xf0] }
 0x126   :  { %4715 = vmatpush.bf16.msra.mxu1 %v7577_v20  ;;  %9896 = vst [vmem:[#allocation26_spill] sm:$0xff] %v9767_v59  ;;  %v7497_v20 = vor.u32 %v9039_v41, %v7496_v16  ;;  %v9085_v59 = vld [vmem:[#allocation10 + $0xbb4] sm:$0xf0]  ;;  %v4477_v57 = vadd.f32 %v4476_v22, %v4464_v4  ;;  %v4489_v1 = vpop.f32.mrf.mxu3  ;;  %v7600_v4 = vld [vmem:[#allocation10 + $0xb10] sm:$0xf] }
 0x127   :  { %4728 = vmatpush.bf16.msra.mxu2 %v7641_v0  ;;  %v9037_v0 = vld [vmem:[#allocation10 + $0xa34] sm:$0xf0]  ;;  %5423 = vst [vmem:[#allocation1 + $0x20] ss:$4 sm:$0xff] %v5412_v58  ;;  %v7681_v58 = vor.u32 %v9085_v59, %v7680_v51  ;;  %v4465_v59 = vpop.f32.mrf.mxu1  ;;  %v7664_v51 = vld [vmem:[#allocation10 + $0xb90] sm:$0xf] }
 0x128   :  { %4741 = vmatpush.bf16.msra.mxu3 %v7705_v56  ;;  %v7561_v56 = vor.u32 %v9055_v55, %v7560_v14  ;;  %v9773_v16 = vld.sshfl [vmem:[#allocation1] sm:$0xff pattern:$0x73625140]  ;;  %v7489_v41 = vor.u32 %v9037_v0, %v7488_v54  ;;  %v7553_v14 = vor.u32 %v9053_v5, %v7552_v52  ;;  %v9035_v55 = vld [vmem:[#allocation10 + $0xa24] sm:$0xf0] }
 0x129   :  { %4703 = vmatpush.bf16.msra.mxu0 %v7505_v23  ;;  %v9771_v23 = vld.sshfl [vmem:[#allocation1 + $0x8] sm:$0xff pattern:$0x73625140]  ;;  %9899 = vst [vmem:[#allocation29_spill] sm:$0xff] %v9773_v16  ;;  %v9033_v5 = vld [vmem:[#allocation10 + $0xa14] sm:$0xf0] }
 0x12a   :  { %4716 = vmatpush.bf16.msra.mxu1 %v7569_v29  ;;  %9898 = vst [vmem:[#allocation28_spill] sm:$0xff] %v9771_v23  ;;  %v7617_v29 = vor.u32 %v9069_v9, %v7616_v6  ;;  %v9083_v23 = vld [vmem:[#allocation10 + $0xba4] sm:$0xf0]  ;;  %v4452_v0 = vpop.f32.mrf.mxu0  ;;  %v7536_v6 = vld [vmem:[#allocation10 + $0xa90] sm:$0xf] }
 0x12b   :  { %4729 = vmatpush.bf16.msra.mxu2 %v7633_v42  ;;  %5420 = vst [vmem:[#allocation1] ss:$4 sm:$0xff] %v5409_v62  ;;  %v7480_v42 = vld [vmem:[#allocation10 + $0xa20] sm:$0xf]  ;;  %v7673_v9 = vor.u32 %v9083_v23, %v7672_v11  ;;  %v9049_v62 = vld [vmem:[#allocation10 + $0xa94] sm:$0xf0] }
 0x12c   :  { %4742 = vmatpush.bf16.msra.mxu3 %v7697_v36  ;;  %v9051_v36 = vld [vmem:[#allocation10 + $0xaa4] sm:$0xf0]  ;;  %v7481_v54 = vor.u32 %v9035_v55, %v7480_v42  ;;  %v9081_v22 = vld [vmem:[#allocation10 + $0xb94] sm:$0xf0]  ;;  %v7464_v42 = vld [vmem:[#allocation10 + $0xa00] sm:$0xf] }
 0x12d   :  { %4704 = vmatpush.bf16.msra.mxu0 %v7497_v20  ;;  %v9775_v20 = vadd.f32 %v4489_v1, %v4477_v57  ;;  %v7545_v52 = vor.u32 %v9051_v36, %v7544_v2  ;;  %v9031_v55 = vld [vmem:[#allocation10 + $0xa04] sm:$0xf0]  ;;  %v7528_v2 = vld [vmem:[#allocation10 + $0xa80] sm:$0xf]  ;;  %v7776_v0 = vld [vmem:[#allocation10 + $0xc70] sm:$0xf] }
 0x12e   :  { %4717 = vmatpush.bf16.msra.mxu1 %v7561_v56  ;;  %v7609_v56 = vor.u32 %v9067_v46, %v7608_v49  ;;  %v9047_v36 = vld [vmem:[#allocation10 + $0xa84] sm:$0xf0]  ;;  %v7592_v49 = vld [vmem:[#allocation10 + $0xb00] sm:$0xf]  ;;  %v4478_v46 = vpop.f32.mrf.mxu2  ;;  %v4491_v11 = vpop.f32.mrf.mxu3  ;;  %v9109_v59 = vld [vmem:[#allocation10 + $0xc74] sm:$0xf0] }
 0x12f   :  { %4730 = vmatpush.bf16.msra.mxu2 %v7625_v63  ;;  %v7472_v63 = vld [vmem:[#allocation10 + $0xa10] sm:$0xf]  ;;  %v9063_v23 = vld [vmem:[#allocation10 + $0xb04] sm:$0xf0]  ;;  %v7656_v57 = vld [vmem:[#allocation10 + $0xb80] sm:$0xf] }
 0x130   :  { %4743 = vmatpush.bf16.msra.mxu3 %v7689_v18  ;;  %v9065_v18 = vld [vmem:[#allocation10 + $0xb14] sm:$0xf0]  ;;  %v9079_v1 = vld [vmem:[#allocation10 + $0xb84] sm:$0xf0]  ;;  %v7768_v11 = vld [vmem:[#allocation10 + $0xc60] sm:$0xf] }
 0x131   :  { %4705 = vmatpush.bf16.msra.mxu0 %v7489_v41  ;;  %v7473_v41 = vor.u32 %v9033_v5, %v7472_v63  ;;  %v7465_v63 = vor.u32 %v9031_v55, %v7464_v42  ;;  %v9125_v5 = vld [vmem:[#allocation10 + $0xcf4] sm:$0xf0]  ;;  %v9107_v16 = vld [vmem:[#allocation10 + $0xc64] sm:$0xf0]  ;;  %v7896_v55 = vld [vmem:[#allocation10 + $0xd60] sm:$0xf] }
 0x132   :  { %4718 = vmatpush.bf16.msra.mxu1 %v7553_v14  ;;  %v7537_v14 = vor.u32 %v9049_v62, %v7536_v6  ;;  %v7529_v6 = vor.u32 %v9047_v36, %v7528_v2  ;;  %v7593_v62 = vor.u32 %v9063_v23, %v7592_v49  ;;  %v9123_v42 = vld [vmem:[#allocation10 + $0xce4] sm:$0xf0]  ;;  %v7769_v2 = vor.u32 %v9107_v16, %v7768_v11  ;;  %v9105_v23 = vld [vmem:[#allocation10 + $0xc54] sm:$0xf0] }
 0x133   :  { %4731 = vmatpush.bf16.msra.mxu2 %v7617_v29  ;;  %v7601_v29 = vor.u32 %v9065_v18, %v7600_v4  ;;  %v7968_v4 = vld [vmem:[#allocation10 + $0xdf0] sm:$0xf]  ;;  %v9157_v18 = vld [vmem:[#allocation10 + $0xdf4] sm:$0xf0]  ;;  %v7833_v36 = vor.u32 %v9123_v42, %v7832_v37  ;;  %v7897_v49 = vor.u32 %v9139_v38, %v7896_v55 }
 0x134   :  { %4744 = vmatpush.bf16.msra.mxu3 %v7681_v58  ;;  %v7665_v58 = vor.u32 %v9081_v22, %v7664_v51  ;;  %v7777_v51 = vor.u32 %v9109_v59, %v7776_v0  ;;  %v9121_v0 = vld [vmem:[#allocation10 + $0xcd4] sm:$0xf0]  ;;  %v7888_v59 = vld [vmem:[#allocation10 + $0xd50] sm:$0xf] }
 0x135   :  { %4706 = vmatpush.bf16.msra.mxu0 %v7481_v54  ;;  %v7840_v54 = vld [vmem:[#allocation10 + $0xcf0] sm:$0xf]  ;;  %v9153_v16 = vld [vmem:[#allocation10 + $0xdd4] sm:$0xf0] }
 0x136   :  { %4719 = vmatpush.bf16.msra.mxu1 %v7545_v52  ;;  %v7904_v52 = vld [vmem:[#allocation10 + $0xd70] sm:$0xf]  ;;  %v7841_v22 = vor.u32 %v9125_v5, %v7840_v54  ;;  %v9137_v54 = vld [vmem:[#allocation10 + $0xd54] sm:$0xf0] }
 0x137   :  { %4732 = vmatpush.bf16.msra.mxu2 %v7609_v56  ;;  %v9141_v56 = vld [vmem:[#allocation10 + $0xd74] sm:$0xf0]  ;;  %v7889_v5 = vor.u32 %v9137_v54, %v7888_v59  ;;  %v7744_v55 = vld [vmem:[#allocation10 + $0xc30] sm:$0xf] }
 0x138   :  { %4745 = vmatpush.bf16.msra.mxu3 %v7673_v9  ;;  %v7657_v9 = vor.u32 %v9079_v1, %v7656_v57  ;;  %v7905_v46 = vor.u32 %v9141_v56, %v7904_v52  ;;  %v7824_v57 = vld [vmem:[#allocation10 + $0xcd0] sm:$0xf]  ;;  %v7752_v52 = vld [vmem:[#allocation10 + $0xc40] sm:$0xf]  ;;  %v9103_v56 = vld [vmem:[#allocation10 + $0xc44] sm:$0xf0] }
 0x139   :  { %4707 = vmatpush.bf16.msra.mxu0 %v7473_v41  ;;  %v7969_v41 = vor.u32 %v9157_v18, %v7968_v4  ;;  %v7825_v37 = vor.u32 %v9121_v0, %v7824_v57  ;;  %v9119_v4 = vld [vmem:[#allocation10 + $0xcc4] sm:$0xf0]  ;;  %v7880_v18 = vld [vmem:[#allocation10 + $0xd40] sm:$0xf]  ;;  %v9133_v57 = vld [vmem:[#allocation10 + $0xd34] sm:$0xf0] }
 0x13a   :  { %4720 = vmatpush.bf16.msra.mxu1 %v7537_v14  ;;  %v7960_v14 = vld [vmem:[#allocation10 + $0xde0] sm:$0xf]  ;;  %v9149_v0 = vld [vmem:[#allocation10 + $0xdb4] sm:$0xf0] }
 0x13b   :  { %4733 = vmatpush.bf16.msra.mxu2 %v7601_v29  ;;  %v9155_v29 = vld [vmem:[#allocation10 + $0xde4] sm:$0xf0] }
 0x13c   :  { %4746 = vmatpush.bf16.msra.mxu3 %v7665_v58  ;;  %v7760_v58 = vld [vmem:[#allocation10 + $0xc50] sm:$0xf]  ;;  %v7961_v1 = vor.u32 %v9155_v29, %v7960_v14  ;;  %v9101_v14 = vld [vmem:[#allocation10 + $0xc34] sm:$0xf0] }
 0x13d   :  { %4708 = vmatpush.bf16.msra.mxu0 %v7465_v63  ;;  %v7952_v63 = vld [vmem:[#allocation10 + $0xdd0] sm:$0xf]  ;;  %v7761_v38 = vor.u32 %v9105_v23, %v7760_v58  ;;  %v4502_v11 = vpop.f32.mrf.mxu0  ;;  %v9117_v58 = vld [vmem:[#allocation10 + $0xcb4] sm:$0xf0]  ;;  %v7745_v54 = vor.u32 %v9101_v14, %v7744_v55 }
 0x13e   :  { %4721 = vmatpush.bf16.msra.mxu1 %v7529_v6  ;;  %v7816_v6 = vld [vmem:[#allocation10 + $0xcc0] sm:$0xf]  ;;  %v7808_v29 = vld [vmem:[#allocation10 + $0xcb0] sm:$0xf]  ;;  %v9097_v14 = vld [vmem:[#allocation10 + $0xc14] sm:$0xf0] }
 0x13f   :  { %4734 = vmatpush.bf16.msra.mxu2 %v7593_v62  ;;  %v7953_v62 = vor.u32 %v9153_v16, %v7952_v63  ;;  %v7872_v23 = vld [vmem:[#allocation10 + $0xd30] sm:$0xf]  ;;  %v7809_v63 = vor.u32 %v9117_v58, %v7808_v29 }
 0x140   :  { %4747 = vmatpush.bf16.msra.mxu3 %v7657_v9  ;;  %4709 = vmatmul.bf16.vlgmr.msra.gmra.mxu0 %v9699_v39  ;;  %v9135_v9 = vld [vmem:[#allocation10 + $0xd44] sm:$0xf0]  ;;  %v7873_v16 = vor.u32 %v9133_v57, %v7872_v23  ;;  %v7728_v55 = vld [vmem:[#allocation10 + $0xc10] sm:$0xf]  ;;  %v9129_v23 = vld [vmem:[#allocation10 + $0xd14] sm:$0xf0] }
 0x141   :  { %4753 = vmatpush.bf16.msrb.mxu0 %v7777_v51  ;;  %4722 = vmatmul.bf16.vlgmr.msra.gmra.mxu1 %v9703_v43  ;;  %v7944_v51 = vld [vmem:[#allocation10 + $0xdc0] sm:$0xf]  ;;  %v7881_v42 = vor.u32 %v9135_v9, %v7880_v18  ;;  %v7792_v29 = vld [vmem:[#allocation10 + $0xc90] sm:$0xf] }
 0x142   :  { %4766 = vmatpush.bf16.msrb.mxu1 %v7841_v22  ;;  %4735 = vmatmul.bf16.vlgmr.msra.gmra.mxu2 %v9701_v40  ;;  %v9151_v22 = vld [vmem:[#allocation10 + $0xdc4] sm:$0xf0]  ;;  %v7928_v9 = vld [vmem:[#allocation10 + $0xda0] sm:$0xf]  ;;  %v7856_v58 = vld [vmem:[#allocation10 + $0xd10] sm:$0xf] }
 0x143   :  { %4779 = vmatpush.bf16.msrb.mxu2 %v7905_v46  ;;  %4748 = vmatmul.bf16.vlgmr.msra.gmra.mxu3 %v9705_v45  ;;  %v7753_v46 = vor.u32 %v9103_v56, %v7752_v52  ;;  %v9115_v56 = vld [vmem:[#allocation10 + $0xca4] sm:$0xf0]  ;;  %v7920_v57 = vld [vmem:[#allocation10 + $0xd90] sm:$0xf] }
 0x144   :  { %4792 = vmatpush.bf16.msrb.mxu3 %v7969_v41  ;;  %v7817_v41 = vor.u32 %v9119_v4, %v7816_v6  ;;  %v7864_v6 = vld [vmem:[#allocation10 + $0xd20] sm:$0xf] }
 0x145   :  { %4754 = vmatpush.bf16.msrb.mxu0 %v7769_v2  ;;  %v4503_v2 = vadd.f32 %v4502_v11, %v9775_v20  ;;  %v4528_v52 = vpop.f32.mrf.mxu2  ;;  %v4504_v11 = vpop.f32.mrf.mxu0 }
 0x146   :  { %4767 = vmatpush.bf16.msrb.mxu1 %v7833_v36  ;;  %v4515_v36 = vpop.f32.mrf.mxu1  ;;  %v4541_v18 = vpop.f32.mrf.mxu3  ;;  %v9189_v11 = vld [vmem:[#allocation10 + $0xef4] sm:$0xf0] }
 0x147   :  { %4780 = vmatpush.bf16.msrb.mxu2 %v7897_v49  ;;  %v7945_v49 = vor.u32 %v9151_v22, %v7944_v51  ;;  %v4516_v59 = vadd.f32 %v4515_v36, %v4503_v2  ;;  %v9147_v51 = vld [vmem:[#allocation10 + $0xda4] sm:$0xf0] }
 0x148   :  { %4793 = vmatpush.bf16.msrb.mxu3 %v7961_v1  ;;  %v7936_v1 = vld [vmem:[#allocation10 + $0xdb0] sm:$0xf]  ;;  %v7929_v36 = vor.u32 %v9147_v51, %v7928_v9  ;;  %v9173_v9 = vld [vmem:[#allocation10 + $0xe74] sm:$0xf0] }
 0x149   :  { %4755 = vmatpush.bf16.msrb.mxu0 %v7761_v38  ;;  %v7736_v38 = vld [vmem:[#allocation10 + $0xc20] sm:$0xf]  ;;  %v7937_v20 = vor.u32 %v9149_v0, %v7936_v1  ;;  %v4529_v4 = vadd.f32 %v4528_v52, %v4516_v59  ;;  %v9145_v1 = vld [vmem:[#allocation10 + $0xd94] sm:$0xf0]  ;;  %v7729_v0 = vor.u32 %v9097_v14, %v7728_v55  ;;  %v8096_v51 = vld [vmem:[#allocation10 + $0xef0] sm:$0xf] }
 0x14a   :  { %4768 = vmatpush.bf16.msrb.mxu1 %v7825_v37  ;;  %v9099_v37 = vld [vmem:[#allocation10 + $0xc24] sm:$0xf0]  ;;  %v7720_v59 = vld [vmem:[#allocation10 + $0xc00] sm:$0xf] }
 0x14b   :  { %4781 = vmatpush.bf16.msrb.mxu2 %v7889_v5  ;;  %v7800_v5 = vld [vmem:[#allocation10 + $0xca0] sm:$0xf]  ;;  %v7737_v22 = vor.u32 %v9099_v37, %v7736_v38  ;;  %v9111_v37 = vld [vmem:[#allocation10 + $0xc84] sm:$0xf0] }
 0x14c   :  { %4794 = vmatpush.bf16.msrb.mxu3 %v7953_v62  ;;  %v9131_v62 = vld [vmem:[#allocation10 + $0xd24] sm:$0xf0]  ;;  %v7784_v38 = vld [vmem:[#allocation10 + $0xc80] sm:$0xf] }
 0x14d   :  { %4756 = vmatpush.bf16.msrb.mxu0 %v7753_v46  ;;  %v9782_v46 = vadd.f32 %v4541_v18, %v4529_v4  ;;  %v4530_v52 = vpop.f32.mrf.mxu2  ;;  %v8032_v18 = vld [vmem:[#allocation10 + $0xe70] sm:$0xf]  ;;  %v7785_v55 = vor.u32 %v9111_v37, %v7784_v38 }
 0x14e   :  { %4769 = vmatpush.bf16.msrb.mxu1 %v7817_v41  ;;  %v7801_v41 = vor.u32 %v9115_v56, %v7800_v5  ;;  %v4517_v2 = vpop.f32.mrf.mxu1  ;;  %v7848_v5 = vld [vmem:[#allocation10 + $0xd00] sm:$0xf]  ;;  %v9127_v56 = vld [vmem:[#allocation10 + $0xd04] sm:$0xf0]  ;;  %v4543_v4 = vpop.f32.mrf.mxu3 }
 0x14f   :  { %4782 = vmatpush.bf16.msrb.mxu2 %v7881_v42  ;;  %v7865_v42 = vor.u32 %v9131_v62, %v7864_v6  ;;  %v7912_v6 = vld [vmem:[#allocation10 + $0xd80] sm:$0xf]  ;;  %v9143_v62 = vld [vmem:[#allocation10 + $0xd84] sm:$0xf0]  ;;  %v7849_v14 = vor.u32 %v9127_v56, %v7848_v5  ;;  %v9221_v2 = vld [vmem:[#allocation10 + $0xff4] sm:$0xf0] }
 0x150   :  { %4795 = vmatpush.bf16.msrb.mxu3 %v7945_v49  ;;  %v9113_v49 = vld [vmem:[#allocation10 + $0xc94] sm:$0xf0]  ;;  %v8088_v52 = vld [vmem:[#allocation10 + $0xee0] sm:$0xf]  ;;  %v9203_v4 = vld [vmem:[#allocation10 + $0xf64] sm:$0xf0] }
 0x151   :  { %4757 = vmatpush.bf16.msrb.mxu0 %v7745_v54  ;;  %v9095_v54 = vld [vmem:[#allocation10 + $0xc04] sm:$0xf0]  ;;  %v9169_v56 = vld [vmem:[#allocation10 + $0xe54] sm:$0xf0] }
 0x152   :  { %4770 = vmatpush.bf16.msrb.mxu1 %v7809_v63  ;;  %v7793_v63 = vor.u32 %v9113_v49, %v7792_v29  ;;  %v8224_v29 = vld [vmem:[#allocation10 + $0xff0] sm:$0xf]  ;;  %v8033_v49 = vor.u32 %v9173_v9, %v8032_v18  ;;  %v9185_v18 = vld [vmem:[#allocation10 + $0xed4] sm:$0xf0] }
 0x153   :  { %4783 = vmatpush.bf16.msrb.mxu2 %v7873_v16  ;;  %v7857_v16 = vor.u32 %v9129_v23, %v7856_v58  ;;  %v8097_v58 = vor.u32 %v9189_v11, %v8096_v51  ;;  %v8144_v9 = vld [vmem:[#allocation10 + $0xf50] sm:$0xf]  ;;  %v9201_v51 = vld [vmem:[#allocation10 + $0xf54] sm:$0xf0] }
 0x154   :  { %4796 = vmatpush.bf16.msrb.mxu3 %v7937_v20  ;;  %v7921_v20 = vor.u32 %v9145_v1, %v7920_v57  ;;  %v8024_v57 = vld [vmem:[#allocation10 + $0xe60] sm:$0xf]  ;;  %v9171_v1 = vld [vmem:[#allocation10 + $0xe64] sm:$0xf0]  ;;  %v9217_v11 = vld [vmem:[#allocation10 + $0xfd4] sm:$0xf0] }
 0x155   :  { %4758 = vmatpush.bf16.msrb.mxu0 %v7737_v22  ;;  %v7721_v22 = vor.u32 %v9095_v54, %v7720_v59  ;;  %v9187_v59 = vld [vmem:[#allocation10 + $0xee4] sm:$0xf0]  ;;  %v8152_v54 = vld [vmem:[#allocation10 + $0xf60] sm:$0xf]  ;;  %v8025_v38 = vor.u32 %v9171_v1, %v8024_v57 }
 0x156   :  { %4771 = vmatpush.bf16.msrb.mxu1 %v7801_v41  ;;  %v8160_v41 = vld [vmem:[#allocation10 + $0xf70] sm:$0xf]  ;;  %v8089_v37 = vor.u32 %v9187_v59, %v8088_v52  ;;  %v8153_v5 = vor.u32 %v9203_v4, %v8152_v54  ;;  %v8200_v1 = vld [vmem:[#allocation10 + $0xfc0] sm:$0xf]  ;;  %v9215_v52 = vld [vmem:[#allocation10 + $0xfc4] sm:$0xf0] }
 0x157   :  { %4784 = vmatpush.bf16.msrb.mxu2 %v7865_v42  ;;  %v9205_v42 = vld [vmem:[#allocation10 + $0xf74] sm:$0xf0] }
 0x158   :  { %4797 = vmatpush.bf16.msrb.mxu3 %v7929_v36  ;;  %v7913_v36 = vor.u32 %v9143_v62, %v7912_v6  ;;  %v8161_v23 = vor.u32 %v9205_v42, %v8160_v41  ;;  %v8080_v6 = vld [vmem:[#allocation10 + $0xed0] sm:$0xf] }
 0x159   :  { %4759 = vmatpush.bf16.msrb.mxu0 %v7729_v0  ;;  %v8225_v0 = vor.u32 %v9221_v2, %v8224_v29  ;;  %v8081_v42 = vor.u32 %v9185_v18, %v8080_v6  ;;  %v9167_v29 = vld [vmem:[#allocation10 + $0xe44] sm:$0xf0]  ;;  %v8072_v2 = vld [vmem:[#allocation10 + $0xec0] sm:$0xf]  ;;  %v8128_v6 = vld [vmem:[#allocation10 + $0xf30] sm:$0xf] }
 0x15a   :  { %4772 = vmatpush.bf16.msrb.mxu1 %v7793_v63  ;;  %v8216_v63 = vld [vmem:[#allocation10 + $0xfe0] sm:$0xf]  ;;  %v8192_v18 = vld [vmem:[#allocation10 + $0xfb0] sm:$0xf] }
 0x15b   :  { %4785 = vmatpush.bf16.msrb.mxu2 %v7857_v16  ;;  %v9219_v16 = vld [vmem:[#allocation10 + $0xfe4] sm:$0xf0] }
 0x15c   :  { %4798 = vmatpush.bf16.msrb.mxu3 %v7921_v20  ;;  %v8016_v20 = vld [vmem:[#allocation10 + $0xe50] sm:$0xf]  ;;  %v8217_v62 = vor.u32 %v9219_v16, %v8216_v63 }
 0x15d   :  { %4760 = vmatpush.bf16.msrb.mxu0 %v7721_v22  ;;  %v8208_v22 = vld [vmem:[#allocation10 + $0xfd0] sm:$0xf]  ;;  %v8017_v41 = vor.u32 %v9169_v56, %v8016_v20  ;;  %v4554_v57 = vpop.f32.mrf.mxu0  ;;  %v9181_v56 = vld [vmem:[#allocation10 + $0xeb4] sm:$0xf0] }
 0x15e   :  { %4773 = vmatpush.bf16.msrb.mxu1 %v7785_v55  ;;  %v8145_v55 = vor.u32 %v9201_v51, %v8144_v9  ;;  %v4567_v54 = vpop.f32.mrf.mxu1  ;;  %v8000_v16 = vld [vmem:[#allocation10 + $0xe30] sm:$0xf]  ;;  %v9213_v9 = vld [vmem:[#allocation10 + $0xfb4] sm:$0xf0] }
 0x15f   :  { %4786 = vmatpush.bf16.msrb.mxu2 %v7849_v14  ;;  %v8008_v14 = vld [vmem:[#allocation10 + $0xe40] sm:$0xf] }
 0x160   :  { %4799 = vmatpush.bf16.msrb.mxu3 %v7913_v36  ;;  %4761 = vmatmul.bf16.vlgmr.msrb.gmra.mxu0 %v9720_v25  ;;  %v8209_v36 = vor.u32 %v9217_v11, %v8208_v22  ;;  %v8009_v59 = vor.u32 %v9167_v29, %v8008_v14  ;;  %v7992_v11 = vld [vmem:[#allocation10 + $0xe20] sm:$0xf]  ;;  %v9179_v29 = vld [vmem:[#allocation10 + $0xea4] sm:$0xf0] }
 0x161   :  { %4805 = vmatpush.bf16.msra.mxu0 %v8033_v49  ;;  %4774 = vmatmul.bf16.vlgmr.msrb.gmra.mxu1 %v9724_v17  ;;  %v9183_v49 = vld [vmem:[#allocation10 + $0xec4] sm:$0xf0] }
 0x162   :  { %4818 = vmatpush.bf16.msra.mxu1 %v8097_v58  ;;  %4787 = vmatmul.bf16.vlgmr.msrb.gmra.mxu2 %v9722_v13  ;;  %v8136_v58 = vld [vmem:[#allocation10 + $0xf40] sm:$0xf]  ;;  %v8073_v4 = vor.u32 %v9183_v49, %v8072_v2 }
 0x163   :  { %4831 = vmatpush.bf16.msra.mxu2 %v8161_v23  ;;  %4800 = vmatmul.bf16.vlgmr.msrb.gmra.mxu3 %v9726_v27  ;;  %v9199_v23 = vld [vmem:[#allocation10 + $0xf44] sm:$0xf0]  ;;  %v8120_v2 = vld [vmem:[#allocation10 + $0xf20] sm:$0xf] }
 0x164   :  { %4844 = vmatpush.bf16.msra.mxu3 %v8225_v0  ;;  %v4555_v0 = vadd.f32 %v4554_v57, %v9782_v46  ;;  %v8137_v63 = vor.u32 %v9199_v23, %v8136_v58  ;;  %v8184_v23 = vld [vmem:[#allocation10 + $0xfa0] sm:$0xf]  ;;  %v9211_v57 = vld [vmem:[#allocation10 + $0xfa4] sm:$0xf0] }
 0x165   :  { %4806 = vmatpush.bf16.msra.mxu0 %v8025_v38  ;;  %v9165_v38 = vld [vmem:[#allocation10 + $0xe34] sm:$0xf0]  ;;  %v4580_v14 = vpop.f32.mrf.mxu2 }
 0x166   :  { %4819 = vmatpush.bf16.msra.mxu1 %v8089_v37  ;;  %v8064_v37 = vld [vmem:[#allocation10 + $0xeb0] sm:$0xf]  ;;  %v4568_v20 = vadd.f32 %v4567_v54, %v4555_v0  ;;  %v8001_v51 = vor.u32 %v9165_v38, %v8000_v16  ;;  %v4593_v58 = vpop.f32.mrf.mxu3  ;;  %v4569_v0 = vpop.f32.mrf.mxu1  ;;  %v9161_v16 = vld [vmem:[#allocation10 + $0xe14] sm:$0xf0] }
 0x167   :  { %4832 = vmatpush.bf16.msra.mxu2 %v8153_v5  ;;  %v8201_v5 = vor.u32 %v9215_v52, %v8200_v1  ;;  %v8065_v46 = vor.u32 %v9181_v56, %v8064_v37  ;;  %v4556_v1 = vpop.f32.mrf.mxu0  ;;  %v8048_v38 = vld [vmem:[#allocation10 + $0xe90] sm:$0xf]  ;;  %v8185_v37 = vor.u32 %v9211_v57, %v8184_v23  ;;  %v9193_v56 = vld [vmem:[#allocation10 + $0xf14] sm:$0xf0] }
 0x168   :  { %4845 = vmatpush.bf16.msra.mxu3 %v8217_v62  ;;  %v9197_v62 = vld [vmem:[#allocation10 + $0xf34] sm:$0xf0]  ;;  %v4581_v49 = vadd.f32 %v4580_v14, %v4568_v20  ;;  %v8112_v20 = vld [vmem:[#allocation10 + $0xf10] sm:$0xf] }
 0x169   :  { %4807 = vmatpush.bf16.msra.mxu0 %v8017_v41  ;;  %v8129_v22 = vor.u32 %v9197_v62, %v8128_v6  ;;  %v9163_v41 = vld [vmem:[#allocation10 + $0xe24] sm:$0xf0]  ;;  %v8176_v6 = vld [vmem:[#allocation10 + $0xf90] sm:$0xf]  ;;  %v9209_v62 = vld [vmem:[#allocation10 + $0xf94] sm:$0xf0] }
 0x16a   :  { %4820 = vmatpush.bf16.msra.mxu1 %v8081_v42  ;;  %v8056_v42 = vld [vmem:[#allocation10 + $0xea0] sm:$0xf]  ;;  %v7993_v52 = vor.u32 %v9163_v41, %v7992_v11  ;;  %v9175_v41 = vld [vmem:[#allocation10 + $0xe84] sm:$0xf0]  ;;  %v8177_v14 = vor.u32 %v9209_v62, %v8176_v6  ;;  %v8352_v23 = vld [vmem:[#allocation10 + $0x10f0] sm:$0xf] }
 0x16b   :  { %4833 = vmatpush.bf16.msra.mxu2 %v8145_v55  ;;  %v8193_v55 = vor.u32 %v9213_v9, %v8192_v18  ;;  %v8057_v54 = vor.u32 %v9179_v29, %v8056_v42  ;;  %v7976_v9 = vld [vmem:[#allocation10 + $0xe00] sm:$0xf]  ;;  %v8416_v0 = vld [vmem:[#allocation10 + $0x1170] sm:$0xf]  ;;  %v9235_v62 = vld [vmem:[#allocation10 + $0x1064] sm:$0xf0] }
 0x16c   :  { %4846 = vmatpush.bf16.msra.mxu3 %v8209_v36  ;;  %v9195_v36 = vld [vmem:[#allocation10 + $0xf24] sm:$0xf0]  ;;  %v8040_v11 = vld [vmem:[#allocation10 + $0xe80] sm:$0xf] }
 0x16d   :  { %4808 = vmatpush.bf16.msra.mxu0 %v8009_v59  ;;  %v9789_v59 = vadd.f32 %v4593_v58, %v4581_v49  ;;  %v8104_v42 = vld [vmem:[#allocation10 + $0xf00] sm:$0xf]  ;;  %v8288_v49 = vld [vmem:[#allocation10 + $0x1070] sm:$0xf]  ;;  %v9237_v58 = vld [vmem:[#allocation10 + $0x1074] sm:$0xf0] }
 0x16e   :  { %4821 = vmatpush.bf16.msra.mxu1 %v8073_v4  ;;  %v8121_v4 = vor.u32 %v9195_v36, %v8120_v2  ;;  %v8168_v29 = vld [vmem:[#allocation10 + $0xf80] sm:$0xf]  ;;  %v9207_v2 = vld [vmem:[#allocation10 + $0xf84] sm:$0xf0]  ;;  %v4582_v36 = vpop.f32.mrf.mxu2  ;;  %v4595_v57 = vpop.f32.mrf.mxu3 }
 0x16f   :  { %4834 = vmatpush.bf16.msra.mxu2 %v8137_v63  ;;  %v7984_v63 = vld [vmem:[#allocation10 + $0xe10] sm:$0xf]  ;;  %v8280_v6 = vld [vmem:[#allocation10 + $0x1060] sm:$0xf]  ;;  %v9267_v57 = vld [vmem:[#allocation10 + $0x1164] sm:$0xf0] }
 0x170   :  { %4847 = vmatpush.bf16.msra.mxu3 %v8201_v5  ;;  %v9177_v5 = vld [vmem:[#allocation10 + $0xe94] sm:$0xf0]  ;;  %v7985_v18 = vor.u32 %v9161_v16, %v7984_v63  ;;  %v8480_v16 = vld [vmem:[#allocation10 + $0x11f0] sm:$0xf]  ;;  %v8344_v36 = vld [vmem:[#allocation10 + $0x10e0] sm:$0xf] }
 0x171   :  { %4809 = vmatpush.bf16.msra.mxu0 %v8001_v51  ;;  %v9159_v51 = vld [vmem:[#allocation10 + $0xe04] sm:$0xf0] }
 0x172   :  { %4822 = vmatpush.bf16.msra.mxu1 %v8065_v46  ;;  %v8049_v46 = vor.u32 %v9177_v5, %v8048_v38  ;;  %v7977_v1 = vor.u32 %v9159_v51, %v7976_v9  ;;  %v9285_v38 = vld [vmem:[#allocation10 + $0x11f4] sm:$0xf0]  ;;  %v8289_v5 = vor.u32 %v9237_v58, %v8288_v49  ;;  %v9251_v9 = vld [vmem:[#allocation10 + $0x10e4] sm:$0xf0]  ;;  %v8408_v51 = vld [vmem:[#allocation10 + $0x1160] sm:$0xf] }
 0x173   :  { %4835 = vmatpush.bf16.msra.mxu2 %v8129_v22  ;;  %v8113_v22 = vor.u32 %v9193_v56, %v8112_v20  ;;  %v9249_v49 = vld [vmem:[#allocation10 + $0x10d4] sm:$0xf0]  ;;  %v8400_v58 = vld [vmem:[#allocation10 + $0x1150] sm:$0xf] }
 0x174   :  { %4848 = vmatpush.bf16.msra.mxu3 %v8193_v55  ;;  %v9191_v55 = vld [vmem:[#allocation10 + $0xf04] sm:$0xf0] }
 0x175   :  { %4810 = vmatpush.bf16.msra.mxu0 %v7993_v52  ;;  %v9253_v52 = vld [vmem:[#allocation10 + $0x10f4] sm:$0xf0]  ;;  %v8105_v63 = vor.u32 %v9191_v55, %v8104_v42  ;;  %v8409_v42 = vor.u32 %v9267_v57, %v8408_v51 }
 0x176   :  { %4823 = vmatpush.bf16.msra.mxu1 %v8057_v54  ;;  %v9269_v54 = vld [vmem:[#allocation10 + $0x1174] sm:$0xf0]  ;;  %v8353_v20 = vor.u32 %v9253_v52, %v8352_v23 }
 0x177   :  { %4836 = vmatpush.bf16.msra.mxu2 %v8121_v4  ;;  %v8041_v4 = vor.u32 %v9175_v41, %v8040_v11  ;;  %v8417_v56 = vor.u32 %v9269_v54, %v8416_v0  ;;  %v8281_v11 = vor.u32 %v9235_v62, %v8280_v6  ;;  %v8345_v41 = vor.u32 %v9251_v9, %v8344_v36  ;;  %v9233_v55 = vld [vmem:[#allocation10 + $0x1054] sm:$0xf0]  ;;  %v8456_v62 = vld [vmem:[#allocation10 + $0x11c0] sm:$0xf]  ;;  %v9279_v36 = vld [vmem:[#allocation10 + $0x11c4] sm:$0xf0] }
 0x178   :  { %4849 = vmatpush.bf16.msra.mxu3 %v8185_v37  ;;  %v8169_v37 = vor.u32 %v9207_v2, %v8168_v29  ;;  %v8336_v29 = vld [vmem:[#allocation10 + $0x10d0] sm:$0xf]  ;;  %v9265_v23 = vld [vmem:[#allocation10 + $0x1154] sm:$0xf0] }
 0x179   :  { %4811 = vmatpush.bf16.msra.mxu0 %v7985_v18  ;;  %v8481_v18 = vor.u32 %v9285_v38, %v8480_v16  ;;  %v9281_v52 = vld [vmem:[#allocation10 + $0x11d4] sm:$0xf0]  ;;  %v8337_v54 = vor.u32 %v9249_v49, %v8336_v29  ;;  %v9231_v16 = vld [vmem:[#allocation10 + $0x1044] sm:$0xf0]  ;;  %v8328_v38 = vld [vmem:[#allocation10 + $0x10c0] sm:$0xf] }
 0x17a   :  { %4824 = vmatpush.bf16.msra.mxu1 %v8049_v46  ;;  %v8472_v46 = vld [vmem:[#allocation10 + $0x11e0] sm:$0xf]  ;;  %v8384_v29 = vld [vmem:[#allocation10 + $0x1130] sm:$0xf] }
 0x17b   :  { %4837 = vmatpush.bf16.msra.mxu2 %v8113_v22  ;;  %v9283_v22 = vld [vmem:[#allocation10 + $0x11e4] sm:$0xf0]  ;;  %v8448_v49 = vld [vmem:[#allocation10 + $0x11b0] sm:$0xf] }
 0x17c   :  { %4850 = vmatpush.bf16.msra.mxu3 %v8177_v14  ;;  %v8272_v14 = vld [vmem:[#allocation10 + $0x1050] sm:$0xf]  ;;  %v8473_v2 = vor.u32 %v9283_v22, %v8472_v46 }
 0x17d   :  { %4812 = vmatpush.bf16.msra.mxu0 %v7977_v1  ;;  %v8464_v1 = vld [vmem:[#allocation10 + $0x11d0] sm:$0xf]  ;;  %v8273_v0 = vor.u32 %v9233_v55, %v8272_v14  ;;  %v4606_v6 = vpop.f32.mrf.mxu0  ;;  %v9245_v55 = vld [vmem:[#allocation10 + $0x10b4] sm:$0xf0] }
 0x17e   :  { %4825 = vmatpush.bf16.msra.mxu1 %v8041_v4  ;;  %v8401_v4 = vor.u32 %v9265_v23, %v8400_v58  ;;  %v4619_v51 = vpop.f32.mrf.mxu1  ;;  %v8256_v22 = vld [vmem:[#allocation10 + $0x1030] sm:$0xf]  ;;  %v9277_v58 = vld [vmem:[#allocation10 + $0x11b4] sm:$0xf0] }
 0x17f   :  { %4838 = vmatpush.bf16.msra.mxu2 %v8105_v63  ;;  %v8264_v63 = vld [vmem:[#allocation10 + $0x1040] sm:$0xf] }
 0x180   :  { %4851 = vmatpush.bf16.msra.mxu3 %v8169_v37  ;;  %4813 = vmatmul.bf16.vlgmr.msra.gmra.mxu0 %v9728_v28  ;;  %v8465_v37 = vor.u32 %v9281_v52, %v8464_v1  ;;  %v8265_v9 = vor.u32 %v9231_v16, %v8264_v63  ;;  %v8248_v52 = vld [vmem:[#allocation10 + $0x1020] sm:$0xf]  ;;  %v9243_v16 = vld [vmem:[#allocation10 + $0x10a4] sm:$0xf0] }
 0x181   :  { %4857 = vmatpush.bf16.msrb.mxu0 %v8289_v5  ;;  %4826 = vmatmul.bf16.vlgmr.msra.gmra.mxu1 %v9734_v30  ;;  %v9247_v5 = vld [vmem:[#allocation10 + $0x10c4] sm:$0xf0] }
 0x182   :  { %4870 = vmatpush.bf16.msrb.mxu1 %v8353_v20  ;;  %4839 = vmatmul.bf16.vlgmr.msra.gmra.mxu2 %v9732_v50  ;;  %v8392_v20 = vld [vmem:[#allocation10 + $0x1140] sm:$0xf]  ;;  %v8329_v57 = vor.u32 %v9247_v5, %v8328_v38 }
 0x183   :  { %4883 = vmatpush.bf16.msrb.mxu2 %v8417_v56  ;;  %4852 = vmatmul.bf16.vlgmr.msra.gmra.mxu3 %v9736_v31  ;;  %v9263_v56 = vld [vmem:[#allocation10 + $0x1144] sm:$0xf0]  ;;  %v8376_v38 = vld [vmem:[#allocation10 + $0x1120] sm:$0xf] }
 0x184   :  { %4896 = vmatpush.bf16.msrb.mxu3 %v8481_v18  ;;  %v4607_v18 = vadd.f32 %v4606_v6, %v9789_v59  ;;  %v8393_v46 = vor.u32 %v9263_v56, %v8392_v20  ;;  %v8440_v56 = vld [vmem:[#allocation10 + $0x11a0] sm:$0xf]  ;;  %v9275_v6 = vld [vmem:[#allocation10 + $0x11a4] sm:$0xf0] }
 0x185   :  { %4858 = vmatpush.bf16.msrb.mxu0 %v8281_v11  ;;  %v9229_v11 = vld [vmem:[#allocation10 + $0x1034] sm:$0xf0]  ;;  %v4632_v63 = vpop.f32.mrf.mxu2 }
 0x186   :  { %4871 = vmatpush.bf16.msrb.mxu1 %v8345_v41  ;;  %v8320_v41 = vld [vmem:[#allocation10 + $0x10b0] sm:$0xf]  ;;  %v4620_v14 = vadd.f32 %v4619_v51, %v4607_v18  ;;  %v8257_v23 = vor.u32 %v9229_v11, %v8256_v22  ;;  %v4645_v20 = vpop.f32.mrf.mxu3  ;;  %v4621_v18 = vpop.f32.mrf.mxu1  ;;  %v9225_v22 = vld [vmem:[#allocation10 + $0x1014] sm:$0xf0] }
 0x187   :  { %4884 = vmatpush.bf16.msrb.mxu2 %v8409_v42  ;;  %v8457_v42 = vor.u32 %v9279_v36, %v8456_v62  ;;  %v8321_v59 = vor.u32 %v9245_v55, %v8320_v41  ;;  %v4608_v62 = vpop.f32.mrf.mxu0  ;;  %v8304_v11 = vld [vmem:[#allocation10 + $0x1090] sm:$0xf]  ;;  %v8441_v41 = vor.u32 %v9275_v6, %v8440_v56  ;;  %v9257_v55 = vld [vmem:[#allocation10 + $0x1114] sm:$0xf0]  ;;  %v8740_v56 = vld [vmem:[#allocation10 + $0xf4] sm:$0xf] }
 0x188   :  { %4897 = vmatpush.bf16.msrb.mxu3 %v8473_v2  ;;  %v9261_v2 = vld [vmem:[#allocation10 + $0x1134] sm:$0xf0]  ;;  %v4633_v5 = vadd.f32 %v4632_v63, %v4620_v14  ;;  %v8368_v14 = vld [vmem:[#allocation10 + $0x1110] sm:$0xf]  ;;  %v8756_v18 = vld [vmem:[#allocation10 + $0x174] sm:$0xf] }
 0x189   :  { %4859 = vmatpush.bf16.msrb.mxu0 %v8273_v0  ;;  %v8385_v1 = vor.u32 %v9261_v2, %v8384_v29  ;;  %v9227_v0 = vld [vmem:[#allocation10 + $0x1024] sm:$0xf0]  ;;  %v8432_v29 = vld [vmem:[#allocation10 + $0x1190] sm:$0xf]  ;;  %v9273_v2 = vld [vmem:[#allocation10 + $0x1194] sm:$0xf0] }
 0x18a   :  { %4872 = vmatpush.bf16.msrb.mxu1 %v8337_v54  ;;  %v8312_v54 = vld [vmem:[#allocation10 + $0x10a0] sm:$0xf]  ;;  %v8249_v36 = vor.u32 %v9227_v0, %v8248_v52  ;;  %v9239_v0 = vld [vmem:[#allocation10 + $0x1084] sm:$0xf0]  ;;  %v8433_v63 = vor.u32 %v9273_v2, %v8432_v29  ;;  %v8722_v29 = vld [vmem:[#allocation10 + $0x64] sm:$0xf] }
 0x18b   :  { %4885 = vmatpush.bf16.msrb.mxu2 %v8401_v4  ;;  %v8449_v4 = vor.u32 %v9277_v58, %v8448_v49  ;;  %v8313_v51 = vor.u32 %v9243_v16, %v8312_v54  ;;  %v8232_v58 = vld [vmem:[#allocation10 + $0x1000] sm:$0xf]  ;;  %v6234_v2 = vld [vmem:[#allocation10 + $0x68] sm:$0xf0] }
 0x18c   :  { %4898 = vmatpush.bf16.msrb.mxu3 %v8465_v37  ;;  %v9259_v37 = vld [vmem:[#allocation10 + $0x1124] sm:$0xf0]  ;;  %v8296_v52 = vld [vmem:[#allocation10 + $0x1080] sm:$0xf] }
 0x18d   :  { %4860 = vmatpush.bf16.msrb.mxu0 %v8265_v9  ;;  %v9796_v9 = vadd.f32 %v4645_v20, %v4633_v5  ;;  %v8360_v54 = vld [vmem:[#allocation10 + $0x1100] sm:$0xf]  ;;  %v8724_v5 = vld [vmem:[#allocation10 + $0x74] sm:$0xf]  ;;  %v6242_v20 = vld [vmem:[#allocation10 + $0x78] sm:$0xf0] }
 0x18e   :  { %4873 = vmatpush.bf16.msrb.mxu1 %v8329_v57  ;;  %v8377_v57 = vor.u32 %v9259_v37, %v8376_v38  ;;  %v8424_v16 = vld [vmem:[#allocation10 + $0x1180] sm:$0xf]  ;;  %v9271_v38 = vld [vmem:[#allocation10 + $0x1184] sm:$0xf0]  ;;  %v4634_v37 = vpop.f32.mrf.mxu2  ;;  %v4647_v6 = vpop.f32.mrf.mxu3 }
 0x18f   :  { %4886 = vmatpush.bf16.msrb.mxu2 %v8393_v46  ;;  %v8240_v46 = vld [vmem:[#allocation10 + $0x1010] sm:$0xf]  ;;  %v8738_v37 = vld [vmem:[#allocation10 + $0xe4] sm:$0xf]  ;;  %v6362_v6 = vld [vmem:[#allocation10 + $0x168] sm:$0xf0] }
 0x190   :  { %4899 = vmatpush.bf16.msrb.mxu3 %v8457_v42  ;;  %v9241_v42 = vld [vmem:[#allocation10 + $0x1094] sm:$0xf0]  ;;  %v8241_v49 = vor.u32 %v9225_v22, %v8240_v46  ;;  %v8772_v22 = vld [vmem:[#allocation10 + $0x1f4] sm:$0xf] }
 0x191   :  { %4861 = vmatpush.bf16.msrb.mxu0 %v8257_v23  ;;  %v9223_v23 = vld [vmem:[#allocation10 + $0x1004] sm:$0xf0] }
 0x192   :  { %4874 = vmatpush.bf16.msrb.mxu1 %v8321_v59  ;;  %v8305_v59 = vor.u32 %v9241_v42, %v8304_v11  ;;  %v8233_v62 = vor.u32 %v9223_v23, %v8232_v58  ;;  %v6434_v11 = vld [vmem:[#allocation10 + $0x1f8] sm:$0xf0]  ;;  %v6245_v42 = vor.u32 %v8724_v5, %v6242_v20  ;;  %v6298_v58 = vld [vmem:[#allocation10 + $0xe8] sm:$0xf0]  ;;  %v8754_v23 = vld [vmem:[#allocation10 + $0x164] sm:$0xf] }
 0x193   :  { %4887 = vmatpush.bf16.msrb.mxu2 %v8385_v1  ;;  %v8369_v1 = vor.u32 %v9257_v55, %v8368_v14  ;;  %v6290_v5 = vld [vmem:[#allocation10 + $0xd8] sm:$0xf0]  ;;  %v8752_v20 = vld [vmem:[#allocation10 + $0x154] sm:$0xf] }
 0x194   :  { %4900 = vmatpush.bf16.msrb.mxu3 %v8449_v4  ;;  %v9255_v4 = vld [vmem:[#allocation10 + $0x1104] sm:$0xf0] }
 0x195   :  { %4862 = vmatpush.bf16.msrb.mxu0 %v8249_v36  ;;  %v6306_v36 = vld [vmem:[#allocation10 + $0xf8] sm:$0xf0]  ;;  %v8361_v46 = vor.u32 %v9255_v4, %v8360_v54  ;;  %v6365_v54 = vor.u32 %v8754_v23, %v6362_v6 }
 0x196   :  { %4875 = vmatpush.bf16.msrb.mxu1 %v8313_v51  ;;  %v6370_v51 = vld [vmem:[#allocation10 + $0x178] sm:$0xf0]  ;;  %v6309_v14 = vor.u32 %v8740_v56, %v6306_v36 }
 0x197   :  { %4888 = vmatpush.bf16.msrb.mxu2 %v8377_v57  ;;  %v8297_v57 = vor.u32 %v9239_v0, %v8296_v52  ;;  %v6373_v55 = vor.u32 %v8756_v18, %v6370_v51  ;;  %v6237_v52 = vor.u32 %v8722_v29, %v6234_v2  ;;  %v6301_v0 = vor.u32 %v8738_v37, %v6298_v58  ;;  %v6226_v4 = vld [vmem:[#allocation10 + $0x58] sm:$0xf0]  ;;  %v8766_v2 = vld [vmem:[#allocation10 + $0x1c4] sm:$0xf]  ;;  %v6410_v37 = vld [vmem:[#allocation10 + $0x1c8] sm:$0xf0] }
 0x198   :  { %4901 = vmatpush.bf16.msrb.mxu3 %v8441_v41  ;;  %v8425_v41 = vor.u32 %v9271_v38, %v8424_v16  ;;  %v8736_v16 = vld [vmem:[#allocation10 + $0xd4] sm:$0xf]  ;;  %v6354_v56 = vld [vmem:[#allocation10 + $0x158] sm:$0xf0] }
 0x199   :  { %4863 = vmatpush.bf16.msrb.mxu0 %v8241_v49  ;;  %v6437_v49 = vor.u32 %v8772_v22, %v6434_v11  ;;  %v6418_v36 = vld [vmem:[#allocation10 + $0x1d8] sm:$0xf0]  ;;  %v6293_v51 = vor.u32 %v8736_v16, %v6290_v5  ;;  %v6218_v22 = vld [vmem:[#allocation10 + $0x48] sm:$0xf0]  ;;  %v8734_v11 = vld [vmem:[#allocation10 + $0xc4] sm:$0xf] }
 0x19a   :  { %4876 = vmatpush.bf16.msrb.mxu1 %v8305_v59  ;;  %v8770_v59 = vld [vmem:[#allocation10 + $0x1e4] sm:$0xf]  ;;  %v8748_v16 = vld [vmem:[#allocation10 + $0x134] sm:$0xf] }
 0x19b   :  { %4889 = vmatpush.bf16.msrb.mxu2 %v8369_v1  ;;  %v6426_v1 = vld [vmem:[#allocation10 + $0x1e8] sm:$0xf0]  ;;  %v8764_v5 = vld [vmem:[#allocation10 + $0x1b4] sm:$0xf] }
 0x19c   :  { %4902 = vmatpush.bf16.msrb.mxu3 %v8433_v63  ;;  %v8720_v63 = vld [vmem:[#allocation10 + $0x54] sm:$0xf]  ;;  %v6429_v38 = vor.u32 %v8770_v59, %v6426_v1 }
 0x19d   :  { %4864 = vmatpush.bf16.msrb.mxu0 %v8233_v62  ;;  %v8768_v62 = vld [vmem:[#allocation10 + $0x1d4] sm:$0xf]  ;;  %v6229_v18 = vor.u32 %v8720_v63, %v6226_v4  ;;  %v4658_v29 = vpop.f32.mrf.mxu0  ;;  %v6274_v4 = vld [vmem:[#allocation10 + $0xb8] sm:$0xf0] }
 0x19e   :  { %4877 = vmatpush.bf16.msrb.mxu1 %v8297_v57  ;;  %v6357_v57 = vor.u32 %v8752_v20, %v6354_v56  ;;  %v4671_v23 = vpop.f32.mrf.mxu1  ;;  %v8716_v1 = vld [vmem:[#allocation10 + $0x34] sm:$0xf]  ;;  %v6402_v20 = vld [vmem:[#allocation10 + $0x1b8] sm:$0xf0] }
 0x19f   :  { %4890 = vmatpush.bf16.msrb.mxu2 %v8361_v46  ;;  %v8718_v46 = vld [vmem:[#allocation10 + $0x44] sm:$0xf] }
 0x1a0   :  { %4903 = vmatpush.bf16.msrb.mxu3 %v8425_v41  ;;  %4865 = vmatmul.bf16.vlgmr.msrb.gmra.mxu0 %v9751_v19  ;;  %v6421_v41 = vor.u32 %v8768_v62, %v6418_v36  ;;  %v6221_v58 = vor.u32 %v8718_v46, %v6218_v22  ;;  %v8714_v36 = vld [vmem:[#allocation10 + $0x24] sm:$0xf]  ;;  %v6266_v22 = vld [vmem:[#allocation10 + $0xa8] sm:$0xf0] }
 0x1a1   :  { %4909 = vmatpush.bf16.msra.mxu0 %v6245_v42  ;;  %4878 = vmatmul.bf16.vlgmr.msrb.gmra.mxu1 %v9755_v3  ;;  %v6282_v42 = vld [vmem:[#allocation10 + $0xc8] sm:$0xf0] }
 0x1a2   :  { %4922 = vmatpush.bf16.msra.mxu1 %v6309_v14  ;;  %4891 = vmatmul.bf16.vlgmr.msrb.gmra.mxu2 %v9753_v34  ;;  %v8750_v14 = vld [vmem:[#allocation10 + $0x144] sm:$0xf]  ;;  %v6285_v6 = vor.u32 %v8734_v11, %v6282_v42 }
 0x1a3   :  { %4935 = vmatpush.bf16.msra.mxu2 %v6373_v55  ;;  %4904 = vmatmul.bf16.vlgmr.msrb.gmra.mxu3 %v9746_v35  ;;  %v6346_v55 = vld [vmem:[#allocation10 + $0x148] sm:$0xf0]  ;;  %v8746_v11 = vld [vmem:[#allocation10 + $0x124] sm:$0xf] }
 0x1a4   :  { %4948 = vmatpush.bf16.msra.mxu3 %v6437_v49  ;;  %v4659_v49 = vadd.f32 %v4658_v29, %v9796_v9  ;;  %v6349_v59 = vor.u32 %v8750_v14, %v6346_v55  ;;  %v8762_v55 = vld [vmem:[#allocation10 + $0x1a4] sm:$0xf]  ;;  %v6394_v29 = vld [vmem:[#allocation10 + $0x1a8] sm:$0xf0] }
 0x1a5   :  { %4910 = vmatpush.bf16.msra.mxu0 %v6237_v52  ;;  %v6210_v52 = vld [vmem:[#allocation10 + $0x38] sm:$0xf0]  ;;  %v4684_v46 = vpop.f32.mrf.mxu2 }
 0x1a6   :  { %4923 = vmatpush.bf16.msra.mxu1 %v6301_v0  ;;  %v8732_v0 = vld [vmem:[#allocation10 + $0xb4] sm:$0xf]  ;;  %v4672_v63 = vadd.f32 %v4671_v23, %v4659_v49  ;;  %v6213_v56 = vor.u32 %v8716_v1, %v6210_v52  ;;  %v4697_v14 = vpop.f32.mrf.mxu3  ;;  %v4673_v49 = vpop.f32.mrf.mxu1  ;;  %v6194_v1 = vld [vmem:[#allocation10 + $0x18] sm:$0xf0] }
 0x1a7   :  { %4936 = vmatpush.bf16.msra.mxu2 %v6365_v54  ;;  %v6413_v54 = vor.u32 %v8766_v2, %v6410_v37  ;;  %v6277_v9 = vor.u32 %v8732_v0, %v6274_v4  ;;  %v4660_v2 = vpop.f32.mrf.mxu0  ;;  %v8728_v52 = vld [vmem:[#allocation10 + $0x94] sm:$0xf]  ;;  %v6397_v0 = vor.u32 %v8762_v55, %v6394_v29  ;;  %v6322_v4 = vld [vmem:[#allocation10 + $0x118] sm:$0xf0] }
 0x1a8   :  { %4949 = vmatpush.bf16.msra.mxu3 %v6429_v38  ;;  %v6338_v38 = vld [vmem:[#allocation10 + $0x138] sm:$0xf0]  ;;  %v4685_v42 = vadd.f32 %v4684_v46, %v4672_v63  ;;  %v8744_v63 = vld [vmem:[#allocation10 + $0x114] sm:$0xf] }
 0x1a9   :  { %4911 = vmatpush.bf16.msra.mxu0 %v6229_v18  ;;  %v6341_v62 = vor.u32 %v8748_v16, %v6338_v38  ;;  %v6202_v18 = vld [vmem:[#allocation10 + $0x28] sm:$0xf0]  ;;  %v8760_v16 = vld [vmem:[#allocation10 + $0x194] sm:$0xf]  ;;  %v6386_v38 = vld [vmem:[#allocation10 + $0x198] sm:$0xf0] }
 0x1aa   :  { %4924 = vmatpush.bf16.msra.mxu1 %v6293_v51  ;;  %v8730_v51 = vld [vmem:[#allocation10 + $0xa4] sm:$0xf]  ;;  %v6205_v37 = vor.u32 %v8714_v36, %v6202_v18  ;;  %v6250_v18 = vld [vmem:[#allocation10 + $0x88] sm:$0xf0]  ;;  %v6389_v46 = vor.u32 %v8760_v16, %v6386_v38  ;;  %v8804_v55 = vld [vmem:[#allocation10 + $0x2f4] sm:$0xf] }
 0x1ab   :  { %4937 = vmatpush.bf16.msra.mxu2 %v6357_v57  ;;  %v6405_v57 = vor.u32 %v8764_v5, %v6402_v20  ;;  %v6269_v23 = vor.u32 %v8730_v51, %v6266_v22  ;;  %v8710_v20 = vld [vmem:[#allocation10 + $0x4] sm:$0xf]  ;;  %v8820_v49 = vld [vmem:[#allocation10 + $0x374] sm:$0xf]  ;;  %v6490_v38 = vld [vmem:[#allocation10 + $0x268] sm:$0xf0] }
 0x1ac   :  { %4950 = vmatpush.bf16.msra.mxu3 %v6421_v41  ;;  %v6330_v41 = vld [vmem:[#allocation10 + $0x128] sm:$0xf0]  ;;  %v8726_v36 = vld [vmem:[#allocation10 + $0x84] sm:$0xf] }
 0x1ad   :  { %4912 = vmatpush.bf16.msra.mxu0 %v6221_v58  ;;  %v9803_v58 = vadd.f32 %v4697_v14, %v4685_v42  ;;  %v8742_v51 = vld [vmem:[#allocation10 + $0x104] sm:$0xf]  ;;  %v8788_v42 = vld [vmem:[#allocation10 + $0x274] sm:$0xf]  ;;  %v6498_v14 = vld [vmem:[#allocation10 + $0x278] sm:$0xf0] }
 0x1ae   :  { %4925 = vmatpush.bf16.msra.mxu1 %v6285_v6  ;;  %v6333_v6 = vor.u32 %v8746_v11, %v6330_v41  ;;  %v8758_v22 = vld [vmem:[#allocation10 + $0x184] sm:$0xf]  ;;  %v6378_v11 = vld [vmem:[#allocation10 + $0x188] sm:$0xf0]  ;;  %v4686_v41 = vpop.f32.mrf.mxu2  ;;  %v4699_v29 = vpop.f32.mrf.mxu3 }
 0x1af   :  { %4938 = vmatpush.bf16.msra.mxu2 %v6349_v59  ;;  %v8712_v59 = vld [vmem:[#allocation10 + $0x14] sm:$0xf]  ;;  %v8786_v16 = vld [vmem:[#allocation10 + $0x264] sm:$0xf]  ;;  %v6618_v29 = vld [vmem:[#allocation10 + $0x368] sm:$0xf0] }
 0x1b0   :  { %4951 = vmatpush.bf16.msra.mxu3 %v6413_v54  ;;  %v6258_v54 = vld [vmem:[#allocation10 + $0x98] sm:$0xf0]  ;;  %v6197_v5 = vor.u32 %v8712_v59, %v6194_v1  ;;  %v8836_v1 = vld [vmem:[#allocation10 + $0x3f4] sm:$0xf]  ;;  %v8802_v41 = vld [vmem:[#allocation10 + $0x2e4] sm:$0xf] }
 0x1b1   :  { %4913 = vmatpush.bf16.msra.mxu0 %v6213_v56  ;;  %v6186_v56 = vld [vmem:[#allocation10 + $0x8] sm:$0xf0] }
 0x1b2   :  { %4926 = vmatpush.bf16.msra.mxu1 %v6277_v9  ;;  %v6261_v9 = vor.u32 %v8728_v52, %v6258_v54  ;;  %v6189_v2 = vor.u32 %v8710_v20, %v6186_v56  ;;  %v6690_v52 = vld [vmem:[#allocation10 + $0x3f8] sm:$0xf0]  ;;  %v6501_v54 = vor.u32 %v8788_v42, %v6498_v14  ;;  %v6554_v20 = vld [vmem:[#allocation10 + $0x2e8] sm:$0xf0]  ;;  %v8818_v56 = vld [vmem:[#allocation10 + $0x364] sm:$0xf] }
 0x1b3   :  { %4939 = vmatpush.bf16.msra.mxu2 %v6341_v62  ;;  %v6325_v62 = vor.u32 %v8744_v63, %v6322_v4  ;;  %v6546_v42 = vld [vmem:[#allocation10 + $0x2d8] sm:$0xf0]  ;;  %v8816_v14 = vld [vmem:[#allocation10 + $0x354] sm:$0xf] }
 0x1b4   :  { %4952 = vmatpush.bf16.msra.mxu3 %v6405_v57  ;;  %v6314_v57 = vld [vmem:[#allocation10 + $0x108] sm:$0xf0] }
 0x1b5   :  { %4914 = vmatpush.bf16.msra.mxu0 %v6205_v37  ;;  %v6562_v37 = vld [vmem:[#allocation10 + $0x2f8] sm:$0xf0]  ;;  %v6317_v59 = vor.u32 %v8742_v51, %v6314_v57  ;;  %v6621_v51 = vor.u32 %v8818_v56, %v6618_v29  ;;  %v8796_v29 = vld [vmem:[#allocation10 + $0x2b4] sm:$0xf] }
 0x1b6   :  { %4927 = vmatpush.bf16.msra.mxu1 %v6269_v23  ;;  %v6626_v23 = vld [vmem:[#allocation10 + $0x378] sm:$0xf0]  ;;  %v6565_v63 = vor.u32 %v8804_v55, %v6562_v37 }
 0x1b7   :  { %4940 = vmatpush.bf16.msra.mxu2 %v6333_v6  ;;  %v6253_v6 = vor.u32 %v8726_v36, %v6250_v18  ;;  %v6629_v4 = vor.u32 %v8820_v49, %v6626_v23  ;;  %v6493_v36 = vor.u32 %v8786_v16, %v6490_v38  ;;  %v6557_v18 = vor.u32 %v8802_v41, %v6554_v20  ;;  %v6482_v57 = vld [vmem:[#allocation10 + $0x258] sm:$0xf0]  ;;  %v6666_v16 = vld [vmem:[#allocation10 + $0x3c8] sm:$0xf0]  ;;  %v8780_v20 = vld [vmem:[#allocation10 + $0x234] sm:$0xf] }
 0x1b8   :  { %4953 = vmatpush.bf16.msra.mxu3 %v6397_v0  ;;  %v6381_v0 = vor.u32 %v8758_v22, %v6378_v11  ;;  %v8800_v22 = vld [vmem:[#allocation10 + $0x2d4] sm:$0xf]  ;;  %v6610_v55 = vld [vmem:[#allocation10 + $0x358] sm:$0xf0] }
 0x1b9   :  { %4915 = vmatpush.bf16.msra.mxu0 %v6197_v5  ;;  %v6693_v5 = vor.u32 %v8836_v1, %v6690_v52  ;;  %v6674_v37 = vld [vmem:[#allocation10 + $0x3d8] sm:$0xf0]  ;;  %v6549_v23 = vor.u32 %v8800_v22, %v6546_v42  ;;  %v6474_v1 = vld [vmem:[#allocation10 + $0x248] sm:$0xf0]  ;;  %v8798_v52 = vld [vmem:[#allocation10 + $0x2c4] sm:$0xf] }
 0x1ba   :  { %4928 = vmatpush.bf16.msra.mxu1 %v6261_v9  ;;  %v8834_v9 = vld [vmem:[#allocation10 + $0x3e4] sm:$0xf]  ;;  %v6466_v56 = vld [vmem:[#allocation10 + $0x238] sm:$0xf0] }
 0x1bb   :  { %4941 = vmatpush.bf16.msra.mxu2 %v6325_v62  ;;  %v6682_v62 = vld [vmem:[#allocation10 + $0x3e8] sm:$0xf0]  ;;  %v6469_v22 = vor.u32 %v8780_v20, %v6466_v56  ;;  %v8778_v42 = vld [vmem:[#allocation10 + $0x224] sm:$0xf]  ;;  %v8808_v20 = vld [vmem:[#allocation10 + $0x314] sm:$0xf] }
 0x1bc   :  { %4954 = vmatpush.bf16.msra.mxu3 %v6389_v46  ;;  %v8784_v46 = vld [vmem:[#allocation10 + $0x254] sm:$0xf]  ;;  %v6685_v11 = vor.u32 %v8834_v9, %v6682_v62  ;;  %v6578_v56 = vld [vmem:[#allocation10 + $0x318] sm:$0xf0] }
 0x1bd   :  { %4916 = vmatpush.bf16.msra.mxu0 %v6189_v2  ;;  %v8832_v2 = vld [vmem:[#allocation10 + $0x3d4] sm:$0xf]  ;;  %v6485_v49 = vor.u32 %v8784_v46, %v6482_v57  ;;  %v6658_v57 = vld [vmem:[#allocation10 + $0x3b8] sm:$0xf0] }
 0x1be   :  { %4929 = vmatpush.bf16.msra.mxu1 %v6253_v6  ;;  %v6613_v6 = vor.u32 %v8816_v14, %v6610_v55  ;;  %v8828_v46 = vld [vmem:[#allocation10 + $0x3b4] sm:$0xf]  ;;  %v6458_v14 = vld [vmem:[#allocation10 + $0x228] sm:$0xf0]  ;;  %v8794_v55 = vld [vmem:[#allocation10 + $0x2a4] sm:$0xf] }
 0x1bf   :  { %4942 = vmatpush.bf16.msra.mxu2 %v6317_v59  ;;  %v8782_v59 = vld [vmem:[#allocation10 + $0x244] sm:$0xf] }
 0x1c0   :  { %4955 = vmatpush.bf16.msra.mxu3 %v6381_v0  ;;  %4917 = vmatmul.bf16.vlgmr.msra.gmra.mxu0 %v9633_v47  ;;  %v6677_v0 = vor.u32 %v8832_v2, %v6674_v37  ;;  %v8830_v47 = vld [vmem:[#allocation10 + $0x3c4] sm:$0xf]  ;;  %v6477_v38 = vor.u32 %v8782_v59, %v6474_v1  ;;  %v6661_v2 = vor.u32 %v8828_v46, %v6658_v57 }
 0x1c1   :  { %4961 = vmatpush.bf16.msrb.mxu0 %v6501_v54  ;;  %4930 = vmatmul.bf16.vlgmr.msra.gmra.mxu1 %v9637_v53  ;;  %v8814_v54 = vld [vmem:[#allocation10 + $0x344] sm:$0xf]  ;;  %v4723_v53 = vpop.f32.mrf.mxu1  ;;  %v6669_v9 = vor.u32 %v8830_v47, %v6666_v16  ;;  %v6581_v46 = vor.u32 %v8808_v20, %v6578_v56 }
 0x1c2   :  { %4974 = vmatpush.bf16.msrb.mxu1 %v6565_v63  ;;  %4943 = vmatmul.bf16.vlgmr.msra.gmra.mxu2 %v9631_v44  ;;  %v6538_v44 = vld [vmem:[#allocation10 + $0x2c8] sm:$0xf0]  ;;  %v8790_v57 = vld [vmem:[#allocation10 + $0x284] sm:$0xf] }
 0x1c3   :  { %4987 = vmatpush.bf16.msrb.mxu2 %v6629_v4  ;;  %4956 = vmatmul.bf16.vlgmr.msra.gmra.mxu3 %v9635_v48  ;;  %v6602_v63 = vld [vmem:[#allocation10 + $0x348] sm:$0xf0]  ;;  %v4710_v4 = vpop.f32.mrf.mxu0  ;;  %v6541_v41 = vor.u32 %v8798_v52, %v6538_v44  ;;  %v8826_v52 = vld [vmem:[#allocation10 + $0x3a4] sm:$0xf] }
 0x1c4   :  { %5000 = vmatpush.bf16.msrb.mxu3 %v6693_v5  ;;  %v4711_v48 = vadd.f32 %v4710_v4, %v9803_v58  ;;  %v6605_v5 = vor.u32 %v8814_v54, %v6602_v63  ;;  %v6461_v54 = vor.u32 %v8778_v42, %v6458_v14  ;;  %v6570_v42 = vld [vmem:[#allocation10 + $0x308] sm:$0xf0]  ;;  %v8822_v14 = vld [vmem:[#allocation10 + $0x384] sm:$0xf] }
 0x1c5   :  { %4962 = vmatpush.bf16.msrb.mxu0 %v6493_v36  ;;  %v6530_v36 = vld [vmem:[#allocation10 + $0x2b8] sm:$0xf0]  ;;  %v4736_v37 = vpop.f32.mrf.mxu2  ;;  %v8866_v20 = vld [vmem:[#allocation10 + $0x4e4] sm:$0xf] }
 0x1c6   :  { %4975 = vmatpush.bf16.msrb.mxu1 %v6557_v18  ;;  %v4724_v62 = vadd.f32 %v4723_v53, %v4711_v48  ;;  %v8812_v18 = vld [vmem:[#allocation10 + $0x334] sm:$0xf]  ;;  %v6533_v58 = vor.u32 %v8796_v29, %v6530_v36  ;;  %v4749_v1 = vpop.f32.mrf.mxu3  ;;  %v8774_v36 = vld [vmem:[#allocation10 + $0x204] sm:$0xf] }
 0x1c7   :  { %4988 = vmatpush.bf16.msrb.mxu2 %v6621_v51  ;;  %v6594_v51 = vld [vmem:[#allocation10 + $0x338] sm:$0xf0]  ;;  %v8776_v48 = vld [vmem:[#allocation10 + $0x214] sm:$0xf] }
 0x1c8   :  { %5001 = vmatpush.bf16.msrb.mxu3 %v6685_v11  ;;  %v6597_v11 = vor.u32 %v8812_v18, %v6594_v51  ;;  %v4737_v59 = vadd.f32 %v4736_v37, %v4724_v62  ;;  %v8792_v53 = vld [vmem:[#allocation10 + $0x294] sm:$0xf]  ;;  %v6442_v18 = vld [vmem:[#allocation10 + $0x208] sm:$0xf0] }
 0x1c9   :  { %4963 = vmatpush.bf16.msrb.mxu0 %v6485_v49  ;;  %v6522_v49 = vld [vmem:[#allocation10 + $0x2a8] sm:$0xf0]  ;;  %v4725_v63 = vpop.f32.mrf.mxu1  ;;  %v8824_v29 = vld [vmem:[#allocation10 + $0x394] sm:$0xf] }
 0x1ca   :  { %4976 = vmatpush.bf16.msrb.mxu1 %v6549_v23  ;;  %v8810_v23 = vld [vmem:[#allocation10 + $0x324] sm:$0xf]  ;;  %v9810_v4 = vadd.f32 %v4749_v1, %v4737_v59  ;;  %v6525_v47 = vor.u32 %v8794_v55, %v6522_v49  ;;  %v6634_v55 = vld [vmem:[#allocation10 + $0x388] sm:$0xf0]  ;;  %v8852_v37 = vld [vmem:[#allocation10 + $0x474] sm:$0xf]  ;;  %v6445_v59 = vor.u32 %v8774_v36, %v6442_v18 }
 0x1cb   :  { %4989 = vmatpush.bf16.msrb.mxu2 %v6613_v6  ;;  %v6586_v6 = vld [vmem:[#allocation10 + $0x328] sm:$0xf0]  ;;  %v4712_v44 = vpop.f32.mrf.mxu0  ;;  %v6754_v49 = vld [vmem:[#allocation10 + $0x478] sm:$0xf0]  ;;  %v8900_v63 = vld [vmem:[#allocation10 + $0x5f4] sm:$0xf] }
 0x1cc   :  { %5002 = vmatpush.bf16.msrb.mxu3 %v6677_v0  ;;  %v6650_v0 = vld [vmem:[#allocation10 + $0x3a8] sm:$0xf0]  ;;  %v6589_v16 = vor.u32 %v8810_v23, %v6586_v6  ;;  %v8868_v23 = vld [vmem:[#allocation10 + $0x4f4] sm:$0xf]  ;;  %v6818_v1 = vld [vmem:[#allocation10 + $0x4f8] sm:$0xf0] }
 0x1cd   :  { %4964 = vmatpush.bf16.msrb.mxu0 %v6477_v38  ;;  %v6450_v38 = vld [vmem:[#allocation10 + $0x218] sm:$0xf0]  ;;  %v8898_v36 = vld [vmem:[#allocation10 + $0x5e4] sm:$0xf]  ;;  %v6938_v18 = vld [vmem:[#allocation10 + $0x5e8] sm:$0xf0] }
 0x1ce   :  { %4977 = vmatpush.bf16.msrb.mxu1 %v6541_v41  ;;  %v6653_v41 = vor.u32 %v8826_v52, %v6650_v0  ;;  %v6453_v62 = vor.u32 %v8776_v48, %v6450_v38  ;;  %v4751_v6 = vpop.f32.mrf.mxu3  ;;  %v8884_v52 = vld [vmem:[#allocation10 + $0x574] sm:$0xf]  ;;  %v6882_v0 = vld [vmem:[#allocation10 + $0x578] sm:$0xf0]  ;;  %v6757_v48 = vor.u32 %v8852_v37, %v6754_v49  ;;  %v6821_v38 = vor.u32 %v8868_v23, %v6818_v1  ;;  %v8846_v1 = vld [vmem:[#allocation10 + $0x444] sm:$0xf] }
 0x1cf   :  { %4990 = vmatpush.bf16.msrb.mxu2 %v6605_v5  ;;  %v6514_v5 = vld [vmem:[#allocation10 + $0x298] sm:$0xf0]  ;;  %v8896_v37 = vld [vmem:[#allocation10 + $0x5d4] sm:$0xf] }
 0x1d0   :  { %5003 = vmatpush.bf16.msrb.mxu3 %v6669_v9  ;;  %v6642_v9 = vld [vmem:[#allocation10 + $0x398] sm:$0xf0]  ;;  %v6517_v51 = vor.u32 %v8792_v53, %v6514_v5  ;;  %v6885_v53 = vor.u32 %v8884_v52, %v6882_v0  ;;  %v6746_v5 = vld [vmem:[#allocation10 + $0x468] sm:$0xf0] }
 0x1d1   :  { %4965 = vmatpush.bf16.msrb.mxu0 %v6469_v22  ;;  %v6506_v22 = vld [vmem:[#allocation10 + $0x288] sm:$0xf0]  ;;  %v6930_v49 = vld [vmem:[#allocation10 + $0x5d8] sm:$0xf0] }
 0x1d2   :  { %4978 = vmatpush.bf16.msrb.mxu1 %v6533_v58  ;;  %v8806_v58 = vld [vmem:[#allocation10 + $0x304] sm:$0xf]  ;;  %v6509_v44 = vor.u32 %v8790_v57, %v6506_v22  ;;  %v8848_v22 = vld [vmem:[#allocation10 + $0x454] sm:$0xf]  ;;  %v6730_v52 = vld [vmem:[#allocation10 + $0x448] sm:$0xf0]  ;;  %v6933_v0 = vor.u32 %v8896_v37, %v6930_v49 }
 0x1d3   :  { %4991 = vmatpush.bf16.msrb.mxu2 %v6597_v11  ;;  %v6645_v11 = vor.u32 %v8824_v29, %v6642_v9  ;;  %v6810_v29 = vld [vmem:[#allocation10 + $0x4e8] sm:$0xf0]  ;;  %v8882_v9 = vld [vmem:[#allocation10 + $0x564] sm:$0xf] }
 0x1d4   :  { %5004 = vmatpush.bf16.msrb.mxu3 %v6661_v2  ;;  %v4738_v2 = vpop.f32.mrf.mxu2  ;;  %v6842_v37 = vld [vmem:[#allocation10 + $0x528] sm:$0xf0] }
 0x1d5   :  { %4966 = vmatpush.bf16.msrb.mxu0 %v6461_v54  ;;  %v6573_v54 = vor.u32 %v8806_v58, %v6570_v42  ;;  %v6738_v58 = vld [vmem:[#allocation10 + $0x458] sm:$0xf0]  ;;  %v6941_v42 = vor.u32 %v8898_v36, %v6938_v18  ;;  %v8892_v18 = vld [vmem:[#allocation10 + $0x5b4] sm:$0xf] }
 0x1d6   :  { %4979 = vmatpush.bf16.msrb.mxu1 %v6525_v47  ;;  %v6946_v47 = vld [vmem:[#allocation10 + $0x5f8] sm:$0xf0]  ;;  %v6741_v23 = vor.u32 %v8848_v22, %v6738_v58  ;;  %v8842_v22 = vld [vmem:[#allocation10 + $0x424] sm:$0xf]  ;;  %v6714_v58 = vld [vmem:[#allocation10 + $0x428] sm:$0xf0] }
 0x1d7   :  { %4992 = vmatpush.bf16.msrb.mxu2 %v6589_v16  ;;  %v6637_v16 = vor.u32 %v8822_v14, %v6634_v55  ;;  %v6949_v56 = vor.u32 %v8900_v63, %v6946_v47  ;;  %v6802_v14 = vld [vmem:[#allocation10 + $0x4d8] sm:$0xf0]  ;;  %v8880_v55 = vld [vmem:[#allocation10 + $0x554] sm:$0xf]  ;;  %v6922_v47 = vld [vmem:[#allocation10 + $0x5c8] sm:$0xf0] }
 0x1d8   :  { %5005 = vmatpush.bf16.msrb.mxu3 %v6653_v41  ;;  %v8850_v41 = vld [vmem:[#allocation10 + $0x464] sm:$0xf]  ;;  %v6866_v2 = vld [vmem:[#allocation10 + $0x558] sm:$0xf0] }
 0x1d9   :  { %4967 = vmatpush.bf16.msrb.mxu0 %v6453_v62  ;;  %v6874_v62 = vld [vmem:[#allocation10 + $0x568] sm:$0xf0]  ;;  %v6850_v36 = vld [vmem:[#allocation10 + $0x538] sm:$0xf0] }
 0x1da   :  { %4980 = vmatpush.bf16.msrb.mxu1 %v6517_v51  ;;  %v6749_v51 = vor.u32 %v8850_v41, %v6746_v5  ;;  %v6877_v57 = vor.u32 %v8882_v9, %v6874_v62  ;;  %v8844_v41 = vld [vmem:[#allocation10 + $0x434] sm:$0xf]  ;;  %v6722_v5 = vld [vmem:[#allocation10 + $0x438] sm:$0xf0] }
 0x1db   :  { %4993 = vmatpush.bf16.msrb.mxu2 %v6581_v46  ;;  %v6813_v46 = vor.u32 %v8866_v20, %v6810_v29  ;;  %v8860_v20 = vld [vmem:[#allocation10 + $0x4b4] sm:$0xf]  ;;  %v6786_v9 = vld [vmem:[#allocation10 + $0x4b8] sm:$0xf0] }
 0x1dc   :  { %5006 = vmatpush.bf16.msrb.mxu3 %v6645_v11  ;;  %v8864_v11 = vld [vmem:[#allocation10 + $0x4d4] sm:$0xf] }
 0x1dd   :  { %4968 = vmatpush.bf16.msrb.mxu0 %v6445_v59  ;;  %v6805_v6 = vor.u32 %v8864_v11, %v6802_v14  ;;  %v6869_v59 = vor.u32 %v8880_v55, %v6866_v2  ;;  %v4762_v63 = vpop.f32.mrf.mxu0  ;;  %v8876_v62 = vld [vmem:[#allocation10 + $0x534] sm:$0xf]  ;;  %v8858_v11 = vld [vmem:[#allocation10 + $0x4a4] sm:$0xf]  ;;  %v6778_v55 = vld [vmem:[#allocation10 + $0x4a8] sm:$0xf0] }
 0x1de   :  { %4981 = vmatpush.bf16.msrb.mxu1 %v6509_v44  ;;  %v6794_v44 = vld [vmem:[#allocation10 + $0x4c8] sm:$0xf0]  ;;  %v8874_v2 = vld [vmem:[#allocation10 + $0x524] sm:$0xf] }
 0x1df   :  { %4994 = vmatpush.bf16.msrb.mxu2 %v6573_v54  ;;  %v8878_v54 = vld [vmem:[#allocation10 + $0x544] sm:$0xf] }
 0x1e0   :  { %5007 = vmatpush.bf16.msrb.mxu3 %v6637_v16  ;;  %4969 = vmatmul.bf16.vlgmr.msrb.gmra.mxu0 %v9645_v8  ;;  %v6858_v8 = vld [vmem:[#allocation10 + $0x548] sm:$0xf0]  ;;  %v4763_v16 = vadd.f32 %v4762_v63, %v9810_v4  ;;  %v6789_v4 = vor.u32 %v8860_v20, %v6786_v9  ;;  %v6706_v63 = vld [vmem:[#allocation10 + $0x418] sm:$0xf0]  ;;  %v8854_v9 = vld [vmem:[#allocation10 + $0x484] sm:$0xf] }
 0x1e1   :  { %5013 = vmatpush.bf16.msra.mxu0 %v6757_v48  ;;  %4982 = vmatmul.bf16.vlgmr.msrb.gmra.mxu1 %v9649_v12  ;;  %v6733_v48 = vor.u32 %v8846_v1, %v6730_v52  ;;  %v4775_v12 = vpop.f32.mrf.mxu1  ;;  %v6717_v52 = vor.u32 %v8842_v22, %v6714_v58  ;;  %v6698_v20 = vld [vmem:[#allocation10 + $0x408] sm:$0xf0]  ;;  %v8916_v22 = vld [vmem:[#allocation10 + $0x674] sm:$0xf]  ;;  %v7010_v58 = vld [vmem:[#allocation10 + $0x678] sm:$0xf0] }
 0x1e2   :  { %5026 = vmatpush.bf16.msra.mxu1 %v6821_v38  ;;  %4995 = vmatmul.bf16.vlgmr.msrb.gmra.mxu2 %v9643_v7  ;;  %v8862_v7 = vld [vmem:[#allocation10 + $0x4c4] sm:$0xf]  ;;  %v4776_v29 = vadd.f32 %v4775_v12, %v4763_v16  ;;  %v6770_v16 = vld [vmem:[#allocation10 + $0x498] sm:$0xf0] }
 0x1e3   :  { %5039 = vmatpush.bf16.msra.mxu2 %v6885_v53  ;;  %5008 = vmatmul.bf16.vlgmr.msrb.gmra.mxu3 %v9647_v10  ;;  %v8894_v10 = vld [vmem:[#allocation10 + $0x5c4] sm:$0xf]  ;;  %v6797_v38 = vor.u32 %v8862_v7, %v6794_v44  ;;  %v6861_v53 = vor.u32 %v8878_v54, %v6858_v8  ;;  %v6781_v44 = vor.u32 %v8858_v11, %v6778_v55  ;;  %v8840_v8 = vld [vmem:[#allocation10 + $0x414] sm:$0xf]  ;;  %v6834_v12 = vld [vmem:[#allocation10 + $0x518] sm:$0xf0] }
 0x1e4   :  { %5052 = vmatpush.bf16.msra.mxu3 %v6949_v56  ;;  %v6925_v56 = vor.u32 %v8894_v10, %v6922_v47  ;;  %v6845_v54 = vor.u32 %v8874_v2, %v6842_v37  ;;  %v8856_v10 = vld [vmem:[#allocation10 + $0x494] sm:$0xf]  ;;  %v7074_v55 = vld [vmem:[#allocation10 + $0x6f8] sm:$0xf0] }
 0x1e5   :  { %5014 = vmatpush.bf16.msra.mxu0 %v6749_v51  ;;  %v6914_v51 = vld [vmem:[#allocation10 + $0x5b8] sm:$0xf0]  ;;  %v4788_v14 = vpop.f32.mrf.mxu2  ;;  %v4764_v1 = vpop.f32.mrf.mxu0  ;;  %v8932_v11 = vld [vmem:[#allocation10 + $0x6f4] sm:$0xf] }
 0x1e6   :  { %5027 = vmatpush.bf16.msra.mxu1 %v6813_v46  ;;  %v6725_v46 = vor.u32 %v8844_v41, %v6722_v5  ;;  %v4789_v49 = vadd.f32 %v4788_v14, %v4776_v29  ;;  %v6709_v41 = vor.u32 %v8840_v8, %v6706_v63  ;;  %v8838_v5 = vld [vmem:[#allocation10 + $0x404] sm:$0xf]  ;;  %v8948_v2 = vld [vmem:[#allocation10 + $0x774] sm:$0xf]  ;;  %v7138_v37 = vld [vmem:[#allocation10 + $0x778] sm:$0xf0] }
 0x1e7   :  { %5040 = vmatpush.bf16.msra.mxu2 %v6877_v57  ;;  %v6853_v57 = vor.u32 %v8876_v62, %v6850_v36  ;;  %v6762_v62 = vld [vmem:[#allocation10 + $0x488] sm:$0xf0]  ;;  %v8870_v36 = vld [vmem:[#allocation10 + $0x504] sm:$0xf]  ;;  %v6701_v14 = vor.u32 %v8838_v5, %v6698_v20  ;;  %v8912_v20 = vld [vmem:[#allocation10 + $0x654] sm:$0xf] }
 0x1e8   :  { %5053 = vmatpush.bf16.msra.mxu3 %v6941_v42  ;;  %v6917_v42 = vor.u32 %v8892_v18, %v6914_v51  ;;  %v6826_v51 = vld [vmem:[#allocation10 + $0x508] sm:$0xf0]  ;;  %v8930_v63 = vld [vmem:[#allocation10 + $0x6e4] sm:$0xf] }
 0x1e9   :  { %5015 = vmatpush.bf16.msra.mxu0 %v6741_v23  ;;  %v4801_v23 = vpop.f32.mrf.mxu3  ;;  %v4777_v7 = vpop.f32.mrf.mxu1  ;;  %v7002_v8 = vld [vmem:[#allocation10 + $0x668] sm:$0xf0] }
 0x1ea   :  { %5028 = vmatpush.bf16.msra.mxu1 %v6805_v6  ;;  %v8890_v6 = vld [vmem:[#allocation10 + $0x5a4] sm:$0xf]  ;;  %v7077_v7 = vor.u32 %v8932_v11, %v7074_v55 }
 0x1eb   :  { %5041 = vmatpush.bf16.msra.mxu2 %v6869_v59  ;;  %v6906_v59 = vld [vmem:[#allocation10 + $0x5a8] sm:$0xf0]  ;;  %v8926_v11 = vld [vmem:[#allocation10 + $0x6c4] sm:$0xf] }
 0x1ec   :  { %5054 = vmatpush.bf16.msra.mxu3 %v6933_v0  ;;  %v9817_v0 = vadd.f32 %v4801_v23, %v4789_v49  ;;  %v6909_v47 = vor.u32 %v8890_v6, %v6906_v59  ;;  %v6765_v49 = vor.u32 %v8854_v9, %v6762_v62  ;;  %v6829_v23 = vor.u32 %v8870_v36, %v6826_v51  ;;  %v8964_v6 = vld [vmem:[#allocation10 + $0x7f4] sm:$0xf]  ;;  %v7202_v59 = vld [vmem:[#allocation10 + $0x7f8] sm:$0xf0]  ;;  %v8942_v55 = vld [vmem:[#allocation10 + $0x744] sm:$0xf] }
 0x1ed   :  { %5016 = vmatpush.bf16.msra.mxu0 %v6733_v48  ;;  %v8872_v48 = vld [vmem:[#allocation10 + $0x514] sm:$0xf]  ;;  %v7058_v62 = vld [vmem:[#allocation10 + $0x6d8] sm:$0xf0] }
 0x1ee   :  { %5029 = vmatpush.bf16.msra.mxu1 %v6797_v38  ;;  %v8888_v38 = vld [vmem:[#allocation10 + $0x594] sm:$0xf]  ;;  %v6837_v29 = vor.u32 %v8872_v48, %v6834_v12  ;;  %v7130_v48 = vld [vmem:[#allocation10 + $0x768] sm:$0xf0]  ;;  %v8962_v12 = vld [vmem:[#allocation10 + $0x7e4] sm:$0xf] }
 0x1ef   :  { %5042 = vmatpush.bf16.msra.mxu2 %v6861_v53  ;;  %v6898_v53 = vld [vmem:[#allocation10 + $0x598] sm:$0xf0]  ;;  %v8944_v36 = vld [vmem:[#allocation10 + $0x754] sm:$0xf] }
 0x1f0   :  { %5055 = vmatpush.bf16.msra.mxu3 %v6925_v56  ;;  %v6773_v56 = vor.u32 %v8856_v10, %v6770_v16  ;;  %v6901_v18 = vor.u32 %v8888_v38, %v6898_v53  ;;  %v7205_v10 = vor.u32 %v8964_v6, %v7202_v59  ;;  %v8946_v16 = vld [vmem:[#allocation10 + $0x764] sm:$0xf]  ;;  %v7194_v38 = vld [vmem:[#allocation10 + $0x7e8] sm:$0xf0]  ;;  %v8960_v51 = vld [vmem:[#allocation10 + $0x7d4] sm:$0xf] }
 0x1f1   :  { %5017 = vmatpush.bf16.msra.mxu0 %v6725_v46  ;;  %v8886_v46 = vld [vmem:[#allocation10 + $0x584] sm:$0xf]  ;;  %v7133_v5 = vor.u32 %v8946_v16, %v7130_v48  ;;  %v7197_v9 = vor.u32 %v8962_v12, %v7194_v38  ;;  %v7170_v16 = vld [vmem:[#allocation10 + $0x7b8] sm:$0xf0] }
 0x1f2   :  { %5030 = vmatpush.bf16.msra.mxu1 %v6789_v4  ;;  %v6890_v4 = vld [vmem:[#allocation10 + $0x588] sm:$0xf0]  ;;  %v8906_v38 = vld [vmem:[#allocation10 + $0x624] sm:$0xf] }
 0x1f3   :  { %5043 = vmatpush.bf16.msra.mxu2 %v6853_v57  ;;  %v4790_v57 = vpop.f32.mrf.mxu2  ;;  %v6893_v1 = vor.u32 %v8886_v46, %v6890_v4  ;;  %v7186_v46 = vld [vmem:[#allocation10 + $0x7d8] sm:$0xf0] }
 0x1f4   :  { %5056 = vmatpush.bf16.msra.mxu3 %v6917_v42  ;;  %v4803_v42 = vpop.f32.mrf.mxu3 }
 0x1f5   :  { %5018 = vmatpush.bf16.msra.mxu0 %v6717_v52  ;;  %v7013_v52 = vor.u32 %v8916_v22, %v7010_v58  ;;  %v8910_v58 = vld [vmem:[#allocation10 + $0x644] sm:$0xf]  ;;  %v7189_v42 = vor.u32 %v8960_v51, %v7186_v46  ;;  %v7162_v51 = vld [vmem:[#allocation10 + $0x7a8] sm:$0xf0] }
 0x1f6   :  { %5031 = vmatpush.bf16.msra.mxu1 %v6781_v44  ;;  %v7141_v44 = vor.u32 %v8948_v2, %v7138_v37  ;;  %v7178_v37 = vld [vmem:[#allocation10 + $0x7c8] sm:$0xf0] }
 0x1f7   :  { %5044 = vmatpush.bf16.msra.mxu2 %v6845_v54  ;;  %v8914_v54 = vld [vmem:[#allocation10 + $0x664] sm:$0xf] }
 0x1f8   :  { %5057 = vmatpush.bf16.msra.mxu3 %v6909_v47  ;;  %v7066_v47 = vld [vmem:[#allocation10 + $0x6e8] sm:$0xf0]  ;;  %v7005_v53 = vor.u32 %v8914_v54, %v7002_v8  ;;  %v7042_v8 = vld [vmem:[#allocation10 + $0x6b8] sm:$0xf0] }
 0x1f9   :  { %5019 = vmatpush.bf16.msra.mxu0 %v6709_v41  ;;  %v7069_v41 = vor.u32 %v8930_v63, %v7066_v47  ;;  %v8940_v63 = vld [vmem:[#allocation10 + $0x734] sm:$0xf] }
 0x1fa   :  { %5032 = vmatpush.bf16.msra.mxu1 %v6773_v56  ;;  %v6994_v56 = vld [vmem:[#allocation10 + $0x658] sm:$0xf0]  ;;  %v8956_v47 = vld [vmem:[#allocation10 + $0x7b4] sm:$0xf] }
 0x1fb   :  { %5045 = vmatpush.bf16.msra.mxu2 %v6837_v29  ;;  %v8928_v29 = vld [vmem:[#allocation10 + $0x6d4] sm:$0xf]  ;;  %v6997_v4 = vor.u32 %v8912_v20, %v6994_v56  ;;  %v7034_v56 = vld [vmem:[#allocation10 + $0x6a8] sm:$0xf0] }
 0x1fc   :  { %5058 = vmatpush.bf16.msra.mxu3 %v6901_v18  ;;  %v7122_v18 = vld [vmem:[#allocation10 + $0x758] sm:$0xf0]  ;;  %v7061_v57 = vor.u32 %v8928_v29, %v7058_v62  ;;  %v8938_v29 = vld [vmem:[#allocation10 + $0x724] sm:$0xf] }
 0x1fd   :  { %5020 = vmatpush.bf16.msra.mxu0 %v6701_v14  ;;  %v7125_v22 = vor.u32 %v8944_v36, %v7122_v18  ;;  %v7050_v14 = vld [vmem:[#allocation10 + $0x6c8] sm:$0xf0]  ;;  %v4814_v2 = vpop.f32.mrf.mxu0  ;;  %v8954_v18 = vld [vmem:[#allocation10 + $0x7a4] sm:$0xf] }
 0x1fe   :  { %5033 = vmatpush.bf16.msra.mxu1 %v6765_v49  ;;  %v7053_v6 = vor.u32 %v8926_v11, %v7050_v14  ;;  %v8904_v11 = vld [vmem:[#allocation10 + $0x614] sm:$0xf] }
 0x1ff   :  { %5046 = vmatpush.bf16.msra.mxu2 %v6829_v23  ;;  %v4827_v23 = vpop.f32.mrf.mxu1  ;;  %v8920_v14 = vld [vmem:[#allocation10 + $0x694] sm:$0xf] }
 0x200   :  { %5059 = vmatpush.bf16.msra.mxu3 %v6893_v1  ;;  %5021 = vmatmul.bf16.vlgmr.msra.gmra.mxu0 %v9663_v15  ;;  %v6986_v15 = vld [vmem:[#allocation10 + $0x648] sm:$0xf0]  ;;  %v8908_v1 = vld [vmem:[#allocation10 + $0x634] sm:$0xf] }
 0x201   :  { %5065 = vmatpush.bf16.msrb.mxu0 %v7013_v52  ;;  %5034 = vmatmul.bf16.vlgmr.msra.gmra.mxu1 %v9667_v24  ;;  %v8958_v24 = vld [vmem:[#allocation10 + $0x7c4] sm:$0xf]  ;;  %v6989_v49 = vor.u32 %v8910_v58, %v6986_v15  ;;  %v6978_v52 = vld [vmem:[#allocation10 + $0x638] sm:$0xf0] }
 0x202   :  { %5078 = vmatpush.bf16.msrb.mxu1 %v7077_v7  ;;  %5047 = vmatmul.bf16.vlgmr.msra.gmra.mxu2 %v9665_v21  ;;  %v7114_v21 = vld [vmem:[#allocation10 + $0x748] sm:$0xf0]  ;;  %v8924_v7 = vld [vmem:[#allocation10 + $0x6b4] sm:$0xf]  ;;  %v6981_v48 = vor.u32 %v8908_v1, %v6978_v52  ;;  %v8918_v52 = vld [vmem:[#allocation10 + $0x684] sm:$0xf] }
 0x203   :  { %5091 = vmatpush.bf16.msrb.mxu2 %v7141_v44  ;;  %5060 = vmatmul.bf16.vlgmr.msra.gmra.mxu3 %v9669_v26  ;;  %v4815_v26 = vadd.f32 %v4814_v2, %v9817_v0  ;;  %v7117_v59 = vor.u32 %v8942_v55, %v7114_v21  ;;  %v7181_v44 = vor.u32 %v8958_v24, %v7178_v37  ;;  %v7026_v21 = vld [vmem:[#allocation10 + $0x698] sm:$0xf0]  ;;  %v8936_v2 = vld [vmem:[#allocation10 + $0x714] sm:$0xf] }
 0x204   :  { %5104 = vmatpush.bf16.msrb.mxu3 %v7205_v10  ;;  %v7106_v10 = vld [vmem:[#allocation10 + $0x738] sm:$0xf0]  ;;  %v7045_v0 = vor.u32 %v8924_v7, %v7042_v8  ;;  %v7165_v55 = vor.u32 %v8954_v18, %v7162_v51  ;;  %v8952_v37 = vld [vmem:[#allocation10 + $0x794] sm:$0xf]  ;;  %v7018_v7 = vld [vmem:[#allocation10 + $0x688] sm:$0xf0] }
 0x205   :  { %5066 = vmatpush.bf16.msrb.mxu0 %v7005_v53  ;;  %v4828_v54 = vadd.f32 %v4827_v23, %v4815_v26  ;;  %v7109_v12 = vor.u32 %v8940_v63, %v7106_v10  ;;  %v6970_v53 = vld [vmem:[#allocation10 + $0x628] sm:$0xf0]  ;;  %v4840_v20 = vpop.f32.mrf.mxu2  ;;  %v4816_v46 = vpop.f32.mrf.mxu0  ;;  %v7090_v24 = vld [vmem:[#allocation10 + $0x718] sm:$0xf0]  ;;  %v8902_v23 = vld [vmem:[#allocation10 + $0x604] sm:$0xf] }
 0x206   :  { %5079 = vmatpush.bf16.msrb.mxu1 %v7069_v41  ;;  %v8922_v41 = vld [vmem:[#allocation10 + $0x6a4] sm:$0xf]  ;;  %v4853_v36 = vpop.f32.mrf.mxu3  ;;  %v7154_v26 = vld [vmem:[#allocation10 + $0x798] sm:$0xf0]  ;;  %v7093_v1 = vor.u32 %v8936_v2, %v7090_v24  ;;  %v7082_v8 = vld [vmem:[#allocation10 + $0x708] sm:$0xf0] }
 0x207   :  { %5092 = vmatpush.bf16.msrb.mxu2 %v7133_v5  ;;  %v7173_v5 = vor.u32 %v8956_v47, %v7170_v16  ;;  %v4841_v62 = vadd.f32 %v4840_v20, %v4828_v54  ;;  %v7037_v58 = vor.u32 %v8922_v41, %v7034_v56  ;;  %v7157_v54 = vor.u32 %v8952_v37, %v7154_v26  ;;  %v8950_v63 = vld [vmem:[#allocation10 + $0x784] sm:$0xf]  ;;  %v7146_v10 = vld [vmem:[#allocation10 + $0x788] sm:$0xf0]  ;;  %v8980_v16 = vld [vmem:[#allocation10 + $0x874] sm:$0xf] }
 0x208   :  { %5105 = vmatpush.bf16.msrb.mxu3 %v7197_v9  ;;  %v7098_v9 = vld [vmem:[#allocation10 + $0x728] sm:$0xf0]  ;;  %v9012_v41 = vld [vmem:[#allocation10 + $0x974] sm:$0xf]  ;;  %v7021_v20 = vor.u32 %v8918_v52, %v7018_v7  ;;  %v8978_v46 = vld [vmem:[#allocation10 + $0x864] sm:$0xf] }
 0x209   :  { %5067 = vmatpush.bf16.msrb.mxu0 %v6997_v4  ;;  %v6973_v4 = vor.u32 %v8906_v38, %v6970_v53  ;;  %v7101_v15 = vor.u32 %v8938_v29, %v7098_v9  ;;  %v7330_v53 = vld [vmem:[#allocation10 + $0x8f8] sm:$0xf0]  ;;  %v9028_v29 = vld [vmem:[#allocation10 + $0x9f4] sm:$0xf]  ;;  %v9900_v52 = vld [vmem:[#allocation22_spill] sm:$0xff] }
 0x20a   :  { %5080 = vmatpush.bf16.msrb.mxu1 %v7061_v57  ;;  %v4829_v57 = vpop.f32.mrf.mxu1  ;;  %v7458_v9 = vld [vmem:[#allocation10 + $0x9f8] sm:$0xf0]  ;;  %v8976_v37 = vld [vmem:[#allocation10 + $0x854] sm:$0xf] }
 0x20b   :  { %5093 = vmatpush.bf16.msrb.mxu2 %v7125_v22  ;;  %v9824_v22 = vadd.f32 %v4853_v36, %v4841_v62  ;;  %v7149_v62 = vor.u32 %v8950_v63, %v7146_v10  ;;  %v8994_v57 = vld [vmem:[#allocation10 + $0x8e4] sm:$0xf]  ;;  %v7250_v26 = vld [vmem:[#allocation10 + $0x858] sm:$0xf0]  ;;  %v9024_v7 = vld [vmem:[#allocation10 + $0x9d4] sm:$0xf] }
 0x20c   :  { %5106 = vmatpush.bf16.msrb.mxu3 %v7189_v42  ;;  %v6962_v42 = vld [vmem:[#allocation10 + $0x618] sm:$0xf0] }
 0x20d   :  { %5068 = vmatpush.bf16.msrb.mxu0 %v6989_v49  ;;  %v6965_v49 = vor.u32 %v8904_v11, %v6962_v42  ;;  %v4842_v47 = vpop.f32.mrf.mxu2  ;;  %v9010_v11 = vld [vmem:[#allocation10 + $0x964] sm:$0xf]  ;;  %v7386_v42 = vld [vmem:[#allocation10 + $0x968] sm:$0xf0] }
 0x20e   :  { %5081 = vmatpush.bf16.msrb.mxu1 %v7053_v6  ;;  %v6954_v6 = vld [vmem:[#allocation10 + $0x608] sm:$0xf0]  ;;  %v7389_v24 = vor.u32 %v9010_v11, %v7386_v42  ;;  %v8974_v47 = vld [vmem:[#allocation10 + $0x844] sm:$0xf]  ;;  %v7426_v11 = vld [vmem:[#allocation10 + $0x9b8] sm:$0xf0] }
 0x20f   :  { %5094 = vmatpush.bf16.msrb.mxu2 %v7117_v59  ;;  %v7029_v59 = vor.u32 %v8920_v14, %v7026_v21  ;;  %v6957_v38 = vor.u32 %v8902_v23, %v6954_v6  ;;  %v9026_v14 = vld [vmem:[#allocation10 + $0x9e4] sm:$0xf]  ;;  %v7314_v6 = vld [vmem:[#allocation10 + $0x8d8] sm:$0xf0] }
 0x210   :  { %5107 = vmatpush.bf16.msrb.mxu3 %v7181_v44  ;;  %v8934_v44 = vld [vmem:[#allocation10 + $0x704] sm:$0xf] }
 0x211   :  { %5069 = vmatpush.bf16.msrb.mxu0 %v6981_v48  ;;  %v7266_v48 = vld [vmem:[#allocation10 + $0x878] sm:$0xf0]  ;;  %v7085_v56 = vor.u32 %v8934_v44, %v7082_v8  ;;  %v7253_v8 = vor.u32 %v8976_v37, %v7250_v26  ;;  %v7290_v26 = vld [vmem:[#allocation10 + $0x8a8] sm:$0xf0] }
 0x212   :  { %5082 = vmatpush.bf16.msrb.mxu1 %v7045_v0  ;;  %v8996_v0 = vld [vmem:[#allocation10 + $0x8f4] sm:$0xf]  ;;  %v7269_v36 = vor.u32 %v8980_v16, %v7266_v48  ;;  %v7442_v44 = vld [vmem:[#allocation10 + $0x9d8] sm:$0xf0]  ;;  %v8990_v16 = vld [vmem:[#allocation10 + $0x8c4] sm:$0xf] }
 0x213   :  { %5095 = vmatpush.bf16.msrb.mxu2 %v7109_v12  ;;  %v4855_v12 = vpop.f32.mrf.mxu3  ;;  %v7333_v18 = vor.u32 %v8996_v0, %v7330_v53  ;;  %v7445_v48 = vor.u32 %v9024_v7, %v7442_v44  ;;  %v7306_v0 = vld [vmem:[#allocation10 + $0x8c8] sm:$0xf0]  ;;  %v9022_v53 = vld [vmem:[#allocation10 + $0x9c4] sm:$0xf] }
 0x214   :  { %5108 = vmatpush.bf16.msrb.mxu3 %v7173_v5  ;;  %v7394_v5 = vld [vmem:[#allocation10 + $0x978] sm:$0xf0]  ;;  %v9006_v12 = vld [vmem:[#allocation10 + $0x944] sm:$0xf] }
 0x215   :  { %5070 = vmatpush.bf16.msrb.mxu0 %v6973_v4  ;;  %v7397_v51 = vor.u32 %v9012_v41, %v7394_v5  ;;  %v7258_v4 = vld [vmem:[#allocation10 + $0x868] sm:$0xf0] }
 0x216   :  { %5083 = vmatpush.bf16.msrb.mxu1 %v7037_v58  ;;  %v7461_v58 = vor.u32 %v9028_v29, %v7458_v9  ;;  %v7261_v21 = vor.u32 %v8978_v46, %v7258_v4  ;;  %v7434_v41 = vld [vmem:[#allocation10 + $0x9c8] sm:$0xf0]  ;;  %v7309_v29 = vor.u32 %v8990_v16, %v7306_v0  ;;  %v7298_v4 = vld [vmem:[#allocation10 + $0x8b8] sm:$0xf0]  ;;  %v8984_v16 = vld [vmem:[#allocation10 + $0x894] sm:$0xf] }
 0x217   :  { %5096 = vmatpush.bf16.msrb.mxu2 %v7101_v15  ;;  %v7322_v15 = vld [vmem:[#allocation10 + $0x8e8] sm:$0xf0]  ;;  %v7282_v0 = vld [vmem:[#allocation10 + $0x898] sm:$0xf0] }
 0x218   :  { %5109 = vmatpush.bf16.msrb.mxu3 %v7165_v55  ;;  %v7450_v55 = vld [vmem:[#allocation10 + $0x9e8] sm:$0xf0]  ;;  %v7325_v2 = vor.u32 %v8994_v57, %v7322_v15  ;;  %v9004_v57 = vld [vmem:[#allocation10 + $0x934] sm:$0xf] }
 0x219   :  { %5071 = vmatpush.bf16.msrb.mxu0 %v6965_v49  ;;  %v8992_v49 = vld [vmem:[#allocation10 + $0x8d4] sm:$0xf]  ;;  %v7453_v23 = vor.u32 %v9026_v14, %v7450_v55  ;;  %v8970_v55 = vld [vmem:[#allocation10 + $0x824] sm:$0xf] }
 0x21a   :  { %5084 = vmatpush.bf16.msrb.mxu1 %v7029_v59  ;;  %v9008_v59 = vld [vmem:[#allocation10 + $0x954] sm:$0xf]  ;;  %v7317_v63 = vor.u32 %v8992_v49, %v7314_v6  ;;  %v9002_v49 = vld [vmem:[#allocation10 + $0x924] sm:$0xf] }
 0x21b   :  { %5097 = vmatpush.bf16.msrb.mxu2 %v7093_v1  ;;  %v7378_v1 = vld [vmem:[#allocation10 + $0x958] sm:$0xf0]  ;;  %v9020_v15 = vld [vmem:[#allocation10 + $0x9b4] sm:$0xf] }
 0x21c   :  { %5110 = vmatpush.bf16.msrb.mxu3 %v7157_v54  ;;  %v9901_v54 = vld [vmem:[#allocation23_spill] sm:$0xff]  ;;  %v7381_v10 = vor.u32 %v9008_v59, %v7378_v1  ;;  %v9018_v1 = vld [vmem:[#allocation10 + $0x9a4] sm:$0xf] }
 0x21d   :  { %5072 = vmatpush.bf16.msrb.mxu0 %v6957_v38  ;;  %v4866_v38 = vpop.f32.mrf.mxu0 }
 0x21e   :  { %5085 = vmatpush.bf16.msrb.mxu1 %v7021_v20  ;;  %v4867_v5 = vadd.f32 %v4866_v38, %v9824_v22  ;;  %v9016_v38 = vld [vmem:[#allocation10 + $0x994] sm:$0xf] }
 0x21f   :  { %5098 = vmatpush.bf16.msrb.mxu2 %v7085_v56  ;;  %v4879_v56 = vpop.f32.mrf.mxu1 }
 0x220   :  { %5111 = vmatpush.bf16.msrb.mxu3 %v7149_v62  ;;  %5073 = vmatmul.bf16.vlgmr.msrb.gmra.mxu0 %v9681_v60  ;;  %v7242_v60 = vld [vmem:[#allocation10 + $0x848] sm:$0xf0]  ;;  %v8972_v62 = vld [vmem:[#allocation10 + $0x834] sm:$0xf]  ;;  %v4880_v46 = vadd.f32 %v4879_v56, %v4867_v5  ;;  %v8966_v5 = vld [vmem:[#allocation10 + $0x804] sm:$0xf]  ;;  %v7285_v56 = vor.u32 %v8984_v16, %v7282_v0 }
 0x221   :  { %5117 = vmatpush.bf16.msra.mxu0 %v7269_v36  ;;  %5086 = vmatmul.bf16.vlgmr.msrb.gmra.mxu1 %v9900_v52  ;;  %v7245_v20 = vor.u32 %v8974_v47, %v7242_v60  ;;  %v7234_v36 = vld [vmem:[#allocation10 + $0x838] sm:$0xf0]  ;;  %v7418_v52 = vld [vmem:[#allocation10 + $0x9a8] sm:$0xf0]  ;;  %v8968_v47 = vld [vmem:[#allocation10 + $0x814] sm:$0xf] }
 0x222   :  { %5130 = vmatpush.bf16.msra.mxu1 %v7333_v18  ;;  %5099 = vmatmul.bf16.vlgmr.msrb.gmra.mxu2 %v9683_v61  ;;  %v7370_v61 = vld [vmem:[#allocation10 + $0x948] sm:$0xf0]  ;;  %v8988_v18 = vld [vmem:[#allocation10 + $0x8b4] sm:$0xf]  ;;  %v7237_v42 = vor.u32 %v8972_v62, %v7234_v36  ;;  %v7218_v60 = vld [vmem:[#allocation10 + $0x818] sm:$0xf0] }
 0x223   :  { %5143 = vmatpush.bf16.msra.mxu2 %v7397_v51  ;;  %5112 = vmatmul.bf16.vlgmr.msrb.gmra.mxu3 %v9901_v54  ;;  %v7373_v9 = vor.u32 %v9006_v12, %v7370_v61  ;;  %v7437_v51 = vor.u32 %v9022_v53, %v7434_v41  ;;  %v7301_v22 = vor.u32 %v8988_v18, %v7298_v4  ;;  %v9000_v12 = vld [vmem:[#allocation10 + $0x914] sm:$0xf]  ;;  %v7346_v61 = vld [vmem:[#allocation10 + $0x918] sm:$0xf0]  ;;  %v7274_v62 = vld [vmem:[#allocation10 + $0x888] sm:$0xf0] }
 0x224   :  { %5156 = vmatpush.bf16.msra.mxu3 %v7461_v58  ;;  %v7362_v58 = vld [vmem:[#allocation10 + $0x938] sm:$0xf0]  ;;  %v7221_v41 = vor.u32 %v8968_v47, %v7218_v60  ;;  %v8998_v36 = vld [vmem:[#allocation10 + $0x904] sm:$0xf]  ;;  %v7402_v4 = vld [vmem:[#allocation10 + $0x988] sm:$0xf0] }
 0x225   :  { %5118 = vmatpush.bf16.msra.mxu0 %v7261_v21  ;;  %v7365_v14 = vor.u32 %v9004_v57, %v7362_v58  ;;  %v7226_v21 = vld [vmem:[#allocation10 + $0x828] sm:$0xf0]  ;;  %v4892_v37 = vpop.f32.mrf.mxu2  ;;  %v4868_v7 = vpop.f32.mrf.mxu0  ;;  %v7410_v53 = vld [vmem:[#allocation10 + $0x998] sm:$0xf0]  ;;  %v9044_v58 = vld [vmem:[#allocation10 + $0xa74] sm:$0xf] }
 0x226   :  { %5131 = vmatpush.bf16.msra.mxu1 %v7325_v2  ;;  %v8986_v2 = vld [vmem:[#allocation10 + $0x8a4] sm:$0xf]  ;;  %v4893_v6 = vadd.f32 %v4892_v37, %v4880_v46  ;;  %v4905_v59 = vpop.f32.mrf.mxu3  ;;  %v7229_v44 = vor.u32 %v8970_v55, %v7226_v21  ;;  %v7413_v18 = vor.u32 %v9016_v38, %v7410_v53  ;;  %v9076_v55 = vld [vmem:[#allocation10 + $0xb74] sm:$0xf]  ;;  %v7650_v21 = vld [vmem:[#allocation10 + $0xb78] sm:$0xf0] }
 0x227   :  { %5144 = vmatpush.bf16.msra.mxu2 %v7389_v24  ;;  %v7429_v24 = vor.u32 %v9020_v15, %v7426_v11  ;;  %v4881_v54 = vpop.f32.mrf.mxu1  ;;  %v9014_v46 = vld [vmem:[#allocation10 + $0x984] sm:$0xf]  ;;  %v7522_v15 = vld [vmem:[#allocation10 + $0xa78] sm:$0xf0]  ;;  %v9060_v11 = vld [vmem:[#allocation10 + $0xaf4] sm:$0xf] }
 0x228   :  { %5157 = vmatpush.bf16.msra.mxu3 %v7453_v23  ;;  %v7354_v23 = vld [vmem:[#allocation10 + $0x928] sm:$0xf0]  ;;  %v9092_v37 = vld [vmem:[#allocation10 + $0xbf4] sm:$0xf]  ;;  %v9058_v7 = vld [vmem:[#allocation10 + $0xae4] sm:$0xf] }
 0x229   :  { %5119 = vmatpush.bf16.msra.mxu0 %v7253_v8  ;;  %v9831_v8 = vadd.f32 %v4905_v59, %v4893_v6  ;;  %v7653_v59 = vor.u32 %v9076_v55, %v7650_v21  ;;  %v7578_v54 = vld [vmem:[#allocation10 + $0xae8] sm:$0xf0]  ;;  %v9090_v47 = vld [vmem:[#allocation10 + $0xbe4] sm:$0xf]  ;;  %v9056_v38 = vld [vmem:[#allocation10 + $0xad4] sm:$0xf] }
 0x22a   :  { %5132 = vmatpush.bf16.msra.mxu1 %v7317_v63  ;;  %v7293_v63 = vor.u32 %v8986_v2, %v7290_v26  ;;  %v7714_v26 = vld [vmem:[#allocation10 + $0xbf8] sm:$0xf0]  ;;  %v7706_v60 = vld [vmem:[#allocation10 + $0xbe8] sm:$0xf0] }
 0x22b   :  { %5145 = vmatpush.bf16.msra.mxu2 %v7381_v10  ;;  %v7357_v10 = vor.u32 %v9002_v49, %v7354_v23  ;;  %v7405_v49 = vor.u32 %v9014_v46, %v7402_v4  ;;  %v7525_v23 = vor.u32 %v9044_v58, %v7522_v15  ;;  %v7709_v53 = vor.u32 %v9090_v47, %v7706_v60  ;;  %v9038_v46 = vld [vmem:[#allocation10 + $0xa44] sm:$0xf]  ;;  %v7562_v58 = vld [vmem:[#allocation10 + $0xac8] sm:$0xf0] }
 0x22c   :  { %5158 = vmatpush.bf16.msra.mxu3 %v7445_v48  ;;  %v7421_v48 = vor.u32 %v9018_v1, %v7418_v52  ;;  %v9042_v1 = vld [vmem:[#allocation10 + $0xa64] sm:$0xf]  ;;  %v7514_v52 = vld [vmem:[#allocation10 + $0xa68] sm:$0xf0] }
 0x22d   :  { %5120 = vmatpush.bf16.msra.mxu0 %v7245_v20  ;;  %v7210_v20 = vld [vmem:[#allocation10 + $0x808] sm:$0xf0]  ;;  %v4894_v57 = vpop.f32.mrf.mxu2  ;;  %v7517_v16 = vor.u32 %v9042_v1, %v7514_v52  ;;  %v9054_v4 = vld [vmem:[#allocation10 + $0xac4] sm:$0xf]  ;;  %v9084_v52 = vld [vmem:[#allocation10 + $0xbb4] sm:$0xf] }
 0x22e   :  { %5133 = vmatpush.bf16.msra.mxu1 %v7309_v29  ;;  %v7349_v29 = vor.u32 %v9000_v12, %v7346_v61  ;;  %v9040_v12 = vld [vmem:[#allocation10 + $0xa54] sm:$0xf]  ;;  %v7506_v61 = vld [vmem:[#allocation10 + $0xa58] sm:$0xf0]  ;;  %v9070_v15 = vld [vmem:[#allocation10 + $0xb44] sm:$0xf]  ;;  %v7565_v55 = vor.u32 %v9054_v4, %v7562_v58 }
 0x22f   :  { %5146 = vmatpush.bf16.msra.mxu2 %v7373_v9  ;;  %v8982_v9 = vld [vmem:[#allocation10 + $0x884] sm:$0xf]  ;;  %v7482_v47 = vld [vmem:[#allocation10 + $0xa28] sm:$0xf0]  ;;  %v7538_v4 = vld [vmem:[#allocation10 + $0xa98] sm:$0xf0] }
 0x230   :  { %5159 = vmatpush.bf16.msra.mxu3 %v7437_v51  ;;  %v7338_v51 = vld [vmem:[#allocation10 + $0x908] sm:$0xf0]  ;;  %v7277_v2 = vor.u32 %v8982_v9, %v7274_v62  ;;  %v7698_v9 = vld [vmem:[#allocation10 + $0xbd8] sm:$0xf0]  ;;  %v9050_v60 = vld [vmem:[#allocation10 + $0xaa4] sm:$0xf] }
 0x231   :  { %5121 = vmatpush.bf16.msra.mxu0 %v7237_v42  ;;  %v4907_v42 = vpop.f32.mrf.mxu3  ;;  %v9903_v62 = vld [vmem:[#allocation25_spill] sm:$0xff] }
 0x232   :  { %5134 = vmatpush.bf16.msra.mxu1 %v7301_v22  ;;  %v7213_v22 = vor.u32 %v8966_v5, %v7210_v20  ;;  %v9072_v5 = vld [vmem:[#allocation10 + $0xb54] sm:$0xf]  ;;  %v7634_v20 = vld [vmem:[#allocation10 + $0xb58] sm:$0xf0]  ;;  %v7690_v42 = vld [vmem:[#allocation10 + $0xbc8] sm:$0xf0] }
 0x233   :  { %5147 = vmatpush.bf16.msra.mxu2 %v7365_v14  ;;  %v7586_v14 = vld [vmem:[#allocation10 + $0xaf8] sm:$0xf0] }
 0x234   :  { %5160 = vmatpush.bf16.msra.mxu3 %v7429_v24  ;;  %v7341_v24 = vor.u32 %v8998_v36, %v7338_v51  ;;  %v7589_v6 = vor.u32 %v9060_v11, %v7586_v14  ;;  %v7509_v36 = vor.u32 %v9040_v12, %v7506_v61  ;;  %v7637_v51 = vor.u32 %v9072_v5, %v7634_v20  ;;  %v9086_v11 = vld [vmem:[#allocation10 + $0xbc4] sm:$0xf]  ;;  %v7610_v61 = vld [vmem:[#allocation10 + $0xb28] sm:$0xf0]  ;;  %v7602_v58 = vld [vmem:[#allocation10 + $0xb18] sm:$0xf0] }
 0x235   :  { %5122 = vmatpush.bf16.msra.mxu0 %v7229_v44  ;;  %v7717_v44 = vor.u32 %v9092_v37, %v7714_v26  ;;  %v9052_v37 = vld [vmem:[#allocation10 + $0xab4] sm:$0xf]  ;;  %v9066_v12 = vld [vmem:[#allocation10 + $0xb24] sm:$0xf]  ;;  %v7674_v5 = vld [vmem:[#allocation10 + $0xba8] sm:$0xf0] }
 0x236   :  { %5135 = vmatpush.bf16.msra.mxu1 %v7293_v63  ;;  %v9074_v63 = vld [vmem:[#allocation10 + $0xb64] sm:$0xf] }
 0x237   :  { %5148 = vmatpush.bf16.msra.mxu2 %v7357_v10  ;;  %v7642_v10 = vld [vmem:[#allocation10 + $0xb68] sm:$0xf0] }
 0x238   :  { %5161 = vmatpush.bf16.msra.mxu3 %v7421_v48  ;;  %v7581_v48 = vor.u32 %v9058_v7, %v7578_v54  ;;  %v7645_v0 = vor.u32 %v9074_v63, %v7642_v10  ;;  %v7682_v7 = vld [vmem:[#allocation10 + $0xbb8] sm:$0xf0]  ;;  %v9034_v10 = vld [vmem:[#allocation10 + $0xa24] sm:$0xf] }
 0x239   :  { %5123 = vmatpush.bf16.msra.mxu0 %v7221_v41  ;;  %v7570_v41 = vld [vmem:[#allocation10 + $0xad8] sm:$0xf0]  ;;  %v7485_v20 = vor.u32 %v9034_v10, %v7482_v47 }
 0x23a   :  { %5136 = vmatpush.bf16.msra.mxu1 %v7285_v56  ;;  %v9902_v56 = vld [vmem:[#allocation24_spill] sm:$0xff] }
 0x23b   :  { %5149 = vmatpush.bf16.msra.mxu2 %v7349_v29  ;;  %v9088_v29 = vld [vmem:[#allocation10 + $0xbd4] sm:$0xf]  ;;  %v7906_v10 = vld [vmem:[#allocation10 + $0xd78] sm:$0xf0] }
 0x23c   :  { %5162 = vmatpush.bf16.msra.mxu3 %v7413_v18  ;;  %v7573_v18 = vor.u32 %v9056_v38, %v7570_v41  ;;  %v7701_v57 = vor.u32 %v9088_v29, %v7698_v9  ;;  %v9082_v41 = vld [vmem:[#allocation10 + $0xba4] sm:$0xf] }
 0x23d   :  { %5124 = vmatpush.bf16.msra.mxu0 %v7213_v22  ;;  %v4918_v14 = vpop.f32.mrf.mxu0 }
 0x23e   :  { %5137 = vmatpush.bf16.msra.mxu1 %v7277_v2  ;;  %v9036_v2 = vld [vmem:[#allocation10 + $0xa34] sm:$0xf]  ;;  %v4931_v26 = vpop.f32.mrf.mxu1 }
 0x23f   :  { %5150 = vmatpush.bf16.msra.mxu2 %v7341_v24  ;;  %v7490_v24 = vld [vmem:[#allocation10 + $0xa38] sm:$0xf0]  ;;  %v4932_v1 = vadd.f32 %v4931_v26, %v4918_v14 }
 0x240   :  { %5163 = vmatpush.bf16.msra.mxu3 %v7405_v49  ;;  %5125 = vmatmul.bf16.vlgmr.msra.gmra.mxu0 %v9691_v32  ;;  %v7498_v32 = vld [vmem:[#allocation10 + $0xa48] sm:$0xf0]  ;;  %v7693_v49 = vor.u32 %v9086_v11, %v7690_v42  ;;  %v9030_v42 = vld [vmem:[#allocation10 + $0xa04] sm:$0xf] }
 0x241   :  { %5169 = vmatpush.bf16.msrb.mxu0 %v7525_v23  ;;  %5138 = vmatmul.bf16.vlgmr.msra.gmra.mxu1 %v9902_v56  ;;  %v7501_v22 = vor.u32 %v9038_v46, %v7498_v32  ;;  %v7554_v23 = vld [vmem:[#allocation10 + $0xab8] sm:$0xf0]  ;;  %v7677_v32 = vor.u32 %v9082_v41, %v7674_v5  ;;  %v7770_v41 = vld [vmem:[#allocation10 + $0xc68] sm:$0xf0]  ;;  %v9122_v5 = vld [vmem:[#allocation10 + $0xce4] sm:$0xf] }
 0x242   :  { %5182 = vmatpush.bf16.msrb.mxu1 %v7589_v6  ;;  %5151 = vmatmul.bf16.vlgmr.msra.gmra.mxu2 %v9693_v33  ;;  %v7626_v33 = vld [vmem:[#allocation10 + $0xb48] sm:$0xf0]  ;;  %v9068_v6 = vld [vmem:[#allocation10 + $0xb34] sm:$0xf]  ;;  %v7557_v54 = vor.u32 %v9052_v37, %v7554_v23  ;;  %v9078_v23 = vld [vmem:[#allocation10 + $0xb84] sm:$0xf] }
 0x243   :  { %5195 = vmatpush.bf16.msrb.mxu2 %v7653_v59  ;;  %5164 = vmatmul.bf16.vlgmr.msra.gmra.mxu3 %v9903_v62  ;;  %v7629_v21 = vor.u32 %v9070_v15, %v7626_v33  ;;  %v7618_v59 = vld [vmem:[#allocation10 + $0xb38] sm:$0xf0]  ;;  %v7613_v62 = vor.u32 %v9066_v12, %v7610_v61  ;;  %v9080_v15 = vld [vmem:[#allocation10 + $0xb94] sm:$0xf] }
 0x244   :  { %5208 = vmatpush.bf16.msrb.mxu3 %v7717_v44  ;;  %v7493_v44 = vor.u32 %v9036_v2, %v7490_v24  ;;  %v7621_v63 = vor.u32 %v9068_v6, %v7618_v59  ;;  %v7666_v33 = vld [vmem:[#allocation10 + $0xb98] sm:$0xf0]  ;;  %v7530_v2 = vld [vmem:[#allocation10 + $0xa88] sm:$0xf0]  ;;  %v9062_v24 = vld [vmem:[#allocation10 + $0xb04] sm:$0xf] }
 0x245   :  { %5170 = vmatpush.bf16.msrb.mxu0 %v7517_v16  ;;  %v4944_v16 = vpop.f32.mrf.mxu2  ;;  %v4920_v29 = vpop.f32.mrf.mxu0  ;;  %v7669_v26 = vor.u32 %v9080_v15, %v7666_v33  ;;  %v7658_v6 = vld [vmem:[#allocation10 + $0xb88] sm:$0xf0]  ;;  %v7826_v33 = vld [vmem:[#allocation10 + $0xcd8] sm:$0xf0] }
 0x246   :  { %5183 = vmatpush.bf16.msrb.mxu1 %v7581_v48  ;;  %v7685_v48 = vor.u32 %v9084_v52, %v7682_v7  ;;  %v4945_v38 = vadd.f32 %v4944_v16, %v4932_v1  ;;  %v4933_v46 = vpop.f32.mrf.mxu1  ;;  %v9108_v1 = vld [vmem:[#allocation10 + $0xc74] sm:$0xf]  ;;  %v7778_v52 = vld [vmem:[#allocation10 + $0xc78] sm:$0xf0]  ;;  %v7834_v29 = vld [vmem:[#allocation10 + $0xce8] sm:$0xf0] }
 0x247   :  { %5196 = vmatpush.bf16.msrb.mxu2 %v7645_v0  ;;  %v7546_v0 = vld [vmem:[#allocation10 + $0xaa8] sm:$0xf0]  ;;  %v9124_v7 = vld [vmem:[#allocation10 + $0xcf4] sm:$0xf]  ;;  %v7781_v12 = vor.u32 %v9108_v1, %v7778_v52  ;;  %v7837_v46 = vor.u32 %v9122_v5, %v7834_v29  ;;  %v9098_v5 = vld [vmem:[#allocation10 + $0xc24] sm:$0xf] }
 0x248   :  { %5209 = vmatpush.bf16.msrb.mxu3 %v7709_v53  ;;  %v4957_v53 = vpop.f32.mrf.mxu3  ;;  %v7549_v9 = vor.u32 %v9050_v60, %v7546_v0  ;;  %v9156_v16 = vld [vmem:[#allocation10 + $0xdf4] sm:$0xf]  ;;  %v7661_v0 = vor.u32 %v9078_v23, %v7658_v6  ;;  %v9134_v23 = vld [vmem:[#allocation10 + $0xd44] sm:$0xf] }
 0x249   :  { %5171 = vmatpush.bf16.msrb.mxu0 %v7509_v36  ;;  %v9837_v56 = vadd.f32 %v4957_v53, %v4945_v38  ;;  %v9032_v36 = vld [vmem:[#allocation10 + $0xa14] sm:$0xf]  ;;  %v9106_v53 = vld [vmem:[#allocation10 + $0xc64] sm:$0xf] }
 0x24a   :  { %5184 = vmatpush.bf16.msrb.mxu1 %v7573_v18  ;;  %v7474_v18 = vld [vmem:[#allocation10 + $0xa18] sm:$0xf0]  ;;  %v9150_v6 = vld [vmem:[#allocation10 + $0xdc4] sm:$0xf] }
 0x24b   :  { %5197 = vmatpush.bf16.msrb.mxu2 %v7637_v51  ;;  %v9048_v51 = vld [vmem:[#allocation10 + $0xa94] sm:$0xf]  ;;  %v7477_v11 = vor.u32 %v9032_v36, %v7474_v18  ;;  %v9154_v36 = vld [vmem:[#allocation10 + $0xde4] sm:$0xf]  ;;  %v7962_v18 = vld [vmem:[#allocation10 + $0xde8] sm:$0xf0] }
 0x24c   :  { %5210 = vmatpush.bf16.msrb.mxu3 %v7701_v57  ;;  %v9064_v57 = vld [vmem:[#allocation10 + $0xb14] sm:$0xf]  ;;  %v7541_v14 = vor.u32 %v9048_v51, %v7538_v4  ;;  %v7773_v51 = vor.u32 %v9106_v53, %v7770_v41  ;;  %v7965_v15 = vor.u32 %v9154_v36, %v7962_v18  ;;  %v9114_v29 = vld [vmem:[#allocation10 + $0xca4] sm:$0xf]  ;;  %v7866_v18 = vld [vmem:[#allocation10 + $0xd28] sm:$0xf0] }
 0x24d   :  { %5172 = vmatpush.bf16.msrb.mxu0 %v7501_v22  ;;  %v7466_v22 = vld [vmem:[#allocation10 + $0xa08] sm:$0xf0]  ;;  %v4946_v37 = vpop.f32.mrf.mxu2  ;;  %v9104_v4 = vld [vmem:[#allocation10 + $0xc54] sm:$0xf]  ;;  %v9130_v36 = vld [vmem:[#allocation10 + $0xd24] sm:$0xf] }
 0x24e   :  { %5185 = vmatpush.bf16.msrb.mxu1 %v7565_v55  ;;  %v7605_v55 = vor.u32 %v9064_v57, %v7602_v58  ;;  %v7762_v57 = vld [vmem:[#allocation10 + $0xc58] sm:$0xf0]  ;;  %v9120_v58 = vld [vmem:[#allocation10 + $0xcd4] sm:$0xf]  ;;  %v9118_v37 = vld [vmem:[#allocation10 + $0xcc4] sm:$0xf] }
 0x24f   :  { %5198 = vmatpush.bf16.msrb.mxu2 %v7629_v21  ;;  %v9046_v21 = vld [vmem:[#allocation10 + $0xa84] sm:$0xf] }
 0x250   :  { %5211 = vmatpush.bf16.msrb.mxu3 %v7693_v49  ;;  %v7594_v49 = vld [vmem:[#allocation10 + $0xb08] sm:$0xf0]  ;;  %v4959_v59 = vpop.f32.mrf.mxu3  ;;  %v7533_v47 = vor.u32 %v9046_v21, %v7530_v2  ;;  %v7829_v21 = vor.u32 %v9120_v58, %v7826_v33 }
 0x251   :  { %5173 = vmatpush.bf16.msrb.mxu0 %v7493_v44  ;;  %v7469_v44 = vor.u32 %v9030_v42, %v7466_v22  ;;  %v7597_v60 = vor.u32 %v9062_v24, %v7594_v49  ;;  %v7890_v42 = vld [vmem:[#allocation10 + $0xd58] sm:$0xf0]  ;;  %v9152_v22 = vld [vmem:[#allocation10 + $0xdd4] sm:$0xf]  ;;  %v9102_v24 = vld [vmem:[#allocation10 + $0xc44] sm:$0xf] }
 0x252   :  { %5186 = vmatpush.bf16.msrb.mxu1 %v7557_v54  ;;  %v7842_v54 = vld [vmem:[#allocation10 + $0xcf8] sm:$0xf0]  ;;  %v7818_v49 = vld [vmem:[#allocation10 + $0xcc8] sm:$0xf0] }
 0x253   :  { %5199 = vmatpush.bf16.msrb.mxu2 %v7621_v63  ;;  %v9140_v63 = vld [vmem:[#allocation10 + $0xd74] sm:$0xf]  ;;  %v7845_v61 = vor.u32 %v9124_v7, %v7842_v54 }
 0x254   :  { %5212 = vmatpush.bf16.msrb.mxu3 %v7685_v48  ;;  %v7970_v48 = vld [vmem:[#allocation10 + $0xdf8] sm:$0xf0]  ;;  %v7909_v38 = vor.u32 %v9140_v63, %v7906_v10  ;;  %v9100_v7 = vld [vmem:[#allocation10 + $0xc34] sm:$0xf] }
 0x255   :  { %5174 = vmatpush.bf16.msrb.mxu0 %v7485_v20  ;;  %v7973_v20 = vor.u32 %v9156_v16, %v7970_v48  ;;  %v9116_v54 = vld [vmem:[#allocation10 + $0xcb4] sm:$0xf]  ;;  %v7874_v48 = vld [vmem:[#allocation10 + $0xd38] sm:$0xf0] }
 0x256   :  { %5187 = vmatpush.bf16.msrb.mxu1 %v7549_v9  ;;  %v9138_v9 = vld [vmem:[#allocation10 + $0xd64] sm:$0xf]  ;;  %v9132_v16 = vld [vmem:[#allocation10 + $0xd34] sm:$0xf] }
 0x257   :  { %5200 = vmatpush.bf16.msrb.mxu2 %v7613_v62  ;;  %v7898_v62 = vld [vmem:[#allocation10 + $0xd68] sm:$0xf0]  ;;  %v7877_v41 = vor.u32 %v9132_v16, %v7874_v48  ;;  %v9188_v16 = vld [vmem:[#allocation10 + $0xef4] sm:$0xf] }
 0x258   :  { %5213 = vmatpush.bf16.msrb.mxu3 %v7677_v32  ;;  %v7901_v32 = vor.u32 %v9138_v9, %v7898_v62  ;;  %v7802_v62 = vld [vmem:[#allocation10 + $0xca8] sm:$0xf0] }
 0x259   :  { %5175 = vmatpush.bf16.msrb.mxu0 %v7477_v11  ;;  %v9136_v11 = vld [vmem:[#allocation10 + $0xd54] sm:$0xf]  ;;  %v7805_v33 = vor.u32 %v9114_v29, %v7802_v62  ;;  %v9170_v62 = vld [vmem:[#allocation10 + $0xe64] sm:$0xf] }
 0x25a   :  { %5188 = vmatpush.bf16.msrb.mxu1 %v7541_v14  ;;  %v7954_v14 = vld [vmem:[#allocation10 + $0xdd8] sm:$0xf0]  ;;  %v7893_v2 = vor.u32 %v9136_v11, %v7890_v42  ;;  %v7869_v11 = vor.u32 %v9130_v36, %v7866_v18  ;;  %v9096_v42 = vld [vmem:[#allocation10 + $0xc14] sm:$0xf]  ;;  %v8026_v36 = vld [vmem:[#allocation10 + $0xe68] sm:$0xf0] }
 0x25b   :  { %5201 = vmatpush.bf16.msrb.mxu2 %v7605_v55  ;;  %v7765_v55 = vor.u32 %v9104_v4, %v7762_v57  ;;  %v7930_v4 = vld [vmem:[#allocation10 + $0xda8] sm:$0xf0]  ;;  %v9186_v18 = vld [vmem:[#allocation10 + $0xee4] sm:$0xf] }
 0x25c   :  { %5214 = vmatpush.bf16.msrb.mxu3 %v7669_v26  ;;  %v7957_v26 = vor.u32 %v9152_v22, %v7954_v14  ;;  %v7730_v22 = vld [vmem:[#allocation10 + $0xc18] sm:$0xf0]  ;;  %v9112_v14 = vld [vmem:[#allocation10 + $0xc94] sm:$0xf] }
 0x25d   :  { %5176 = vmatpush.bf16.msrb.mxu0 %v7469_v44  ;;  %v4970_v1 = vpop.f32.mrf.mxu0  ;;  %v7746_v44 = vld [vmem:[#allocation10 + $0xc38] sm:$0xf0] }
 0x25e   :  { %5189 = vmatpush.bf16.msrb.mxu1 %v7533_v47  ;;  %v4971_v63 = vadd.f32 %v4970_v1, %v9837_v56  ;;  %v4983_v10 = vpop.f32.mrf.mxu1  ;;  %v7786_v1 = vld [vmem:[#allocation10 + $0xc88] sm:$0xf0] }
 0x25f   :  { %5202 = vmatpush.bf16.msrb.mxu2 %v7597_v60  ;;  %v7810_v60 = vld [vmem:[#allocation10 + $0xcb8] sm:$0xf0] }
 0x260   :  { %5215 = vmatpush.bf16.msrb.mxu3 %v7661_v0  ;;  %5177 = vmatmul.bf16.vlgmr.msrb.gmra.mxu0 %v9699_v39  ;;  %v7754_v39 = vld [vmem:[#allocation10 + $0xc48] sm:$0xf0]  ;;  %v9148_v0 = vld [vmem:[#allocation10 + $0xdb4] sm:$0xf]  ;;  %v7813_v53 = vor.u32 %v9116_v54, %v7810_v60  ;;  %v9142_v54 = vld [vmem:[#allocation10 + $0xd84] sm:$0xf] }
 0x261   :  { %5221 = vmatpush.bf16.msra.mxu0 %v7781_v12  ;;  %5190 = vmatmul.bf16.vlgmr.msrb.gmra.mxu1 %v9703_v43  ;;  %v7946_v43 = vld [vmem:[#allocation10 + $0xdc8] sm:$0xf0]  ;;  %v7757_v59 = vor.u32 %v9102_v24, %v7754_v39  ;;  %v7938_v12 = vld [vmem:[#allocation10 + $0xdb8] sm:$0xf0]  ;;  %v9128_v24 = vld [vmem:[#allocation10 + $0xd14] sm:$0xf] }
 0x262   :  { %5234 = vmatpush.bf16.msra.mxu1 %v7845_v61  ;;  %5203 = vmatmul.bf16.vlgmr.msrb.gmra.mxu2 %v9701_v40  ;;  %v7882_v40 = vld [vmem:[#allocation10 + $0xd48] sm:$0xf0]  ;;  %v7949_v47 = vor.u32 %v9150_v6, %v7946_v43  ;;  %v4984_v61 = vadd.f32 %v4983_v10, %v4971_v63  ;;  %v7941_v56 = vor.u32 %v9148_v0, %v7938_v12  ;;  %v7858_v39 = vld [vmem:[#allocation10 + $0xd18] sm:$0xf0]  ;;  %v9204_v12 = vld [vmem:[#allocation10 + $0xf74] sm:$0xf] }
 0x263   :  { %5247 = vmatpush.bf16.msra.mxu2 %v7909_v38  ;;  %5216 = vmatmul.bf16.vlgmr.msrb.gmra.mxu3 %v9705_v45  ;;  %v7821_v45 = vor.u32 %v9118_v37, %v7818_v49  ;;  %v7885_v52 = vor.u32 %v9134_v23, %v7882_v40  ;;  %v7749_v38 = vor.u32 %v9100_v7, %v7746_v44  ;;  %v9144_v37 = vld [vmem:[#allocation10 + $0xd94] sm:$0xf]  ;;  %v9094_v23 = vld [vmem:[#allocation10 + $0xc04] sm:$0xf]  ;;  %v7722_v40 = vld [vmem:[#allocation10 + $0xc08] sm:$0xf0] }
 0x264   :  { %5260 = vmatpush.bf16.msra.mxu3 %v7973_v20  ;;  %v7738_v20 = vld [vmem:[#allocation10 + $0xc28] sm:$0xf0]  ;;  %v7733_v49 = vor.u32 %v9096_v42, %v7730_v22  ;;  %v7861_v43 = vor.u32 %v9128_v24, %v7858_v39  ;;  %v8034_v60 = vld [vmem:[#allocation10 + $0xe78] sm:$0xf0]  ;;  %v7725_v48 = vor.u32 %v9094_v23, %v7722_v40  ;;  %v9168_v22 = vld [vmem:[#allocation10 + $0xe54] sm:$0xf] }
 0x265   :  { %5222 = vmatpush.bf16.msra.mxu0 %v7773_v51  ;;  %v4996_v9 = vpop.f32.mrf.mxu2  ;;  %v7741_v57 = vor.u32 %v9098_v5, %v7738_v20  ;;  %v7850_v44 = vld [vmem:[#allocation10 + $0xd08] sm:$0xf0]  ;;  %v8098_v0 = vld [vmem:[#allocation10 + $0xef8] sm:$0xf0]  ;;  %v9200_v24 = vld [vmem:[#allocation10 + $0xf54] sm:$0xf] }
 0x266   :  { %5235 = vmatpush.bf16.msra.mxu1 %v7837_v46  ;;  %v4997_v51 = vadd.f32 %v4996_v9, %v4984_v61  ;;  %v5009_v46 = vpop.f32.mrf.mxu3  ;;  %v7914_v63 = vld [vmem:[#allocation10 + $0xd88] sm:$0xf0]  ;;  %v8162_v61 = vld [vmem:[#allocation10 + $0xf78] sm:$0xf0]  ;;  %v8101_v9 = vor.u32 %v9188_v16, %v8098_v0  ;;  %v9180_v16 = vld [vmem:[#allocation10 + $0xeb4] sm:$0xf] }
 0x267   :  { %5248 = vmatpush.bf16.msra.mxu2 %v7901_v32  ;;  %v9146_v32 = vld [vmem:[#allocation10 + $0xda4] sm:$0xf]  ;;  %v8226_v5 = vld [vmem:[#allocation10 + $0xff8] sm:$0xf0]  ;;  %v7917_v20 = vor.u32 %v9142_v54, %v7914_v63 }
 0x268   :  { %5261 = vmatpush.bf16.msra.mxu3 %v7965_v15  ;;  %v9844_v58 = vadd.f32 %v5009_v46, %v4997_v51  ;;  %v4972_v15 = vpop.f32.mrf.mxu0  ;;  %v8090_v46 = vld [vmem:[#allocation10 + $0xee8] sm:$0xf0]  ;;  %v8146_v39 = vld [vmem:[#allocation10 + $0xf58] sm:$0xf0] }
 0x269   :  { %5223 = vmatpush.bf16.msra.mxu0 %v7765_v55  ;;  %v4985_v55 = vpop.f32.mrf.mxu1  ;;  %v8218_v15 = vld [vmem:[#allocation10 + $0xfe8] sm:$0xf0]  ;;  %v8149_v40 = vor.u32 %v9200_v24, %v8146_v39  ;;  %v9176_v24 = vld [vmem:[#allocation10 + $0xe94] sm:$0xf] }
 0x26a   :  { %5236 = vmatpush.bf16.msra.mxu1 %v7829_v21  ;;  %v7933_v21 = vor.u32 %v9146_v32, %v7930_v4  ;;  %v9202_v32 = vld [vmem:[#allocation10 + $0xf64] sm:$0xf]  ;;  %v8154_v4 = vld [vmem:[#allocation10 + $0xf68] sm:$0xf0]  ;;  %v9184_v55 = vld [vmem:[#allocation10 + $0xed4] sm:$0xf] }
 0x26b   :  { %5249 = vmatpush.bf16.msra.mxu2 %v7893_v2  ;;  %v7794_v2 = vld [vmem:[#allocation10 + $0xc98] sm:$0xf0]  ;;  %v8157_v42 = vor.u32 %v9202_v32, %v8154_v4 }
 0x26c   :  { %5262 = vmatpush.bf16.msra.mxu3 %v7957_v26  ;;  %v7922_v26 = vld [vmem:[#allocation10 + $0xd98] sm:$0xf0]  ;;  %v7797_v6 = vor.u32 %v9112_v14, %v7794_v2 }
 0x26d   :  { %5224 = vmatpush.bf16.msra.mxu0 %v7757_v59  ;;  %v9110_v59 = vld [vmem:[#allocation10 + $0xc84] sm:$0xf]  ;;  %v7925_v7 = vor.u32 %v9144_v37, %v7922_v26  ;;  %v8018_v14 = vld [vmem:[#allocation10 + $0xe58] sm:$0xf0]  ;;  %v9216_v37 = vld [vmem:[#allocation10 + $0xfd4] sm:$0xf] }
 0x26e   :  { %5237 = vmatpush.bf16.msra.mxu1 %v7821_v45  ;;  %v9126_v45 = vld [vmem:[#allocation10 + $0xd04] sm:$0xf]  ;;  %v5011_v10 = vpop.f32.mrf.mxu3  ;;  %v8082_v2 = vld [vmem:[#allocation10 + $0xed8] sm:$0xf0] }
 0x26f   :  { %5250 = vmatpush.bf16.msra.mxu2 %v7885_v52  ;;  %v4998_v52 = vpop.f32.mrf.mxu2  ;;  %v8210_v26 = vld [vmem:[#allocation10 + $0xfd8] sm:$0xf0]  ;;  %v8085_v23 = vor.u32 %v9184_v55, %v8082_v2 }
 0x270   :  { %5263 = vmatpush.bf16.msra.mxu3 %v7949_v47  ;;  %v9172_v47 = vld [vmem:[#allocation10 + $0xe74] sm:$0xf]  ;;  %v7986_v2 = vld [vmem:[#allocation10 + $0xe18] sm:$0xf0] }
 0x271   :  { %5225 = vmatpush.bf16.msra.mxu0 %v7749_v38  ;;  %v7789_v38 = vor.u32 %v9110_v59, %v7786_v1  ;;  %v8037_v29 = vor.u32 %v9172_v47, %v8034_v60  ;;  %v8213_v59 = vor.u32 %v9216_v37, %v8210_v26  ;;  %v8074_v1 = vld [vmem:[#allocation10 + $0xec8] sm:$0xf0]  ;;  %v9164_v47 = vld [vmem:[#allocation10 + $0xe34] sm:$0xf]  ;;  %v8002_v60 = vld [vmem:[#allocation10 + $0xe38] sm:$0xf0] }
 0x272   :  { %5238 = vmatpush.bf16.msra.mxu1 %v7813_v53  ;;  %v7853_v53 = vor.u32 %v9126_v45, %v7850_v44  ;;  %v9198_v45 = vld [vmem:[#allocation10 + $0xf44] sm:$0xf]  ;;  %v8050_v37 = vld [vmem:[#allocation10 + $0xe98] sm:$0xf0]  ;;  %v9192_v26 = vld [vmem:[#allocation10 + $0xf14] sm:$0xf] }
 0x273   :  { %5251 = vmatpush.bf16.msra.mxu2 %v7877_v41  ;;  %v9220_v41 = vld [vmem:[#allocation10 + $0xff4] sm:$0xf] }
 0x274   :  { %5264 = vmatpush.bf16.msra.mxu3 %v7941_v56  ;;  %v8165_v56 = vor.u32 %v9204_v12, %v8162_v61  ;;  %v8229_v51 = vor.u32 %v9220_v41, %v8226_v5  ;;  %v8066_v12 = vld [vmem:[#allocation10 + $0xeb8] sm:$0xf0]  ;;  %v9196_v61 = vld [vmem:[#allocation10 + $0xf34] sm:$0xf]  ;;  %v8005_v5 = vor.u32 %v9164_v47, %v8002_v60 }
 0x275   :  { %5226 = vmatpush.bf16.msra.mxu0 %v7741_v57  ;;  %v9218_v57 = vld [vmem:[#allocation10 + $0xfe4] sm:$0xf]  ;;  %v8194_v41 = vld [vmem:[#allocation10 + $0xfb8] sm:$0xf0]  ;;  %v9252_v47 = vld [vmem:[#allocation10 + $0x10f4] sm:$0xf] }
 0x276   :  { %5239 = vmatpush.bf16.msra.mxu1 %v7805_v33  ;;  %v8029_v33 = vor.u32 %v9170_v62, %v8026_v36 }
 0x277   :  { %5252 = vmatpush.bf16.msra.mxu2 %v7869_v11  ;;  %v8093_v11 = vor.u32 %v9186_v18, %v8090_v46  ;;  %v8058_v18 = vld [vmem:[#allocation10 + $0xea8] sm:$0xf0] }
 0x278   :  { %5265 = vmatpush.bf16.msra.mxu3 %v7933_v21  ;;  %v8221_v21 = vor.u32 %v9218_v57, %v8218_v15  ;;  %v8122_v46 = vld [vmem:[#allocation10 + $0xf28] sm:$0xf0]  ;;  %v9210_v57 = vld [vmem:[#allocation10 + $0xfa4] sm:$0xf] }
 0x279   :  { %5227 = vmatpush.bf16.msra.mxu0 %v7733_v49  ;;  %v8021_v49 = vor.u32 %v9168_v22, %v8018_v14  ;;  %v8186_v15 = vld [vmem:[#allocation10 + $0xfa8] sm:$0xf0] }
 0x27a   :  { %5240 = vmatpush.bf16.msra.mxu1 %v7797_v6  ;;  %v9166_v6 = vld [vmem:[#allocation10 + $0xe44] sm:$0xf]  ;;  %v8189_v39 = vor.u32 %v9210_v57, %v8186_v15 }
 0x27b   :  { %5253 = vmatpush.bf16.msra.mxu2 %v7861_v43  ;;  %v9182_v43 = vld [vmem:[#allocation10 + $0xec4] sm:$0xf] }
 0x27c   :  { %5266 = vmatpush.bf16.msra.mxu3 %v7925_v7  ;;  %v8202_v7 = vld [vmem:[#allocation10 + $0xfc8] sm:$0xf0]  ;;  %v8077_v63 = vor.u32 %v9182_v43, %v8074_v1 }
 0x27d   :  { %5228 = vmatpush.bf16.msra.mxu0 %v7725_v48  ;;  %v5022_v52 = vpop.f32.mrf.mxu0  ;;  %v7978_v43 = vld [vmem:[#allocation10 + $0xe08] sm:$0xf0] }
 0x27e   :  { %5241 = vmatpush.bf16.msra.mxu1 %v7789_v38  ;;  %v5035_v54 = vpop.f32.mrf.mxu1  ;;  %v8130_v38 = vld [vmem:[#allocation10 + $0xf38] sm:$0xf0] }
 0x27f   :  { %5254 = vmatpush.bf16.msra.mxu2 %v7853_v53  ;;  %v9212_v53 = vld [vmem:[#allocation10 + $0xfb4] sm:$0xf] }
 0x280   :  { %5267 = vmatpush.bf16.msra.mxu3 %v7917_v20  ;;  %5229 = vmatmul.bf16.vlgmr.msra.gmra.mxu0 %v9720_v25  ;;  %v8010_v25 = vld [vmem:[#allocation10 + $0xe48] sm:$0xf0]  ;;  %v8133_v20 = vor.u32 %v9196_v61, %v8130_v38  ;;  %v8197_v62 = vor.u32 %v9212_v53, %v8194_v41  ;;  %v9284_v53 = vld [vmem:[#allocation10 + $0x11f4] sm:$0xf]  ;;  %v8482_v41 = vld [vmem:[#allocation10 + $0x11f8] sm:$0xf0] }
 0x281   :  { %5273 = vmatpush.bf16.msrb.mxu0 %v8037_v29  ;;  %5242 = vmatmul.bf16.vlgmr.msra.gmra.mxu1 %v9724_v17  ;;  %v9214_v17 = vld [vmem:[#allocation10 + $0xfc4] sm:$0xf]  ;;  %v8013_v44 = vor.u32 %v9166_v6, %v8010_v25 }
 0x282   :  { %5286 = vmatpush.bf16.msrb.mxu1 %v8101_v9  ;;  %5255 = vmatmul.bf16.vlgmr.msra.gmra.mxu2 %v9722_v13  ;;  %v8138_v13 = vld [vmem:[#allocation10 + $0xf48] sm:$0xf0]  ;;  %v8205_v48 = vor.u32 %v9214_v17, %v8202_v7  ;;  %v9162_v29 = vld [vmem:[#allocation10 + $0xe24] sm:$0xf] }
 0x283   :  { %5299 = vmatpush.bf16.msrb.mxu2 %v8165_v56  ;;  %5268 = vmatmul.bf16.vlgmr.msra.gmra.mxu3 %v9726_v27  ;;  %v5023_v27 = vadd.f32 %v5022_v52, %v9844_v58  ;;  %v8141_v10 = vor.u32 %v9198_v45, %v8138_v13  ;;  %v8069_v58 = vor.u32 %v9180_v16, %v8066_v12  ;;  %v7994_v9 = vld [vmem:[#allocation10 + $0xe28] sm:$0xf0]  ;;  %v9178_v56 = vld [vmem:[#allocation10 + $0xea4] sm:$0xf]  ;;  %v8418_v12 = vld [vmem:[#allocation10 + $0x1178] sm:$0xf0] }
 0x284   :  { %5312 = vmatpush.bf16.msrb.mxu3 %v8229_v51  ;;  %v9194_v51 = vld [vmem:[#allocation10 + $0xf24] sm:$0xf]  ;;  %v8061_v14 = vor.u32 %v9178_v56, %v8058_v18  ;;  %v8042_v13 = vld [vmem:[#allocation10 + $0xe88] sm:$0xf0] }
 0x285   :  { %5274 = vmatpush.bf16.msrb.mxu0 %v8029_v33  ;;  %v5036_v0 = vadd.f32 %v5035_v54, %v5023_v27  ;;  %v5048_v36 = vpop.f32.mrf.mxu2  ;;  %v5024_v33 = vpop.f32.mrf.mxu0  ;;  %v8125_v55 = vor.u32 %v9194_v51, %v8122_v46  ;;  %v9158_v25 = vld [vmem:[#allocation10 + $0xe04] sm:$0xf]  ;;  %v8106_v7 = vld [vmem:[#allocation10 + $0xf08] sm:$0xf0] }
 0x286   :  { %5287 = vmatpush.bf16.msrb.mxu1 %v8093_v11  ;;  %v5061_v4 = vpop.f32.mrf.mxu3  ;;  %v7997_v11 = vor.u32 %v9162_v29, %v7994_v9  ;;  %v9174_v45 = vld [vmem:[#allocation10 + $0xe84] sm:$0xf]  ;;  %v7981_v16 = vor.u32 %v9158_v25, %v7978_v43  ;;  %v8282_v56 = vld [vmem:[#allocation10 + $0x1068] sm:$0xf0] }
 0x287   :  { %5300 = vmatpush.bf16.msrb.mxu2 %v8157_v42  ;;  %v5049_v32 = vadd.f32 %v5048_v36, %v5036_v0  ;;  %v5037_v42 = vpop.f32.mrf.mxu1  ;;  %v9190_v52 = vld [vmem:[#allocation10 + $0xf04] sm:$0xf]  ;;  %v9268_v0 = vld [vmem:[#allocation10 + $0x1174] sm:$0xf]  ;;  %v8045_v61 = vor.u32 %v9174_v45, %v8042_v13  ;;  %v8485_v36 = vor.u32 %v9284_v53, %v8482_v41  ;;  %v8346_v18 = vld [vmem:[#allocation10 + $0x10e8] sm:$0xf0] }
 0x288   :  { %5313 = vmatpush.bf16.msrb.mxu3 %v8221_v21  ;;  %v9160_v21 = vld [vmem:[#allocation10 + $0xe14] sm:$0xf]  ;;  %v9206_v27 = vld [vmem:[#allocation10 + $0xf84] sm:$0xf]  ;;  %v8109_v38 = vor.u32 %v9190_v52, %v8106_v7  ;;  %v8421_v29 = vor.u32 %v9268_v0, %v8418_v12  ;;  %v8410_v46 = vld [vmem:[#allocation10 + $0x1168] sm:$0xf0] }
 0x289   :  { %5275 = vmatpush.bf16.msrb.mxu0 %v8021_v49  ;;  %v9851_v22 = vadd.f32 %v5061_v4, %v5049_v32  ;;  %v8114_v49 = vld [vmem:[#allocation10 + $0xf18] sm:$0xf0]  ;;  %v7989_v6 = vor.u32 %v9160_v21, %v7986_v2  ;;  %v9234_v9 = vld [vmem:[#allocation10 + $0x1064] sm:$0xf]  ;;  %v8474_v4 = vld [vmem:[#allocation10 + $0x11e8] sm:$0xf0] }
 0x28a   :  { %5288 = vmatpush.bf16.msrb.mxu1 %v8085_v23  ;;  %v9208_v23 = vld [vmem:[#allocation10 + $0xf94] sm:$0xf]  ;;  %v8117_v1 = vor.u32 %v9192_v26, %v8114_v49  ;;  %v9266_v51 = vld [vmem:[#allocation10 + $0x1164] sm:$0xf]  ;;  %v8285_v57 = vor.u32 %v9234_v9, %v8282_v56  ;;  %v8274_v42 = vld [vmem:[#allocation10 + $0x1058] sm:$0xf0] }
 0x28b   :  { %5301 = vmatpush.bf16.msrb.mxu2 %v8149_v40  ;;  %v8178_v40 = vld [vmem:[#allocation10 + $0xf98] sm:$0xf0]  ;;  %v9282_v32 = vld [vmem:[#allocation10 + $0x11e4] sm:$0xf]  ;;  %v8413_v33 = vor.u32 %v9266_v51, %v8410_v46  ;;  %v9264_v2 = vld [vmem:[#allocation10 + $0x1154] sm:$0xf] }
 0x28c   :  { %5314 = vmatpush.bf16.msrb.mxu3 %v8213_v59  ;;  %v8053_v59 = vor.u32 %v9176_v24, %v8050_v37  ;;  %v8181_v17 = vor.u32 %v9208_v23, %v8178_v40  ;;  %v8338_v21 = vld [vmem:[#allocation10 + $0x10d8] sm:$0xf0]  ;;  %v9230_v40 = vld [vmem:[#allocation10 + $0x1044] sm:$0xf]  ;;  %v8330_v43 = vld [vmem:[#allocation10 + $0x10c8] sm:$0xf0] }
 0x28d   :  { %5276 = vmatpush.bf16.msrb.mxu0 %v8013_v44  ;;  %v8170_v44 = vld [vmem:[#allocation10 + $0xf88] sm:$0xf0]  ;;  %v5050_v54 = vpop.f32.mrf.mxu2  ;;  %v8402_v24 = vld [vmem:[#allocation10 + $0x1158] sm:$0xf0]  ;;  %v9242_v41 = vld [vmem:[#allocation10 + $0x10a4] sm:$0xf] }
 0x28e   :  { %5289 = vmatpush.bf16.msrb.mxu1 %v8077_v63  ;;  %v9236_v63 = vld [vmem:[#allocation10 + $0x1074] sm:$0xf]  ;;  %v5063_v60 = vpop.f32.mrf.mxu3  ;;  %v8466_v37 = vld [vmem:[#allocation10 + $0x11d8] sm:$0xf0]  ;;  %v8405_v23 = vor.u32 %v9264_v2, %v8402_v24  ;;  %v8458_v45 = vld [vmem:[#allocation10 + $0x11c8] sm:$0xf0] }
 0x28f   :  { %5302 = vmatpush.bf16.msrb.mxu2 %v8141_v10  ;;  %v8290_v10 = vld [vmem:[#allocation10 + $0x1078] sm:$0xf0]  ;;  %v9244_v54 = vld [vmem:[#allocation10 + $0x10b4] sm:$0xf]  ;;  %v8250_v53 = vld [vmem:[#allocation10 + $0x1028] sm:$0xf0] }
 0x290   :  { %5315 = vmatpush.bf16.msrb.mxu3 %v8205_v48  ;;  %v8354_v48 = vld [vmem:[#allocation10 + $0x10f8] sm:$0xf0]  ;;  %v9260_v60 = vld [vmem:[#allocation10 + $0x1134] sm:$0xf]  ;;  %v8378_v9 = vld [vmem:[#allocation10 + $0x1128] sm:$0xf0] }
 0x291   :  { %5277 = vmatpush.bf16.msrb.mxu0 %v8005_v5  ;;  %v8173_v5 = vor.u32 %v9206_v27, %v8170_v44  ;;  %v9228_v27 = vld [vmem:[#allocation10 + $0x1034] sm:$0xf]  ;;  %v8258_v44 = vld [vmem:[#allocation10 + $0x1038] sm:$0xf0] }
 0x292   :  { %5290 = vmatpush.bf16.msrb.mxu1 %v8069_v58  ;;  %v8293_v58 = vor.u32 %v9236_v63, %v8290_v10  ;;  %v8450_v0 = vld [vmem:[#allocation10 + $0x11b8] sm:$0xf0]  ;;  %v8261_v12 = vor.u32 %v9228_v27, %v8258_v44  ;;  %v9272_v24 = vld [vmem:[#allocation10 + $0x1194] sm:$0xf] }
 0x293   :  { %5303 = vmatpush.bf16.msrb.mxu2 %v8133_v20  ;;  %v8357_v20 = vor.u32 %v9252_v47, %v8354_v48  ;;  %v8322_v47 = vld [vmem:[#allocation10 + $0x10b8] sm:$0xf0]  ;;  %v9276_v48 = vld [vmem:[#allocation10 + $0x11b4] sm:$0xf] }
 0x294   :  { %5316 = vmatpush.bf16.msrb.mxu3 %v8197_v62  ;;  %v9250_v62 = vld [vmem:[#allocation10 + $0x10e4] sm:$0xf]  ;;  %v8370_v2 = vld [vmem:[#allocation10 + $0x1118] sm:$0xf0]  ;;  %v9292_v44 = vld [vmem:[#allocation15 + $0x30] sm:$0xff] }
 0x295   :  { %5278 = vmatpush.bf16.msrb.mxu0 %v7997_v11  ;;  %v8349_v15 = vor.u32 %v9250_v62, %v8346_v18  ;;  %v9232_v11 = vld [vmem:[#allocation10 + $0x1054] sm:$0xf]  ;;  %v8442_v18 = vld [vmem:[#allocation10 + $0x11a8] sm:$0xf0]  ;;  %v9301_v27 = vld [vmem:[#allocation15 + $0x78] sm:$0xff] }
 0x296   :  { %5291 = vmatpush.bf16.msrb.mxu1 %v8061_v14  ;;  %v9248_v14 = vld [vmem:[#allocation10 + $0x10d4] sm:$0xf]  ;;  %v8277_v26 = vor.u32 %v9232_v11, %v8274_v42  ;;  %v8242_v11 = vld [vmem:[#allocation10 + $0x1018] sm:$0xf0] }
 0x297   :  { %5304 = vmatpush.bf16.msrb.mxu2 %v8125_v55  ;;  %v8477_v55 = vor.u32 %v9282_v32, %v8474_v4  ;;  %v8341_v49 = vor.u32 %v9248_v14, %v8338_v21  ;;  %v9240_v42 = vld [vmem:[#allocation10 + $0x1094] sm:$0xf] }
 0x298   :  { %5317 = vmatpush.bf16.msrb.mxu3 %v8189_v39  ;;  %v9280_v39 = vld [vmem:[#allocation10 + $0x11d4] sm:$0xf] }
 0x299   :  { %5279 = vmatpush.bf16.msrb.mxu0 %v7989_v6  ;;  %v9246_v6 = vld [vmem:[#allocation10 + $0x10c4] sm:$0xf]  ;;  %v8469_v25 = vor.u32 %v9280_v39, %v8466_v37  ;;  %v9256_v21 = vld [vmem:[#allocation10 + $0x1114] sm:$0xf]  ;;  %v8434_v39 = vld [vmem:[#allocation10 + $0x1198] sm:$0xf0] }
 0x29a   :  { %5292 = vmatpush.bf16.msrb.mxu1 %v8053_v59  ;;  %v9262_v59 = vld [vmem:[#allocation10 + $0x1144] sm:$0xf] }
 0x29b   :  { %5305 = vmatpush.bf16.msrb.mxu2 %v8117_v1 }
 0x29c   :  { %5318 = vmatpush.bf16.msrb.mxu3 %v8181_v17  ;;  %v8333_v17 = vor.u32 %v9246_v6, %v8330_v43  ;;  %v8437_v6 = vor.u32 %v9272_v24, %v8434_v39  ;;  %v9254_v43 = vld [vmem:[#allocation10 + $0x1104] sm:$0xf] }
 0x29d   :  { %5280 = vmatpush.bf16.msrb.mxu0 %v7981_v16  ;;  %v5074_v1 = vpop.f32.mrf.mxu0  ;;  %v8386_v16 = vld [vmem:[#allocation10 + $0x1138] sm:$0xf0] }
 0x29e   :  { %5293 = vmatpush.bf16.msrb.mxu1 %v8045_v61  ;;  %v5087_v52 = vpop.f32.mrf.mxu1  ;;  %v8389_v61 = vor.u32 %v9260_v60, %v8386_v16  ;;  %v9290_v16 = vld [vmem:[#allocation15 + $0x20] sm:$0xff] }
 0x29f   :  { %5306 = vmatpush.bf16.msrb.mxu2 %v8109_v38  ;;  %v9226_v38 = vld [vmem:[#allocation10 + $0x1024] sm:$0xf] }
 0x2a0   :  { %5319 = vmatpush.bf16.msrb.mxu3 %v8173_v5  ;;  %5281 = vmatmul.bf16.vlgmr.msrb.gmra.mxu0 %v9728_v28  ;;  %v8266_v28 = vld [vmem:[#allocation10 + $0x1048] sm:$0xf0]  ;;  %v8453_v5 = vor.u32 %v9276_v48, %v8450_v0  ;;  %v8253_v46 = vor.u32 %v9226_v38, %v8250_v53  ;;  %v9298_v0 = vld [vmem:[#allocation15 + $0x60] sm:$0xff]  ;;  %v9288_v53 = vld [vmem:[#allocation15 + $0x10] sm:$0xff] }
 0x2a1   :  { %5325 = vmatpush.bf16.msra.mxu0 %v8293_v58  ;;  %5294 = vmatmul.bf16.vlgmr.msrb.gmra.mxu1 %v9734_v30  ;;  %v9278_v30 = vld [vmem:[#allocation10 + $0x11c4] sm:$0xf]  ;;  %v8269_v13 = vor.u32 %v9230_v40, %v8266_v28  ;;  %v8234_v40 = vld [vmem:[#allocation10 + $0x1008] sm:$0xf0] }
 0x2a2   :  { %5338 = vmatpush.bf16.msra.mxu1 %v8357_v20  ;;  %5307 = vmatmul.bf16.vlgmr.msrb.gmra.mxu2 %v9732_v50  ;;  %v8394_v50 = vld [vmem:[#allocation10 + $0x1148] sm:$0xf0]  ;;  %v8461_v63 = vor.u32 %v9278_v30, %v8458_v45  ;;  %v9238_v28 = vld [vmem:[#allocation10 + $0x1084] sm:$0xf] }
 0x2a3   :  { %5351 = vmatpush.bf16.msra.mxu2 %v8421_v29  ;;  %5320 = vmatmul.bf16.vlgmr.msrb.gmra.mxu3 %v9736_v31  ;;  %v5075_v31 = vadd.f32 %v5074_v1, %v9851_v22  ;;  %v8397_v7 = vor.u32 %v9262_v59, %v8394_v50  ;;  %v8325_v22 = vor.u32 %v9244_v54, %v8322_v47  ;;  %v8314_v20 = vld [vmem:[#allocation10 + $0x10a8] sm:$0xf0]  ;;  %v9258_v29 = vld [vmem:[#allocation10 + $0x1124] sm:$0xf]  ;;  %v9300_v54 = vld [vmem:[#allocation15 + $0x70] sm:$0xff] }
 0x2a4   :  { %5364 = vmatpush.bf16.msra.mxu3 %v8485_v36  ;;  %v9274_v36 = vld [vmem:[#allocation10 + $0x11a4] sm:$0xf]  ;;  %v8362_v59 = vld [vmem:[#allocation10 + $0x1108] sm:$0xf0] }
 0x2a5   :  { %5326 = vmatpush.bf16.msra.mxu0 %v8285_v57  ;;  %v5088_v10 = vadd.f32 %v5087_v52, %v5075_v31  ;;  %v5100_v58 = vpop.f32.mrf.mxu2  ;;  %v5076_v51 = vpop.f32.mrf.mxu0  ;;  %v8317_v57 = vor.u32 %v9242_v41, %v8314_v20  ;;  %v8445_v14 = vor.u32 %v9274_v36, %v8442_v18  ;;  %v9270_v1 = vld [vmem:[#allocation10 + $0x1184] sm:$0xf]  ;;  %v8426_v30 = vld [vmem:[#allocation10 + $0x1188] sm:$0xf0]  ;;  %v8365_v52 = vor.u32 %v9254_v43, %v8362_v59 }
 0x2a6   :  { %5339 = vmatpush.bf16.msra.mxu1 %v8349_v15  ;;  %v5113_v62 = vpop.f32.mrf.mxu3  ;;  %v5089_v32 = vpop.f32.mrf.mxu1  ;;  %v8381_v15 = vor.u32 %v9258_v29, %v8378_v9  ;;  %v9904_v41 = vld [vmem:[#allocation27_spill] sm:$0xff]  ;;  %v9906_v36 = vld [vmem:[#allocation29_spill] sm:$0xff] }
 0x2a7   :  { %5352 = vmatpush.bf16.msra.mxu2 %v8413_v33  ;;  %v5101_v56 = vadd.f32 %v5100_v58, %v5088_v10  ;;  %v9224_v33 = vld [vmem:[#allocation10 + $0x1014] sm:$0xf]  ;;  %v9299_v10 = vld [vmem:[#allocation15 + $0x68] sm:$0xff]  ;;  %v5422_v58 = vld.sshfl [vmem:[#allocation1 + $0x8] sm:$0xff pattern:$0x73625140] }
 0x2a8   :  { %5365 = vmatpush.bf16.msra.mxu3 %v8477_v55  ;;  %v8306_v55 = vld [vmem:[#allocation10 + $0x1098] sm:$0xf0]  ;;  %v8245_v37 = vor.u32 %v9224_v33, %v8242_v11  ;;  %v9296_v9 = vld [vmem:[#allocation15 + $0x50] sm:$0xff]  ;;  %v5434_v18 = vsel %vm5380_vm1, %v9906_v36, 0.0  ;;  %v9287_v33 = vld [vmem:[#allocation15 + $0x8] sm:$0xff] }
 0x2a9   :  { %5327 = vmatpush.bf16.msra.mxu0 %v8277_v26  ;;  %v5114_v4 = vadd.f32 %v5113_v62, %v5101_v56  ;;  %v8309_v26 = vor.u32 %v9240_v42, %v8306_v55  ;;  %v9905_v56 = vld [vmem:[#allocation26_spill] sm:$0xff] }
 0x2aa   :  { %5340 = vmatpush.bf16.msra.mxu1 %v8341_v49  ;;  %v8373_v49 = vor.u32 %v9256_v21, %v8370_v2  ;;  %v5442_v62 = vsel %vm5380_vm1, %v9905_v56, 0.0  ;;  %v5425_v11 = vld.sshfl [vmem:[#allocation1 + $0x28] sm:$0xff pattern:$0x73625140] }
 0x2ab   :  { %5353 = vmatpush.bf16.msra.mxu2 %v8405_v23  ;;  %v9222_v23 = vld [vmem:[#allocation10 + $0x1004] sm:$0xf]  ;;  %v5446_v39 = vsel %vm5380_vm1, %v5425_v11, 0.0  ;;  %v9303_v11 = vld [vmem:[#allocation15 + $0x88] sm:$0xff] }
 0x2ac   :  { %5366 = vmatpush.bf16.msra.mxu3 %v8469_v25  ;;  %v8298_v25 = vld [vmem:[#allocation10 + $0x1088] sm:$0xf0]  ;;  %v8237_v31 = vor.u32 %v9222_v23, %v8234_v40  ;;  %v9314_v36 = vld [vmem:[#allocation15 + $0xe0] sm:$0xff] }
 0x2ad   :  { %5328 = vmatpush.bf16.msra.mxu0 %v8269_v13  ;;  %v5102_v50 = vpop.f32.mrf.mxu2  ;;  %v8301_v13 = vor.u32 %v9238_v28, %v8298_v25 }
 0x2ae   :  { %5341 = vmatpush.bf16.msra.mxu1 %v8333_v17  ;;  %v5115_v45 = vpop.f32.mrf.mxu3  ;;  %v8429_v17 = vor.u32 %v9270_v1, %v8426_v30 }
 0x2af   :  { %5354 = vmatpush.bf16.msra.mxu2 %v8397_v7  ;;  %v9293_v7 = vld [vmem:[#allocation15 + $0x38] sm:$0xff] }
 0x2b0   :  { %5367 = vmatpush.bf16.msra.mxu3 %v8461_v63  ;;  %v9291_v63 = vld [vmem:[#allocation15 + $0x28] sm:$0xff] }
 0x2b1   :  { %5329 = vmatpush.bf16.msra.mxu0 %v8261_v12 }
 0x2b2   :  { %5342 = vmatpush.bf16.msra.mxu1 %v8325_v22 }
 0x2b3   :  { %5355 = vmatpush.bf16.msra.mxu2 %v8389_v61 }
 0x2b4   :  { %5368 = vmatpush.bf16.msra.mxu3 %v8453_v5  ;;  %v5435_v5 = vsel %vm5380_vm1, %v9904_v41, 0.0 }
 0x2b5   :  { %5330 = vmatpush.bf16.msra.mxu0 %v8253_v46  ;;  %v5424_v46 = vld.sshfl [vmem:[#allocation1 + $0x20] sm:$0xff pattern:$0x73625140]  ;;  %v5436_v32 = vadd.f32 %v5435_v5, %v5434_v18 }
 0x2b6   :  { %5343 = vmatpush.bf16.msra.mxu1 %v8317_v57  ;;  %v5439_v21 = vsel %vm5380_vm1, %v5424_v46, 0.0  ;;  %v9305_v46 = vld [vmem:[#allocation15 + $0x98] sm:$0xff] }
 0x2b7   :  { %5356 = vmatpush.bf16.msra.mxu2 %v8381_v15  ;;  %v5444_v15 = vsel %vm5380_vm1, %v5422_v58, 0.0  ;;  %v9307_v58 = vld [vmem:[#allocation15 + $0xa8] sm:$0xff] }
 0x2b8   :  { %5369 = vmatpush.bf16.msra.mxu3 %v8445_v14  ;;  %v9295_v14 = vld [vmem:[#allocation15 + $0x48] sm:$0xff] }
 0x2b9   :  { %5331 = vmatpush.bf16.msra.mxu0 %v8245_v37 }
 0x2ba   :  { %5344 = vmatpush.bf16.msra.mxu1 %v8309_v26  ;;  %v9286_v26 = vld [vmem:[#allocation15] sm:$0xff] }
 0x2bb   :  { %5357 = vmatpush.bf16.msra.mxu2 %v8373_v49  ;;  %v9294_v49 = vld [vmem:[#allocation15 + $0x40] sm:$0xff] }
 0x2bc   :  { %5370 = vmatpush.bf16.msra.mxu3 %v8437_v6 }
 0x2bd   :  { %5332 = vmatpush.bf16.msra.mxu0 %v8237_v31  ;;  %v5126_v47 = vpop.f32.mrf.mxu0 }
 0x2be   :  { %5345 = vmatpush.bf16.msra.mxu1 %v8301_v13  ;;  %v5127_v60 = vadd.f32 %v5126_v47, %v5114_v4  ;;  %v5139_v48 = vpop.f32.mrf.mxu1  ;;  %v9907_v4 = vld [vmem:[#allocation28_spill] sm:$0xff] }
 0x2bf   :  { %5358 = vmatpush.bf16.msra.mxu2 %v8365_v52  ;;  %v5441_v57 = vsel %vm5380_vm1, %v9907_v4, 0.0 }
 0x2c0   :  { %5371 = vmatpush.bf16.msra.mxu3 %v8429_v17  ;;  %5333 = vmatmul.bf16.vlgmr.msra.gmra.mxu0 %v9751_v19  ;;  %v5140_v12 = vadd.f32 %v5139_v48, %v5127_v60  ;;  %v9289_v19 = vld [vmem:[#allocation15 + $0x18] sm:$0xff]  ;;  %v5443_v42 = vadd.f32 %v5442_v62, %v5441_v57  ;;  %v9306_v62 = vld [vmem:[#allocation15 + $0xa0] sm:$0xff]  ;;  %v9304_v57 = vld [vmem:[#allocation15 + $0x90] sm:$0xff] }
 0x2c1   :  { %5346 = vmatmul.bf16.vlgmr.msra.gmra.mxu1 %v9755_v3  ;;  %v9297_v3 = vld [vmem:[#allocation15 + $0x58] sm:$0xff] }
 0x2c2   :  { %5359 = vmatmul.bf16.vlgmr.msra.gmra.mxu2 %v9753_v34  ;;  %v5445_v2 = vadd.f32 %v5444_v15, %v5443_v42  ;;  %v9312_v15 = vld [vmem:[#allocation15 + $0xd0] sm:$0xff]  ;;  %v9311_v42 = vld [vmem:[#allocation15 + $0xc8] sm:$0xff] }
 0x2c3   :  { %5751 = vmatpush.bf16.msrb.mxu2 %v9293_v7  ;;  %5372 = vmatmul.bf16.vlgmr.msra.gmra.mxu3 %v9746_v35  ;;  %v5421_v35 = vld.sshfl [vmem:[#allocation1] sm:$0xff pattern:$0x73625140] }
 0x2c4   :  { %5764 = vmatpush.bf16.msrb.mxu3 %v9301_v27  ;;  %v5437_v51 = vsel %vm5380_vm1, %v5421_v35, 0.0  ;;  %v5447_v40 = vadd.f32 %v5446_v39, %v5445_v2  ;;  %v9302_v2 = vld [vmem:[#allocation15 + $0x80] sm:$0xff] }
 0x2c5   :  { %v5152_v22 = vpop.f32.mrf.mxu2  ;;  %v5128_v38 = vpop.f32.mrf.mxu0  ;;  %v5438_v55 = vadd.f32 %v5437_v51, %v5436_v32  ;;  %v9313_v32 = vld [vmem:[#allocation15 + $0xd8] sm:$0xff] }
 0x2c6   :  { %v5153_v34 = vadd.f32 %v5152_v22, %v5140_v12  ;;  %v5165_v61 = vpop.f32.mrf.mxu3  ;;  %v5141_v20 = vpop.f32.mrf.mxu1  ;;  %v5459_v6 = vpack.c.bf16 %v5447_v40, %v5447_v40  ;;  %v9309_v12 = vld [vmem:[#allocation15 + $0xb8] sm:$0xff]  ;;  %v9308_v38 = vld [vmem:[#allocation15 + $0xb0] sm:$0xff] }
 0x2c7   :  { %5752 = vmatpush.bf16.msrb.mxu2 %v9292_v44  ;;  %v5440_v23 = vadd.f32 %v5439_v21, %v5438_v55  ;;  %5629 = vmatpush.bf16.msrb.mxu0 %v9309_v12  ;;  %v9315_v20 = vld [vmem:[#allocation15 + $0xe8] sm:$0xff] }
 0x2c8   :  { %5765 = vmatpush.bf16.msrb.mxu3 %v9300_v54  ;;  %v5166_v29 = vadd.f32 %v5165_v61, %v5153_v34 }
 0x2c9   :  { %v5458_v28 = vpack.c.bf16 %v5440_v23, %v5440_v23 }
 0x2cb   :  { %5753 = vmatpush.bf16.msrb.mxu2 %v9291_v63  ;;  %5630 = vmatpush.bf16.msrb.mxu0 %v9308_v38 }
 0x2cc   :  { %5766 = vmatpush.bf16.msrb.mxu3 %v9299_v10 }
 0x2cd   :  { %v5154_v24 = vpop.f32.mrf.mxu2 }
 0x2ce   :  { %v5167_v37 = vpop.f32.mrf.mxu3  ;;  %v9310_v24 = vld [vmem:[#allocation15 + $0xc0] sm:$0xff] }
 0x2cf   :  { %5754 = vmatpush.bf16.msrb.mxu2 %v9290_v16  ;;  %5631 = vmatpush.bf16.msrb.mxu0 %v9307_v58 }
 0x2d0   :  { %5767 = vmatpush.bf16.msrb.mxu3 %v9298_v0 }
 0x2d3   :  { %5755 = vmatpush.bf16.msrb.mxu2 %v9289_v19  ;;  %v9317_v19 = vld [vmem:[#allocation15 + $0xf8] sm:$0xff]  ;;  %5632 = vmatpush.bf16.msrb.mxu0 %v9306_v62 }
 0x2d4   :  { %5768 = vmatpush.bf16.msrb.mxu3 %v9297_v3  ;;  %v9544_v3 = vmov 0.0   ;;  %5642 = vmatpush.bf16.msrb.mxu1 %v9317_v19 }
 0x2d5   :  { %134 = vst [vmem:[#allocation3] sm:$0xf] %v9544_v3 }
 0x2d7   :  { %5756 = vmatpush.bf16.msrb.mxu2 %v9288_v53  ;;  %v9316_v53 = vld [vmem:[#allocation15 + $0xf0] sm:$0xff]  ;;  %5633 = vmatpush.bf16.msrb.mxu0 %v9305_v46 }
 0x2d8   :  { %5769 = vmatpush.bf16.msrb.mxu3 %v9296_v9  ;;  %5643 = vmatpush.bf16.msrb.mxu1 %v9316_v53 }
 0x2db   :  { %5757 = vmatpush.bf16.msrb.mxu2 %v9287_v33  ;;  %5634 = vmatpush.bf16.msrb.mxu0 %v9304_v57 }
 0x2dc   :  { %5770 = vmatpush.bf16.msrb.mxu3 %v9295_v14  ;;  %5644 = vmatpush.bf16.msrb.mxu1 %v9315_v20 }
 0x2dd   :  { %v5178_v25 = vpop.f32.mrf.mxu0 }
 0x2de   :  { %v5179_v43 = vadd.f32 %v5178_v25, %v5166_v29  ;;  %v5191_v59 = vpop.f32.mrf.mxu1  ;;  %v5449_v25 = vld [vmem:[#allocation13] sm:$0x3] }
 0x2df   :  { %5758 = vmatpush.bf16.msrb.mxu2 %v9286_v26  ;;  %5635 = vmatpush.bf16.msrb.mxu0 %v9303_v11 }
 0x2e0   :  { %5771 = vmatpush.bf16.msrb.mxu3 %v9294_v49  ;;  %v5192_v50 = vadd.f32 %v5191_v59, %v5179_v43  ;;  %5645 = vmatpush.bf16.msrb.mxu1 %v9314_v36  ;;  %v897_v43 = vld [vmem:[#allocation3] sm:$0xf] }
 0x2e2   :  { %5759 = vmatmul.bf16.vlgmr.msrb.gmra.mxu2 %v5458_v28 }
 0x2e3   :  { %5772 = vmatmul.bf16.vlgmr.msrb.gmra.mxu3 %v5459_v6  ;;  %5636 = vmatpush.bf16.msrb.mxu0 %v9302_v2 }
 0x2e4   :  { %5646 = vmatpush.bf16.msrb.mxu1 %v9313_v32 }
 0x2e5   :  { %v5204_v1 = vpop.f32.mrf.mxu2  ;;  %v5180_v31 = vpop.f32.mrf.mxu0 }
 0x2e6   :  { %v5205_v30 = vadd.f32 %v5204_v1, %v5192_v50  ;;  %v5217_v45 = vpop.f32.mrf.mxu3  ;;  %v5193_v13 = vpop.f32.mrf.mxu1  ;;  %v5452_v1 = vperm.slane %v5449_v25, 1 }
 0x2e7   :  { %v5451_v13 = vperm.slane %v5449_v25, 0 }
 0x2e8   :  { %v5218_v52 = vadd.f32 %v5217_v45, %v5205_v30  ;;  %5647 = vmatpush.bf16.msrb.mxu1 %v9312_v15 }
 0x2ec   :  { %5648 = vmatpush.bf16.msrb.mxu1 %v9311_v42 }
 0x2ed   :  { %v5206_v17 = vpop.f32.mrf.mxu2 }
 0x2ee   :  { %v5219_v7 = vpop.f32.mrf.mxu3 }
 0x2f0   :  { %5649 = vmatpush.bf16.msrb.mxu1 %v9310_v24 }
 0x2fd   :  { %v5230_v27 = vpop.f32.mrf.mxu0 }
 0x2fe   :  { %v5243_v44 = vpop.f32.mrf.mxu1  ;;  %v5231_v22 = vadd.f32 %v5230_v27, %v5218_v52  ;;  %v5453_v52 = vrot.slane %v5452_v1, 6 }
 0x300   :  { %v5244_v5 = vadd.f32 %v5243_v44, %v5231_v22  ;;  %v5454_v17 = vsel %vm5380_vm1, %v5451_v13, %v5453_v52 }
 0x305   :  { %v5256_v54 = vpop.f32.mrf.mxu2  ;;  %v5232_v10 = vpop.f32.mrf.mxu0 }
 0x306   :  { %v5269_v63 = vpop.f32.mrf.mxu3  ;;  %v5245_v47 = vpop.f32.mrf.mxu1  ;;  %v5257_v29 = vadd.f32 %v5256_v54, %v5244_v5 }
 0x308   :  { %v5270_v18 = vadd.f32 %v5269_v63, %v5257_v29 }
 0x30d   :  { %v5258_v60 = vpop.f32.mrf.mxu2 }
 0x30e   :  { %v5271_v16 = vpop.f32.mrf.mxu3 }
 0x31d   :  { %v5282_v48 = vpop.f32.mrf.mxu0 }
 0x31e   :  { %v5295_v0 = vpop.f32.mrf.mxu1  ;;  %v5283_v51 = vadd.f32 %v5282_v48, %v5270_v18 }
 0x320   :  { %v5296_v4 = vadd.f32 %v5295_v0, %v5283_v51 }
 0x325   :  { %v5308_v34 = vpop.f32.mrf.mxu2  ;;  %v5284_v35 = vpop.f32.mrf.mxu0 }
 0x326   :  { %v5321_v61 = vpop.f32.mrf.mxu3  ;;  %v5297_v41 = vpop.f32.mrf.mxu1  ;;  %v5309_v33 = vadd.f32 %v5308_v34, %v5296_v4 }
 0x328   :  { %v5322_v14 = vadd.f32 %v5321_v61, %v5309_v33 }
 0x32d   :  { %v5310_v9 = vpop.f32.mrf.mxu2 }
 0x32e   :  { %v5323_v56 = vpop.f32.mrf.mxu3 }
 0x33d   :  { %v5334_v55 = vpop.f32.mrf.mxu0 }
 0x33e   :  { %v5347_v21 = vpop.f32.mrf.mxu1  ;;  %v5335_v39 = vadd.f32 %v5334_v55, %v5322_v14 }
 0x340   :  { %v5348_v37 = vadd.f32 %v5347_v21, %v5335_v39 }
 0x345   :  { %v5360_v26 = vpop.f32.mrf.mxu2  ;;  %v5336_v40 = vpop.f32.mrf.mxu0 }
 0x346   :  { %v5361_v49 = vadd.f32 %v5360_v26, %v5348_v37  ;;  %v5373_v23 = vpop.f32.mrf.mxu3  ;;  %v5349_v28 = vpop.f32.mrf.mxu1 }
 0x348   :  { %v5374_v6 = vadd.f32 %v5373_v23, %v5361_v49 }
 0x34a   :  { %v5379_v59 = vrot.slane %v5374_v6, 6 }
 0x34c   :  { %v5381_v50 = vsel %vm5380_vm1, %v9831_v8, %v5379_v59 }
 0x34d   :  { %v5383_v30 = vadd.f32 %v5381_v50, %v897_v43  ;;  %v5362_v45 = vpop.f32.mrf.mxu2 }
 0x34e   :  { %v5375_v31 = vpop.f32.mrf.mxu3 }
 0x34f   :  { %5384 = vst [vmem:[#allocation3] sm:$0xf] %v5383_v30 }
 0x356   :  { %v5448_v7 = vld [vmem:[#allocation3] sm:$0xf] }
 0x357   :  { %v5456_v27 = vadd.f32 %v5454_v17, %v5448_v7 }
 0x359   :  { %v5457_v44 = vmax.f32 %v5456_v27, 0.0 }
 0x35b   :  { %5493 = vst [vmem:[#allocation1] ss:$4 sm:$0xff] %v5457_v44 }
 0x362   :  { %v5494_v63 = vld.sshfl [vmem:[#allocation1] sm:$0xff pattern:$0x73625140]  ;;  %v5495_v10 = vld.sshfl [vmem:[#allocation1 + $0x8] sm:$0xff pattern:$0x73625140] }
 0x363   :  { %v5498_v60 = vpack.c.bf16 %v5494_v63, %v5494_v63  ;;  %v5499_v16 = vpack.c.bf16 %v5495_v10, %v5495_v10 }
 0x365   :  { %v5760_v54 = vpop.f32.mrf.mxu2  ;;  %5637 = vmatmul.bf16.vlgmr.msrb.gmra.mxu0 %v5498_v60  ;;  %5650 = vmatmul.bf16.vlgmr.msrb.gmra.mxu1 %v5499_v16 }
 0x366   :  { %v5773_v47 = vpop.f32.mrf.mxu3 }
 0x36d   :  { %v5762_v8 = vpop.f32.mrf.mxu2 }
 0x36e   :  { %v5775_v48 = vpop.f32.mrf.mxu3 }
 0x3e2   :  { %v5638_v0 = vpop.f32.mrf.mxu0  ;;  %v5651_v12 = vpop.f32.mrf.mxu1 }
 0x3e3   :  { %v5652_v19 = vadd.f32 %v5651_v12, %v5638_v0 }
 0x3e5   :  { %v5761_v3 = vadd.f32 %v5760_v54, %v5652_v19 }
 0x3e7   :  { %v5774_v22 = vadd.f32 %v5773_v47, %v5761_v3 }
 0x3e9   :  { %5777 = vst [vmem:[#allocation16] sm:$0x3] %v5774_v22 }
 0x3ea   :  { %v5640_v34 = vpop.f32.mrf.mxu0  ;;  %v5653_v61 = vpop.f32.mrf.mxu1  ;;  %5788 = dma.vmem_to_hbm [thread:$0]  %s5784_s6, 32, %s5786_s1, [#allocation6]  }
 0x3eb   :  { %9531 = dma.done.wait [#allocation6], 32  }
 0x3ec   :  { %9532 = vsyncadd [#allocation6], 4294967264 }
 0x3ed   :  { %5793 = vsyncpa [#allocation5], 1 }
 0x3ee   :  { %5794 = vsyncpa [#allocation8], 1 }
 0x3ef   :  { %5795 = vsyncpa [#allocation11], 1 }
 0x3f0   :  { %5796 = vsyncpa [#allocation14], 1 }
 0x3f1   :  { %5797 = vsyncpa [#allocation6], 1 }

</bundles_post_ra>
